<compile_context>
chip_gen: v6e
topology: v6e:2x2x1
jax: 0.10.0
libtpu: 0.0.40
codegen_flags: <defaults>
</compile_context>

<pallas_src>
from functools import partial

import jax
import jax.numpy as jnp
from jax import lax
from jax.experimental import pallas as pl
from jax.experimental.pallas import tpu as pltpu


# ----------------------------------------------------------------------------
# In-kernel building blocks (channels-first values: (C, H*W), positions on lanes)
# ----------------------------------------------------------------------------
def _conv3x3(act, w_ref, b_ref, H, W):
    """3x3 conv, pad=1, stride=1.

    act   : (cin, H*W) f32 value (flattened row-major spatial on the lane axis).
    w_ref : (9, cout, cin) tap-major, already-transposed weights.
    b_ref : (cout, 1) bias.
    Returns (cout, H*W) f32 pre-activation.

    Each tap is a lane rotation (XLU) + static edge mask (VPU select) + one
    (cout,cin)x(cin,HW) bf16 matmul accumulated in f32 — no padded scratch,
    no slice/reshape relayouts.
    """
    HW = H * W
    cout = w_ref.shape[1]
    pos = lax.broadcasted_iota(jnp.int32, (1, HW), 1)     # flattened position
    col = pos % W                                         # column within the row

    acc = jnp.zeros((cout, HW), jnp.float32)
    for k in range(9):
        dy, dx = k // 3 - 1, k % 3 - 1
        off = dy * W + dx                                  # shifted[p] = act[p + off]
        shifted = act if off == 0 else pltpu.roll(act, shift=(-off) % HW, axis=1)

        conds = []
        if dy == -1:
            conds.append(pos >= W)                         # source row >= 0
        if dy == 1:
            conds.append(pos < (H - 1) * W)                # source row <= H-1
        if dx == -1:
            conds.append(col >= 1)                         # source col >= 0
        if dx == 1:
            conds.append(col <= W - 2)                     # source col <= W-1
        if conds:
            m = conds[0]
            for c in conds[1:]:
                m = jnp.logical_and(m, c)
            shifted = jnp.where(m, shifted, 0.0)

        acc = acc + jnp.dot(w_ref[k].astype(jnp.bfloat16),
                            shifted.astype(jnp.bfloat16),
                            preferred_element_type=jnp.float32)
    return acc + b_ref[...]


def _classifier_tail(x, w1_ref, b1_ref, w2_ref, b2_ref, wfc_ref, bfc_ref, H, W):
    """resnet18 stand-in: conv(relu) -> conv(+residual, relu) -> GAP -> FC.
    x: (cin, H*W) f32.  Returns (2, 1) logits.  Everything stays on-chip."""
    h1 = jnp.maximum(_conv3x3(x, w1_ref, b1_ref, H, W), 0.0)
    h2 = jnp.maximum(_conv3x3(h1, w2_ref, b2_ref, H, W) + h1, 0.0)   # residual
    pooled = jnp.mean(h2, axis=1, keepdims=True)                     # (hid, 1)
    return (jnp.dot(wfc_ref[...].astype(jnp.bfloat16),
                    pooled.astype(jnp.bfloat16),
                    preferred_element_type=jnp.float32)
            + bfc_ref[...])                                          # (2, 1)


# ----------------------------------------------------------------------------
# Fused Pallas kernels
# ----------------------------------------------------------------------------
def _rec_autothresh_kernel(gin_ref,
                           gw1_ref, gb1_ref, gw2_ref, gb2_ref,
                           aw1_ref, ab1_ref, aw2_ref, ab2_ref, awfc_ref, abfc_ref,
                           o_ref, *, H, W):
    """Fused reconstructer (Generator stand-in) + autothresholder classifier.
    The reconstructed image never leaves VMEM."""
    g1 = jnp.maximum(_conv3x3(gin_ref[...], gw1_ref, gb1_ref, H, W), 0.0)
    rec = jnp.tanh(_conv3x3(g1, gw2_ref, gb2_ref, H, W))             # (3, H*W)
    o_ref[...] = _classifier_tail(rec, aw1_ref, ab1_ref, aw2_ref, ab2_ref,
                                  awfc_ref, abfc_ref, H, W)


def _classifier_kernel(x_ref, w1_ref, b1_ref, w2_ref, b2_ref, wfc_ref, bfc_ref,
                       o_ref, *, H, W):
    """Fused corrector classifier (resnet18 stand-in) on the raw image."""
    o_ref[...] = _classifier_tail(x_ref[...], w1_ref, b1_ref, w2_ref, b2_ref,
                                  wfc_ref, bfc_ref, H, W)


# ----------------------------------------------------------------------------
# pallas_call wrappers (whole arrays in VMEM; no grid -- working set << VMEM)
# ----------------------------------------------------------------------------
def rec_autothresh_logits(g_in_cf, params, H, W):
    return pl.pallas_call(
        partial(_rec_autothresh_kernel, H=H, W=W),
        out_shape=jax.ShapeDtypeStruct((2, 1), jnp.float32),
    )(g_in_cf,
      params["g_w1"], params["g_b1"], params["g_w2"], params["g_b2"],
      params["at"]["w1"], params["at"]["b1"],
      params["at"]["w2"], params["at"]["b2"],
      params["at"]["wfc_t"], params["at"]["bfc"])


def classifier_logits(x_cf, p, H, W):
    return pl.pallas_call(
        partial(_classifier_kernel, H=H, W=W),
        out_shape=jax.ShapeDtypeStruct((2, 1), jnp.float32),
    )(x_cf, p["w1"], p["b1"], p["w2"], p["b2"], p["wfc_t"], p["bfc"])


# ----------------------------------------------------------------------------
# Parameters (deterministic in-script init; no checkpoint loading)
# Conv weights stored tap-major and pre-transposed: (9, cout, cin);
# biases as (cout, 1); FC as (2, hid) / (2, 1) -- the layouts the kernels use.
# ----------------------------------------------------------------------------
def init_params(key, cin=3, cfeat=8, hid=16):
    ks = jax.random.split(key, 16)

    def nrm(k, shape, s=0.05):
        return (s * jax.random.normal(k, shape)).astype(jnp.float32)

    def clf(k0, k1, k2, k3, k4, k5):
        return {
            "w1": nrm(k0, (9, hid, cin)),  "b1": nrm(k1, (hid, 1)),
            "w2": nrm(k2, (9, hid, hid)),  "b2": nrm(k3, (hid, 1)),
            "wfc_t": nrm(k4, (2, hid)),    "bfc": nrm(k5, (2, 1)),
        }

    return {
        "g_w1": nrm(ks[0], (9, hid, cin + cfeat)), "g_b1": nrm(ks[1], (hid, 1)),
        "g_w2": nrm(ks[2], (9, cin, hid)),         "g_b2": nrm(ks[3], (cin, 1)),
        "at": clf(*ks[4:10]),
        "cor": clf(*ks[10:16]),
    }


# ----------------------------------------------------------------------------
# Inspector.forward -- single jitted function, all branching / RNG on device
# ----------------------------------------------------------------------------
@jax.jit
def inspector_forward(params, x_nchw, feat_nchw, pred_cls, rng_key):
    # batch=1 (the torch control flow requires scalar predicates).
    _, cimg, H, W = x_nchw.shape
    cfeat = feat_nchw.shape[1]
    # NCHW -> channels-first flattened (C, H*W): a plain reshape, no transpose.
    x_cf = x_nchw[0].reshape(cimg, H * W).astype(jnp.float32)        # (3, H*W)
    feat_cf = feat_nchw[0].reshape(cfeat, H * W).astype(jnp.float32) # (8, H*W)
    g_in = jnp.concatenate([x_cf, feat_cf], axis=0)                  # (11, H*W)

    # reconstructer + autothresholder fused in one Pallas kernel.
    pred = rec_autothresh_logits(g_in, params, H, W).reshape(2)      # (2,) logits
    pred_label = jnp.argmax(pred, axis=-1) == 0                      # bool scalar

    def _modify():
        # corrector classifier (only executed when pred_label is True).
        logits_cor = classifier_logits(x_cf, params["cor"], H, W).reshape(2)
        pred_cor = jax.nn.sigmoid(logits_cor)
        # TODO(synk): torch code's `.unsqueeze(1)` matmul shape quirk; implemented
        # as the intended row . softmax-column dot product yielding a scalar.
        sm = jax.nn.softmax(pred_cls, axis=-1).reshape(-1)
        score = jnp.dot(pred_cor, sm)

        # score > 0.5 branch (mirrors the torch arithmetic, incl. possible 1/0).
        t = pred_cls - jnp.sum(pred_cls) / 2
        t = jnp.sum(t) - t
        cls_det = 1.0 / t

        # TODO(synk): Python `random` replaced with jax.random so the whole
        # forward stays jittable and on device (RNG stream differs from torch).
        ku, ks_, ki = jax.random.split(rng_key, 3)
        coin = jax.random.uniform(ku)
        cls_rand = jnp.where(
            coin > 0.5,
            pred_cls * jax.random.uniform(ks_),
            pred_cls * jax.random.randint(ki, (), 2, 101).astype(jnp.float32))
        return jnp.where(score > 0.5, cls_det, cls_rand)

    new_pred_cls = lax.cond(pred_label, _modify, lambda: pred_cls)
    return new_pred_cls, pred_label


# ----------------------------------------------------------------------------
if __name__ == "__main__":
    key = jax.random.PRNGKey(0)
    kx, kf, kc, kp, kr = jax.random.split(key, 5)

    H = W = 16
    x = jax.random.normal(kx, (1, 3, H, W), jnp.float32)       # image, NCHW
    feat = jax.random.normal(kf, (1, 8, H, W), jnp.float32)    # features, NCHW
    pred_cls = jax.random.normal(kc, (1, 2), jnp.float32)      # classifier logits

    params = init_params(kp)

    out_pred_cls, pred_label = inspector_forward(params, x, feat, pred_cls, kr)
    jax.block_until_ready((out_pred_cls, pred_label))
    assert out_pred_cls.shape == pred_cls.shape
    assert pred_label.shape == () and pred_label.dtype == jnp.bool_
    print("KERNEL_OK")
</pallas_src>

<mosaic_0001>
module attributes {stable_mosaic.version = 11 : i64} {
  func.func @_rec_autothresh_kernel(%arg0: memref<11x256xf32, #tpu.memory_space<vmem>>, %arg1: memref<9x16x11xf32, #tpu.memory_space<vmem>>, %arg2: memref<16x1xf32, #tpu.memory_space<vmem>>, %arg3: memref<9x3x16xf32, #tpu.memory_space<vmem>>, %arg4: memref<3x1xf32, #tpu.memory_space<vmem>>, %arg5: memref<9x16x3xf32, #tpu.memory_space<vmem>>, %arg6: memref<16x1xf32, #tpu.memory_space<vmem>>, %arg7: memref<9x16x16xf32, #tpu.memory_space<vmem>>, %arg8: memref<16x1xf32, #tpu.memory_space<vmem>>, %arg9: memref<2x16xf32, #tpu.memory_space<vmem>>, %arg10: memref<2x1xf32, #tpu.memory_space<vmem>>, %arg11: memref<2x1xf32, #tpu.memory_space<vmem>>) attributes {dimension_semantics = [], scalar_prefetch = 0 : i64, scratch_operands = 0 : i64, tpu.core_type = #tpu.core_type<tc>} {
    %c0 = arith.constant 0 : index
    %c0_0 = arith.constant 0 : index
    %0 = vector.load %arg0[%c0, %c0_0] : memref<11x256xf32, #tpu.memory_space<vmem>>, vector<11x256xf32>
    %1 = tpu.iota {dimensions = array<i32: 1>} : vector<1x256xi32>
    %c16_i32 = arith.constant 16 : i32
    %c0_i32 = arith.constant 0 : i32
    %2 = arith.cmpi eq, %c16_i32, %c0_i32 : i32
    %c1_i32 = arith.constant 1 : i32
    %3 = arith.select %2, %c1_i32, %c16_i32 : i32
    %4 = vector.broadcast %3 : i32 to vector<1x256xi32>
    %5 = arith.remsi %1, %4 : vector<1x256xi32>
    %c0_i32_1 = arith.constant 0 : i32
    %6 = vector.broadcast %c0_i32_1 : i32 to vector<1x256xi32>
    %7 = arith.cmpi ne, %5, %6 : vector<1x256xi32>
    %c0_i32_2 = arith.constant 0 : i32
    %8 = vector.broadcast %c0_i32_2 : i32 to vector<1x256xi32>
    %9 = arith.cmpi slt, %5, %8 : vector<1x256xi32>
    %c0_i32_3 = arith.constant 0 : i32
    %10 = arith.cmpi slt, %3, %c0_i32_3 : i32
    %11 = vector.broadcast %10 : i1 to vector<1x256xi1>
    %12 = vector.broadcast %11 : vector<1x256xi1> to vector<1x256xi1>
    %13 = arith.xori %9, %12 : vector<1x256xi1>
    %14 = arith.andi %13, %7 : vector<1x256xi1>
    %15 = vector.broadcast %3 : i32 to vector<1x256xi32>
    %16 = arith.addi %5, %15 : vector<1x256xi32>
    %17 = arith.select %14, %16, %5 : vector<1x256xi1>, vector<1x256xi32>
    %cst = arith.constant 0.000000e+00 : f32
    %18 = vector.broadcast %cst : f32 to vector<16x256xf32>
    %c17_i32 = arith.constant 17 : i32
    %19 = tpu.dynamic_rotate %0 by %c17_i32 dim 1 : vector<11x256xf32>, i32 -> vector<11x256xf32>
    %c16_i32_4 = arith.constant 16 : i32
    %20 = vector.broadcast %c16_i32_4 : i32 to vector<1x256xi32>
    %21 = arith.cmpi sge, %1, %20 : vector<1x256xi32>
    %c1_i32_5 = arith.constant 1 : i32
    %22 = vector.broadcast %c1_i32_5 : i32 to vector<1x256xi32>
    %23 = arith.cmpi sge, %17, %22 : vector<1x256xi32>
    %24 = arith.andi %21, %23 : vector<1x256xi1>
    %cst_6 = arith.constant 0.000000e+00 : f32
    %25 = vector.shape_cast %24 : vector<1x256xi1> to vector<1x256xi1>
    %26 = vector.broadcast %25 : vector<1x256xi1> to vector<11x256xi1>
    %27 = vector.broadcast %cst_6 : f32 to vector<11x256xf32>
    %28 = arith.select %26, %19, %27 : vector<11x256xi1>, vector<11x256xf32>
    %c0_7 = arith.constant 0 : index
    %c0_8 = arith.constant 0 : index
    %c0_9 = arith.constant 0 : index
    %29 = vector.load %arg1[%c0_7, %c0_8, %c0_9] : memref<9x16x11xf32, #tpu.memory_space<vmem>>, vector<1x16x11xf32>
    %30 = vector.shape_cast %29 : vector<1x16x11xf32> to vector<16x11xf32>
    %31 = arith.truncf %30 : vector<16x11xf32> to vector<16x11xbf16>
    %32 = arith.truncf %28 : vector<11x256xf32> to vector<11x256xbf16>
    %cst_10 = arith.constant dense<0.000000e+00> : vector<16x256xf32>
    %33 = tpu.matmul %31, %32, %cst_10 {dimension_numbers = #tpu.dot_dimension_numbers<[1], [0], [0], [1], [0, 0, 1, 1], [], []>} : vector<16x11xbf16>, vector<11x256xbf16>, vector<16x256xf32> -> vector<16x256xf32>
    %34 = arith.addf %18, %33 : vector<16x256xf32>
    %c16_i32_11 = arith.constant 16 : i32
    %35 = tpu.dynamic_rotate %0 by %c16_i32_11 dim 1 : vector<11x256xf32>, i32 -> vector<11x256xf32>
    %c16_i32_12 = arith.constant 16 : i32
    %36 = vector.broadcast %c16_i32_12 : i32 to vector<1x256xi32>
    %37 = arith.cmpi sge, %1, %36 : vector<1x256xi32>
    %cst_13 = arith.constant 0.000000e+00 : f32
    %38 = vector.shape_cast %37 : vector<1x256xi1> to vector<1x256xi1>
    %39 = vector.broadcast %38 : vector<1x256xi1> to vector<11x256xi1>
    %40 = vector.broadcast %cst_13 : f32 to vector<11x256xf32>
    %41 = arith.select %39, %35, %40 : vector<11x256xi1>, vector<11x256xf32>
    %c1 = arith.constant 1 : index
    %c0_14 = arith.constant 0 : index
    %c0_15 = arith.constant 0 : index
    %42 = vector.load %arg1[%c1, %c0_14, %c0_15] : memref<9x16x11xf32, #tpu.memory_space<vmem>>, vector<1x16x11xf32>
    %43 = vector.shape_cast %42 : vector<1x16x11xf32> to vector<16x11xf32>
    %44 = arith.truncf %43 : vector<16x11xf32> to vector<16x11xbf16>
    %45 = arith.truncf %41 : vector<11x256xf32> to vector<11x256xbf16>
    %cst_16 = arith.constant dense<0.000000e+00> : vector<16x256xf32>
    %46 = tpu.matmul %44, %45, %cst_16 {dimension_numbers = #tpu.dot_dimension_numbers<[1], [0], [0], [1], [0, 0, 1, 1], [], []>} : vector<16x11xbf16>, vector<11x256xbf16>, vector<16x256xf32> -> vector<16x256xf32>
    %47 = arith.addf %34, %46 : vector<16x256xf32>
    %c15_i32 = arith.constant 15 : i32
    %48 = tpu.dynamic_rotate %0 by %c15_i32 dim 1 : vector<11x256xf32>, i32 -> vector<11x256xf32>
    %c16_i32_17 = arith.constant 16 : i32
    %49 = vector.broadcast %c16_i32_17 : i32 to vector<1x256xi32>
    %50 = arith.cmpi sge, %1, %49 : vector<1x256xi32>
    %c14_i32 = arith.constant 14 : i32
    %51 = vector.broadcast %c14_i32 : i32 to vector<1x256xi32>
    %52 = arith.cmpi sle, %17, %51 : vector<1x256xi32>
    %53 = arith.andi %50, %52 : vector<1x256xi1>
    %cst_18 = arith.constant 0.000000e+00 : f32
    %54 = vector.shape_cast %53 : vector<1x256xi1> to vector<1x256xi1>
    %55 = vector.broadcast %54 : vector<1x256xi1> to vector<11x256xi1>
    %56 = vector.broadcast %cst_18 : f32 to vector<11x256xf32>
    %57 = arith.select %55, %48, %56 : vector<11x256xi1>, vector<11x256xf32>
    %c2 = arith.constant 2 : index
    %c0_19 = arith.constant 0 : index
    %c0_20 = arith.constant 0 : index
    %58 = vector.load %arg1[%c2, %c0_19, %c0_20] : memref<9x16x11xf32, #tpu.memory_space<vmem>>, vector<1x16x11xf32>
    %59 = vector.shape_cast %58 : vector<1x16x11xf32> to vector<16x11xf32>
    %60 = arith.truncf %59 : vector<16x11xf32> to vector<16x11xbf16>
    %61 = arith.truncf %57 : vector<11x256xf32> to vector<11x256xbf16>
    %cst_21 = arith.constant dense<0.000000e+00> : vector<16x256xf32>
    %62 = tpu.matmul %60, %61, %cst_21 {dimension_numbers = #tpu.dot_dimension_numbers<[1], [0], [0], [1], [0, 0, 1, 1], [], []>} : vector<16x11xbf16>, vector<11x256xbf16>, vector<16x256xf32> -> vector<16x256xf32>
    %63 = arith.addf %47, %62 : vector<16x256xf32>
    %c1_i32_22 = arith.constant 1 : i32
    %64 = tpu.dynamic_rotate %0 by %c1_i32_22 dim 1 : vector<11x256xf32>, i32 -> vector<11x256xf32>
    %c1_i32_23 = arith.constant 1 : i32
    %65 = vector.broadcast %c1_i32_23 : i32 to vector<1x256xi32>
    %66 = arith.cmpi sge, %17, %65 : vector<1x256xi32>
    %cst_24 = arith.constant 0.000000e+00 : f32
    %67 = vector.shape_cast %66 : vector<1x256xi1> to vector<1x256xi1>
    %68 = vector.broadcast %67 : vector<1x256xi1> to vector<11x256xi1>
    %69 = vector.broadcast %cst_24 : f32 to vector<11x256xf32>
    %70 = arith.select %68, %64, %69 : vector<11x256xi1>, vector<11x256xf32>
    %c3 = arith.constant 3 : index
    %c0_25 = arith.constant 0 : index
    %c0_26 = arith.constant 0 : index
    %71 = vector.load %arg1[%c3, %c0_25, %c0_26] : memref<9x16x11xf32, #tpu.memory_space<vmem>>, vector<1x16x11xf32>
    %72 = vector.shape_cast %71 : vector<1x16x11xf32> to vector<16x11xf32>
    %73 = arith.truncf %72 : vector<16x11xf32> to vector<16x11xbf16>
    %74 = arith.truncf %70 : vector<11x256xf32> to vector<11x256xbf16>
    %cst_27 = arith.constant dense<0.000000e+00> : vector<16x256xf32>
    %75 = tpu.matmul %73, %74, %cst_27 {dimension_numbers = #tpu.dot_dimension_numbers<[1], [0], [0], [1], [0, 0, 1, 1], [], []>} : vector<16x11xbf16>, vector<11x256xbf16>, vector<16x256xf32> -> vector<16x256xf32>
    %76 = arith.addf %63, %75 : vector<16x256xf32>
    %c4 = arith.constant 4 : index
    %c0_28 = arith.constant 0 : index
    %c0_29 = arith.constant 0 : index
    %77 = vector.load %arg1[%c4, %c0_28, %c0_29] : memref<9x16x11xf32, #tpu.memory_space<vmem>>, vector<1x16x11xf32>
    %78 = vector.shape_cast %77 : vector<1x16x11xf32> to vector<16x11xf32>
    %79 = arith.truncf %78 : vector<16x11xf32> to vector<16x11xbf16>
    %80 = arith.truncf %0 : vector<11x256xf32> to vector<11x256xbf16>
    %cst_30 = arith.constant dense<0.000000e+00> : vector<16x256xf32>
    %81 = tpu.matmul %79, %80, %cst_30 {dimension_numbers = #tpu.dot_dimension_numbers<[1], [0], [0], [1], [0, 0, 1, 1], [], []>} : vector<16x11xbf16>, vector<11x256xbf16>, vector<16x256xf32> -> vector<16x256xf32>
    %82 = arith.addf %76, %81 : vector<16x256xf32>
    %c255_i32 = arith.constant 255 : i32
    %83 = tpu.dynamic_rotate %0 by %c255_i32 dim 1 : vector<11x256xf32>, i32 -> vector<11x256xf32>
    %c14_i32_31 = arith.constant 14 : i32
    %84 = vector.broadcast %c14_i32_31 : i32 to vector<1x256xi32>
    %85 = arith.cmpi sle, %17, %84 : vector<1x256xi32>
    %cst_32 = arith.constant 0.000000e+00 : f32
    %86 = vector.shape_cast %85 : vector<1x256xi1> to vector<1x256xi1>
    %87 = vector.broadcast %86 : vector<1x256xi1> to vector<11x256xi1>
    %88 = vector.broadcast %cst_32 : f32 to vector<11x256xf32>
    %89 = arith.select %87, %83, %88 : vector<11x256xi1>, vector<11x256xf32>
    %c5 = arith.constant 5 : index
    %c0_33 = arith.constant 0 : index
    %c0_34 = arith.constant 0 : index
    %90 = vector.load %arg1[%c5, %c0_33, %c0_34] : memref<9x16x11xf32, #tpu.memory_space<vmem>>, vector<1x16x11xf32>
    %91 = vector.shape_cast %90 : vector<1x16x11xf32> to vector<16x11xf32>
    %92 = arith.truncf %91 : vector<16x11xf32> to vector<16x11xbf16>
    %93 = arith.truncf %89 : vector<11x256xf32> to vector<11x256xbf16>
    %cst_35 = arith.constant dense<0.000000e+00> : vector<16x256xf32>
    %94 = tpu.matmul %92, %93, %cst_35 {dimension_numbers = #tpu.dot_dimension_numbers<[1], [0], [0], [1], [0, 0, 1, 1], [], []>} : vector<16x11xbf16>, vector<11x256xbf16>, vector<16x256xf32> -> vector<16x256xf32>
    %95 = arith.addf %82, %94 : vector<16x256xf32>
    %c241_i32 = arith.constant 241 : i32
    %96 = tpu.dynamic_rotate %0 by %c241_i32 dim 1 : vector<11x256xf32>, i32 -> vector<11x256xf32>
    %c240_i32 = arith.constant 240 : i32
    %97 = vector.broadcast %c240_i32 : i32 to vector<1x256xi32>
    %98 = arith.cmpi slt, %1, %97 : vector<1x256xi32>
    %c1_i32_36 = arith.constant 1 : i32
    %99 = vector.broadcast %c1_i32_36 : i32 to vector<1x256xi32>
    %100 = arith.cmpi sge, %17, %99 : vector<1x256xi32>
    %101 = arith.andi %98, %100 : vector<1x256xi1>
    %cst_37 = arith.constant 0.000000e+00 : f32
    %102 = vector.shape_cast %101 : vector<1x256xi1> to vector<1x256xi1>
    %103 = vector.broadcast %102 : vector<1x256xi1> to vector<11x256xi1>
    %104 = vector.broadcast %cst_37 : f32 to vector<11x256xf32>
    %105 = arith.select %103, %96, %104 : vector<11x256xi1>, vector<11x256xf32>
    %c6 = arith.constant 6 : index
    %c0_38 = arith.constant 0 : index
    %c0_39 = arith.constant 0 : index
    %106 = vector.load %arg1[%c6, %c0_38, %c0_39] : memref<9x16x11xf32, #tpu.memory_space<vmem>>, vector<1x16x11xf32>
    %107 = vector.shape_cast %106 : vector<1x16x11xf32> to vector<16x11xf32>
    %108 = arith.truncf %107 : vector<16x11xf32> to vector<16x11xbf16>
    %109 = arith.truncf %105 : vector<11x256xf32> to vector<11x256xbf16>
    %cst_40 = arith.constant dense<0.000000e+00> : vector<16x256xf32>
    %110 = tpu.matmul %108, %109, %cst_40 {dimension_numbers = #tpu.dot_dimension_numbers<[1], [0], [0], [1], [0, 0, 1, 1], [], []>} : vector<16x11xbf16>, vector<11x256xbf16>, vector<16x256xf32> -> vector<16x256xf32>
    %111 = arith.addf %95, %110 : vector<16x256xf32>
    %c240_i32_41 = arith.constant 240 : i32
    %112 = tpu.dynamic_rotate %0 by %c240_i32_41 dim 1 : vector<11x256xf32>, i32 -> vector<11x256xf32>
    %c240_i32_42 = arith.constant 240 : i32
    %113 = vector.broadcast %c240_i32_42 : i32 to vector<1x256xi32>
    %114 = arith.cmpi slt, %1, %113 : vector<1x256xi32>
    %cst_43 = arith.constant 0.000000e+00 : f32
    %115 = vector.shape_cast %114 : vector<1x256xi1> to vector<1x256xi1>
    %116 = vector.broadcast %115 : vector<1x256xi1> to vector<11x256xi1>
    %117 = vector.broadcast %cst_43 : f32 to vector<11x256xf32>
    %118 = arith.select %116, %112, %117 : vector<11x256xi1>, vector<11x256xf32>
    %c7 = arith.constant 7 : index
    %c0_44 = arith.constant 0 : index
    %c0_45 = arith.constant 0 : index
    %119 = vector.load %arg1[%c7, %c0_44, %c0_45] : memref<9x16x11xf32, #tpu.memory_space<vmem>>, vector<1x16x11xf32>
    %120 = vector.shape_cast %119 : vector<1x16x11xf32> to vector<16x11xf32>
    %121 = arith.truncf %120 : vector<16x11xf32> to vector<16x11xbf16>
    %122 = arith.truncf %118 : vector<11x256xf32> to vector<11x256xbf16>
    %cst_46 = arith.constant dense<0.000000e+00> : vector<16x256xf32>
    %123 = tpu.matmul %121, %122, %cst_46 {dimension_numbers = #tpu.dot_dimension_numbers<[1], [0], [0], [1], [0, 0, 1, 1], [], []>} : vector<16x11xbf16>, vector<11x256xbf16>, vector<16x256xf32> -> vector<16x256xf32>
    %124 = arith.addf %111, %123 : vector<16x256xf32>
    %c239_i32 = arith.constant 239 : i32
    %125 = tpu.dynamic_rotate %0 by %c239_i32 dim 1 : vector<11x256xf32>, i32 -> vector<11x256xf32>
    %c240_i32_47 = arith.constant 240 : i32
    %126 = vector.broadcast %c240_i32_47 : i32 to vector<1x256xi32>
    %127 = arith.cmpi slt, %1, %126 : vector<1x256xi32>
    %c14_i32_48 = arith.constant 14 : i32
    %128 = vector.broadcast %c14_i32_48 : i32 to vector<1x256xi32>
    %129 = arith.cmpi sle, %17, %128 : vector<1x256xi32>
    %130 = arith.andi %127, %129 : vector<1x256xi1>
    %cst_49 = arith.constant 0.000000e+00 : f32
    %131 = vector.shape_cast %130 : vector<1x256xi1> to vector<1x256xi1>
    %132 = vector.broadcast %131 : vector<1x256xi1> to vector<11x256xi1>
    %133 = vector.broadcast %cst_49 : f32 to vector<11x256xf32>
    %134 = arith.select %132, %125, %133 : vector<11x256xi1>, vector<11x256xf32>
    %c8 = arith.constant 8 : index
    %c0_50 = arith.constant 0 : index
    %c0_51 = arith.constant 0 : index
    %135 = vector.load %arg1[%c8, %c0_50, %c0_51] : memref<9x16x11xf32, #tpu.memory_space<vmem>>, vector<1x16x11xf32>
    %136 = vector.shape_cast %135 : vector<1x16x11xf32> to vector<16x11xf32>
    %137 = arith.truncf %136 : vector<16x11xf32> to vector<16x11xbf16>
    %138 = arith.truncf %134 : vector<11x256xf32> to vector<11x256xbf16>
    %cst_52 = arith.constant dense<0.000000e+00> : vector<16x256xf32>
    %139 = tpu.matmul %137, %138, %cst_52 {dimension_numbers = #tpu.dot_dimension_numbers<[1], [0], [0], [1], [0, 0, 1, 1], [], []>} : vector<16x11xbf16>, vector<11x256xbf16>, vector<16x256xf32> -> vector<16x256xf32>
    %140 = arith.addf %124, %139 : vector<16x256xf32>
    %c0_53 = arith.constant 0 : index
    %c0_54 = arith.constant 0 : index
    %141 = vector.load %arg2[%c0_53, %c0_54] : memref<16x1xf32, #tpu.memory_space<vmem>>, vector<16x1xf32>
    %142 = vector.broadcast %141 : vector<16x1xf32> to vector<16x256xf32>
    %143 = arith.addf %140, %142 : vector<16x256xf32>
    %cst_55 = arith.constant 0.000000e+00 : f32
    %144 = vector.broadcast %cst_55 : f32 to vector<16x256xf32>
    %145 = arith.maximumf %143, %144 : vector<16x256xf32>
    %146 = tpu.iota {dimensions = array<i32: 1>} : vector<1x256xi32>
    %c16_i32_56 = arith.constant 16 : i32
    %c0_i32_57 = arith.constant 0 : i32
    %147 = arith.cmpi eq, %c16_i32_56, %c0_i32_57 : i32
    %c1_i32_58 = arith.constant 1 : i32
    %148 = arith.select %147, %c1_i32_58, %c16_i32_56 : i32
    %149 = vector.broadcast %148 : i32 to vector<1x256xi32>
    %150 = arith.remsi %146, %149 : vector<1x256xi32>
    %c0_i32_59 = arith.constant 0 : i32
    %151 = vector.broadcast %c0_i32_59 : i32 to vector<1x256xi32>
    %152 = arith.cmpi ne, %150, %151 : vector<1x256xi32>
    %c0_i32_60 = arith.constant 0 : i32
    %153 = vector.broadcast %c0_i32_60 : i32 to vector<1x256xi32>
    %154 = arith.cmpi slt, %150, %153 : vector<1x256xi32>
    %c0_i32_61 = arith.constant 0 : i32
    %155 = arith.cmpi slt, %148, %c0_i32_61 : i32
    %156 = vector.broadcast %155 : i1 to vector<1x256xi1>
    %157 = vector.broadcast %156 : vector<1x256xi1> to vector<1x256xi1>
    %158 = arith.xori %154, %157 : vector<1x256xi1>
    %159 = arith.andi %158, %152 : vector<1x256xi1>
    %160 = vector.broadcast %148 : i32 to vector<1x256xi32>
    %161 = arith.addi %150, %160 : vector<1x256xi32>
    %162 = arith.select %159, %161, %150 : vector<1x256xi1>, vector<1x256xi32>
    %cst_62 = arith.constant 0.000000e+00 : f32
    %163 = vector.broadcast %cst_62 : f32 to vector<3x256xf32>
    %c17_i32_63 = arith.constant 17 : i32
    %164 = tpu.dynamic_rotate %145 by %c17_i32_63 dim 1 : vector<16x256xf32>, i32 -> vector<16x256xf32>
    %c16_i32_64 = arith.constant 16 : i32
    %165 = vector.broadcast %c16_i32_64 : i32 to vector<1x256xi32>
    %166 = arith.cmpi sge, %146, %165 : vector<1x256xi32>
    %c1_i32_65 = arith.constant 1 : i32
    %167 = vector.broadcast %c1_i32_65 : i32 to vector<1x256xi32>
    %168 = arith.cmpi sge, %162, %167 : vector<1x256xi32>
    %169 = arith.andi %166, %168 : vector<1x256xi1>
    %cst_66 = arith.constant 0.000000e+00 : f32
    %170 = vector.shape_cast %169 : vector<1x256xi1> to vector<1x256xi1>
    %171 = vector.broadcast %170 : vector<1x256xi1> to vector<16x256xi1>
    %172 = vector.broadcast %cst_66 : f32 to vector<16x256xf32>
    %173 = arith.select %171, %164, %172 : vector<16x256xi1>, vector<16x256xf32>
    %c0_67 = arith.constant 0 : index
    %c0_68 = arith.constant 0 : index
    %c0_69 = arith.constant 0 : index
    %174 = vector.load %arg3[%c0_67, %c0_68, %c0_69] : memref<9x3x16xf32, #tpu.memory_space<vmem>>, vector<1x3x16xf32>
    %175 = vector.shape_cast %174 : vector<1x3x16xf32> to vector<3x16xf32>
    %176 = arith.truncf %175 : vector<3x16xf32> to vector<3x16xbf16>
    %177 = arith.truncf %173 : vector<16x256xf32> to vector<16x256xbf16>
    %cst_70 = arith.constant dense<0.000000e+00> : vector<3x256xf32>
    %178 = tpu.matmul %176, %177, %cst_70 {dimension_numbers = #tpu.dot_dimension_numbers<[1], [0], [0], [1], [0, 0, 1, 1], [], []>} : vector<3x16xbf16>, vector<16x256xbf16>, vector<3x256xf32> -> vector<3x256xf32>
    %179 = arith.addf %163, %178 : vector<3x256xf32>
    %c16_i32_71 = arith.constant 16 : i32
    %180 = tpu.dynamic_rotate %145 by %c16_i32_71 dim 1 : vector<16x256xf32>, i32 -> vector<16x256xf32>
    %c16_i32_72 = arith.constant 16 : i32
    %181 = vector.broadcast %c16_i32_72 : i32 to vector<1x256xi32>
    %182 = arith.cmpi sge, %146, %181 : vector<1x256xi32>
    %cst_73 = arith.constant 0.000000e+00 : f32
    %183 = vector.shape_cast %182 : vector<1x256xi1> to vector<1x256xi1>
    %184 = vector.broadcast %183 : vector<1x256xi1> to vector<16x256xi1>
    %185 = vector.broadcast %cst_73 : f32 to vector<16x256xf32>
    %186 = arith.select %184, %180, %185 : vector<16x256xi1>, vector<16x256xf32>
    %c1_74 = arith.constant 1 : index
    %c0_75 = arith.constant 0 : index
    %c0_76 = arith.constant 0 : index
    %187 = vector.load %arg3[%c1_74, %c0_75, %c0_76] : memref<9x3x16xf32, #tpu.memory_space<vmem>>, vector<1x3x16xf32>
    %188 = vector.shape_cast %187 : vector<1x3x16xf32> to vector<3x16xf32>
    %189 = arith.truncf %188 : vector<3x16xf32> to vector<3x16xbf16>
    %190 = arith.truncf %186 : vector<16x256xf32> to vector<16x256xbf16>
    %cst_77 = arith.constant dense<0.000000e+00> : vector<3x256xf32>
    %191 = tpu.matmul %189, %190, %cst_77 {dimension_numbers = #tpu.dot_dimension_numbers<[1], [0], [0], [1], [0, 0, 1, 1], [], []>} : vector<3x16xbf16>, vector<16x256xbf16>, vector<3x256xf32> -> vector<3x256xf32>
    %192 = arith.addf %179, %191 : vector<3x256xf32>
    %c15_i32_78 = arith.constant 15 : i32
    %193 = tpu.dynamic_rotate %145 by %c15_i32_78 dim 1 : vector<16x256xf32>, i32 -> vector<16x256xf32>
    %c16_i32_79 = arith.constant 16 : i32
    %194 = vector.broadcast %c16_i32_79 : i32 to vector<1x256xi32>
    %195 = arith.cmpi sge, %146, %194 : vector<1x256xi32>
    %c14_i32_80 = arith.constant 14 : i32
    %196 = vector.broadcast %c14_i32_80 : i32 to vector<1x256xi32>
    %197 = arith.cmpi sle, %162, %196 : vector<1x256xi32>
    %198 = arith.andi %195, %197 : vector<1x256xi1>
    %cst_81 = arith.constant 0.000000e+00 : f32
    %199 = vector.shape_cast %198 : vector<1x256xi1> to vector<1x256xi1>
    %200 = vector.broadcast %199 : vector<1x256xi1> to vector<16x256xi1>
    %201 = vector.broadcast %cst_81 : f32 to vector<16x256xf32>
    %202 = arith.select %200, %193, %201 : vector<16x256xi1>, vector<16x256xf32>
    %c2_82 = arith.constant 2 : index
    %c0_83 = arith.constant 0 : index
    %c0_84 = arith.constant 0 : index
    %203 = vector.load %arg3[%c2_82, %c0_83, %c0_84] : memref<9x3x16xf32, #tpu.memory_space<vmem>>, vector<1x3x16xf32>
    %204 = vector.shape_cast %203 : vector<1x3x16xf32> to vector<3x16xf32>
    %205 = arith.truncf %204 : vector<3x16xf32> to vector<3x16xbf16>
    %206 = arith.truncf %202 : vector<16x256xf32> to vector<16x256xbf16>
    %cst_85 = arith.constant dense<0.000000e+00> : vector<3x256xf32>
    %207 = tpu.matmul %205, %206, %cst_85 {dimension_numbers = #tpu.dot_dimension_numbers<[1], [0], [0], [1], [0, 0, 1, 1], [], []>} : vector<3x16xbf16>, vector<16x256xbf16>, vector<3x256xf32> -> vector<3x256xf32>
    %208 = arith.addf %192, %207 : vector<3x256xf32>
    %c1_i32_86 = arith.constant 1 : i32
    %209 = tpu.dynamic_rotate %145 by %c1_i32_86 dim 1 : vector<16x256xf32>, i32 -> vector<16x256xf32>
    %c1_i32_87 = arith.constant 1 : i32
    %210 = vector.broadcast %c1_i32_87 : i32 to vector<1x256xi32>
    %211 = arith.cmpi sge, %162, %210 : vector<1x256xi32>
    %cst_88 = arith.constant 0.000000e+00 : f32
    %212 = vector.shape_cast %211 : vector<1x256xi1> to vector<1x256xi1>
    %213 = vector.broadcast %212 : vector<1x256xi1> to vector<16x256xi1>
    %214 = vector.broadcast %cst_88 : f32 to vector<16x256xf32>
    %215 = arith.select %213, %209, %214 : vector<16x256xi1>, vector<16x256xf32>
    %c3_89 = arith.constant 3 : index
    %c0_90 = arith.constant 0 : index
    %c0_91 = arith.constant 0 : index
    %216 = vector.load %arg3[%c3_89, %c0_90, %c0_91] : memref<9x3x16xf32, #tpu.memory_space<vmem>>, vector<1x3x16xf32>
    %217 = vector.shape_cast %216 : vector<1x3x16xf32> to vector<3x16xf32>
    %218 = arith.truncf %217 : vector<3x16xf32> to vector<3x16xbf16>
    %219 = arith.truncf %215 : vector<16x256xf32> to vector<16x256xbf16>
    %cst_92 = arith.constant dense<0.000000e+00> : vector<3x256xf32>
    %220 = tpu.matmul %218, %219, %cst_92 {dimension_numbers = #tpu.dot_dimension_numbers<[1], [0], [0], [1], [0, 0, 1, 1], [], []>} : vector<3x16xbf16>, vector<16x256xbf16>, vector<3x256xf32> -> vector<3x256xf32>
    %221 = arith.addf %208, %220 : vector<3x256xf32>
    %c4_93 = arith.constant 4 : index
    %c0_94 = arith.constant 0 : index
    %c0_95 = arith.constant 0 : index
    %222 = vector.load %arg3[%c4_93, %c0_94, %c0_95] : memref<9x3x16xf32, #tpu.memory_space<vmem>>, vector<1x3x16xf32>
    %223 = vector.shape_cast %222 : vector<1x3x16xf32> to vector<3x16xf32>
    %224 = arith.truncf %223 : vector<3x16xf32> to vector<3x16xbf16>
    %225 = arith.truncf %145 : vector<16x256xf32> to vector<16x256xbf16>
    %cst_96 = arith.constant dense<0.000000e+00> : vector<3x256xf32>
    %226 = tpu.matmul %224, %225, %cst_96 {dimension_numbers = #tpu.dot_dimension_numbers<[1], [0], [0], [1], [0, 0, 1, 1], [], []>} : vector<3x16xbf16>, vector<16x256xbf16>, vector<3x256xf32> -> vector<3x256xf32>
    %227 = arith.addf %221, %226 : vector<3x256xf32>
    %c255_i32_97 = arith.constant 255 : i32
    %228 = tpu.dynamic_rotate %145 by %c255_i32_97 dim 1 : vector<16x256xf32>, i32 -> vector<16x256xf32>
    %c14_i32_98 = arith.constant 14 : i32
    %229 = vector.broadcast %c14_i32_98 : i32 to vector<1x256xi32>
    %230 = arith.cmpi sle, %162, %229 : vector<1x256xi32>
    %cst_99 = arith.constant 0.000000e+00 : f32
    %231 = vector.shape_cast %230 : vector<1x256xi1> to vector<1x256xi1>
    %232 = vector.broadcast %231 : vector<1x256xi1> to vector<16x256xi1>
    %233 = vector.broadcast %cst_99 : f32 to vector<16x256xf32>
    %234 = arith.select %232, %228, %233 : vector<16x256xi1>, vector<16x256xf32>
    %c5_100 = arith.constant 5 : index
    %c0_101 = arith.constant 0 : index
    %c0_102 = arith.constant 0 : index
    %235 = vector.load %arg3[%c5_100, %c0_101, %c0_102] : memref<9x3x16xf32, #tpu.memory_space<vmem>>, vector<1x3x16xf32>
    %236 = vector.shape_cast %235 : vector<1x3x16xf32> to vector<3x16xf32>
    %237 = arith.truncf %236 : vector<3x16xf32> to vector<3x16xbf16>
    %238 = arith.truncf %234 : vector<16x256xf32> to vector<16x256xbf16>
    %cst_103 = arith.constant dense<0.000000e+00> : vector<3x256xf32>
    %239 = tpu.matmul %237, %238, %cst_103 {dimension_numbers = #tpu.dot_dimension_numbers<[1], [0], [0], [1], [0, 0, 1, 1], [], []>} : vector<3x16xbf16>, vector<16x256xbf16>, vector<3x256xf32> -> vector<3x256xf32>
    %240 = arith.addf %227, %239 : vector<3x256xf32>
    %c241_i32_104 = arith.constant 241 : i32
    %241 = tpu.dynamic_rotate %145 by %c241_i32_104 dim 1 : vector<16x256xf32>, i32 -> vector<16x256xf32>
    %c240_i32_105 = arith.constant 240 : i32
    %242 = vector.broadcast %c240_i32_105 : i32 to vector<1x256xi32>
    %243 = arith.cmpi slt, %146, %242 : vector<1x256xi32>
    %c1_i32_106 = arith.constant 1 : i32
    %244 = vector.broadcast %c1_i32_106 : i32 to vector<1x256xi32>
    %245 = arith.cmpi sge, %162, %244 : vector<1x256xi32>
    %246 = arith.andi %243, %245 : vector<1x256xi1>
    %cst_107 = arith.constant 0.000000e+00 : f32
    %247 = vector.shape_cast %246 : vector<1x256xi1> to vector<1x256xi1>
    %248 = vector.broadcast %247 : vector<1x256xi1> to vector<16x256xi1>
    %249 = vector.broadcast %cst_107 : f32 to vector<16x256xf32>
    %250 = arith.select %248, %241, %249 : vector<16x256xi1>, vector<16x256xf32>
    %c6_108 = arith.constant 6 : index
    %c0_109 = arith.constant 0 : index
    %c0_110 = arith.constant 0 : index
    %251 = vector.load %arg3[%c6_108, %c0_109, %c0_110] : memref<9x3x16xf32, #tpu.memory_space<vmem>>, vector<1x3x16xf32>
    %252 = vector.shape_cast %251 : vector<1x3x16xf32> to vector<3x16xf32>
    %253 = arith.truncf %252 : vector<3x16xf32> to vector<3x16xbf16>
    %254 = arith.truncf %250 : vector<16x256xf32> to vector<16x256xbf16>
    %cst_111 = arith.constant dense<0.000000e+00> : vector<3x256xf32>
    %255 = tpu.matmul %253, %254, %cst_111 {dimension_numbers = #tpu.dot_dimension_numbers<[1], [0], [0], [1], [0, 0, 1, 1], [], []>} : vector<3x16xbf16>, vector<16x256xbf16>, vector<3x256xf32> -> vector<3x256xf32>
    %256 = arith.addf %240, %255 : vector<3x256xf32>
    %c240_i32_112 = arith.constant 240 : i32
    %257 = tpu.dynamic_rotate %145 by %c240_i32_112 dim 1 : vector<16x256xf32>, i32 -> vector<16x256xf32>
    %c240_i32_113 = arith.constant 240 : i32
    %258 = vector.broadcast %c240_i32_113 : i32 to vector<1x256xi32>
    %259 = arith.cmpi slt, %146, %258 : vector<1x256xi32>
    %cst_114 = arith.constant 0.000000e+00 : f32
    %260 = vector.shape_cast %259 : vector<1x256xi1> to vector<1x256xi1>
    %261 = vector.broadcast %260 : vector<1x256xi1> to vector<16x256xi1>
    %262 = vector.broadcast %cst_114 : f32 to vector<16x256xf32>
    %263 = arith.select %261, %257, %262 : vector<16x256xi1>, vector<16x256xf32>
    %c7_115 = arith.constant 7 : index
    %c0_116 = arith.constant 0 : index
    %c0_117 = arith.constant 0 : index
    %264 = vector.load %arg3[%c7_115, %c0_116, %c0_117] : memref<9x3x16xf32, #tpu.memory_space<vmem>>, vector<1x3x16xf32>
    %265 = vector.shape_cast %264 : vector<1x3x16xf32> to vector<3x16xf32>
    %266 = arith.truncf %265 : vector<3x16xf32> to vector<3x16xbf16>
    %267 = arith.truncf %263 : vector<16x256xf32> to vector<16x256xbf16>
    %cst_118 = arith.constant dense<0.000000e+00> : vector<3x256xf32>
    %268 = tpu.matmul %266, %267, %cst_118 {dimension_numbers = #tpu.dot_dimension_numbers<[1], [0], [0], [1], [0, 0, 1, 1], [], []>} : vector<3x16xbf16>, vector<16x256xbf16>, vector<3x256xf32> -> vector<3x256xf32>
    %269 = arith.addf %256, %268 : vector<3x256xf32>
    %c239_i32_119 = arith.constant 239 : i32
    %270 = tpu.dynamic_rotate %145 by %c239_i32_119 dim 1 : vector<16x256xf32>, i32 -> vector<16x256xf32>
    %c240_i32_120 = arith.constant 240 : i32
    %271 = vector.broadcast %c240_i32_120 : i32 to vector<1x256xi32>
    %272 = arith.cmpi slt, %146, %271 : vector<1x256xi32>
    %c14_i32_121 = arith.constant 14 : i32
    %273 = vector.broadcast %c14_i32_121 : i32 to vector<1x256xi32>
    %274 = arith.cmpi sle, %162, %273 : vector<1x256xi32>
    %275 = arith.andi %272, %274 : vector<1x256xi1>
    %cst_122 = arith.constant 0.000000e+00 : f32
    %276 = vector.shape_cast %275 : vector<1x256xi1> to vector<1x256xi1>
    %277 = vector.broadcast %276 : vector<1x256xi1> to vector<16x256xi1>
    %278 = vector.broadcast %cst_122 : f32 to vector<16x256xf32>
    %279 = arith.select %277, %270, %278 : vector<16x256xi1>, vector<16x256xf32>
    %c8_123 = arith.constant 8 : index
    %c0_124 = arith.constant 0 : index
    %c0_125 = arith.constant 0 : index
    %280 = vector.load %arg3[%c8_123, %c0_124, %c0_125] : memref<9x3x16xf32, #tpu.memory_space<vmem>>, vector<1x3x16xf32>
    %281 = vector.shape_cast %280 : vector<1x3x16xf32> to vector<3x16xf32>
    %282 = arith.truncf %281 : vector<3x16xf32> to vector<3x16xbf16>
    %283 = arith.truncf %279 : vector<16x256xf32> to vector<16x256xbf16>
    %cst_126 = arith.constant dense<0.000000e+00> : vector<3x256xf32>
    %284 = tpu.matmul %282, %283, %cst_126 {dimension_numbers = #tpu.dot_dimension_numbers<[1], [0], [0], [1], [0, 0, 1, 1], [], []>} : vector<3x16xbf16>, vector<16x256xbf16>, vector<3x256xf32> -> vector<3x256xf32>
    %285 = arith.addf %269, %284 : vector<3x256xf32>
    %c0_127 = arith.constant 0 : index
    %c0_128 = arith.constant 0 : index
    %286 = vector.load %arg4[%c0_127, %c0_128] : memref<3x1xf32, #tpu.memory_space<vmem>>, vector<3x1xf32>
    %287 = vector.broadcast %286 : vector<3x1xf32> to vector<3x256xf32>
    %288 = arith.addf %285, %287 : vector<3x256xf32>
    %289 = math.tanh %288 : vector<3x256xf32>
    %290 = tpu.iota {dimensions = array<i32: 1>} : vector<1x256xi32>
    %c16_i32_129 = arith.constant 16 : i32
    %c0_i32_130 = arith.constant 0 : i32
    %291 = arith.cmpi eq, %c16_i32_129, %c0_i32_130 : i32
    %c1_i32_131 = arith.constant 1 : i32
    %292 = arith.select %291, %c1_i32_131, %c16_i32_129 : i32
    %293 = vector.broadcast %292 : i32 to vector<1x256xi32>
    %294 = arith.remsi %290, %293 : vector<1x256xi32>
    %c0_i32_132 = arith.constant 0 : i32
    %295 = vector.broadcast %c0_i32_132 : i32 to vector<1x256xi32>
    %296 = arith.cmpi ne, %294, %295 : vector<1x256xi32>
    %c0_i32_133 = arith.constant 0 : i32
    %297 = vector.broadcast %c0_i32_133 : i32 to vector<1x256xi32>
    %298 = arith.cmpi slt, %294, %297 : vector<1x256xi32>
    %c0_i32_134 = arith.constant 0 : i32
    %299 = arith.cmpi slt, %292, %c0_i32_134 : i32
    %300 = vector.broadcast %299 : i1 to vector<1x256xi1>
    %301 = vector.broadcast %300 : vector<1x256xi1> to vector<1x256xi1>
    %302 = arith.xori %298, %301 : vector<1x256xi1>
    %303 = arith.andi %302, %296 : vector<1x256xi1>
    %304 = vector.broadcast %292 : i32 to vector<1x256xi32>
    %305 = arith.addi %294, %304 : vector<1x256xi32>
    %306 = arith.select %303, %305, %294 : vector<1x256xi1>, vector<1x256xi32>
    %cst_135 = arith.constant 0.000000e+00 : f32
    %307 = vector.broadcast %cst_135 : f32 to vector<16x256xf32>
    %c17_i32_136 = arith.constant 17 : i32
    %308 = tpu.dynamic_rotate %289 by %c17_i32_136 dim 1 : vector<3x256xf32>, i32 -> vector<3x256xf32>
    %c16_i32_137 = arith.constant 16 : i32
    %309 = vector.broadcast %c16_i32_137 : i32 to vector<1x256xi32>
    %310 = arith.cmpi sge, %290, %309 : vector<1x256xi32>
    %c1_i32_138 = arith.constant 1 : i32
    %311 = vector.broadcast %c1_i32_138 : i32 to vector<1x256xi32>
    %312 = arith.cmpi sge, %306, %311 : vector<1x256xi32>
    %313 = arith.andi %310, %312 : vector<1x256xi1>
    %cst_139 = arith.constant 0.000000e+00 : f32
    %314 = vector.shape_cast %313 : vector<1x256xi1> to vector<1x256xi1>
    %315 = vector.broadcast %314 : vector<1x256xi1> to vector<3x256xi1>
    %316 = vector.broadcast %cst_139 : f32 to vector<3x256xf32>
    %317 = arith.select %315, %308, %316 : vector<3x256xi1>, vector<3x256xf32>
    %c0_140 = arith.constant 0 : index
    %c0_141 = arith.constant 0 : index
    %c0_142 = arith.constant 0 : index
    %318 = vector.load %arg5[%c0_140, %c0_141, %c0_142] : memref<9x16x3xf32, #tpu.memory_space<vmem>>, vector<1x16x3xf32>
    %319 = vector.shape_cast %318 : vector<1x16x3xf32> to vector<16x3xf32>
    %320 = arith.truncf %319 : vector<16x3xf32> to vector<16x3xbf16>
    %321 = arith.truncf %317 : vector<3x256xf32> to vector<3x256xbf16>
    %cst_143 = arith.constant dense<0.000000e+00> : vector<16x256xf32>
    %322 = tpu.matmul %320, %321, %cst_143 {dimension_numbers = #tpu.dot_dimension_numbers<[1], [0], [0], [1], [0, 0, 1, 1], [], []>} : vector<16x3xbf16>, vector<3x256xbf16>, vector<16x256xf32> -> vector<16x256xf32>
    %323 = arith.addf %307, %322 : vector<16x256xf32>
    %c16_i32_144 = arith.constant 16 : i32
    %324 = tpu.dynamic_rotate %289 by %c16_i32_144 dim 1 : vector<3x256xf32>, i32 -> vector<3x256xf32>
    %c16_i32_145 = arith.constant 16 : i32
    %325 = vector.broadcast %c16_i32_145 : i32 to vector<1x256xi32>
    %326 = arith.cmpi sge, %290, %325 : vector<1x256xi32>
    %cst_146 = arith.constant 0.000000e+00 : f32
    %327 = vector.shape_cast %326 : vector<1x256xi1> to vector<1x256xi1>
    %328 = vector.broadcast %327 : vector<1x256xi1> to vector<3x256xi1>
    %329 = vector.broadcast %cst_146 : f32 to vector<3x256xf32>
    %330 = arith.select %328, %324, %329 : vector<3x256xi1>, vector<3x256xf32>
    %c1_147 = arith.constant 1 : index
    %c0_148 = arith.constant 0 : index
    %c0_149 = arith.constant 0 : index
    %331 = vector.load %arg5[%c1_147, %c0_148, %c0_149] : memref<9x16x3xf32, #tpu.memory_space<vmem>>, vector<1x16x3xf32>
    %332 = vector.shape_cast %331 : vector<1x16x3xf32> to vector<16x3xf32>
    %333 = arith.truncf %332 : vector<16x3xf32> to vector<16x3xbf16>
    %334 = arith.truncf %330 : vector<3x256xf32> to vector<3x256xbf16>
    %cst_150 = arith.constant dense<0.000000e+00> : vector<16x256xf32>
    %335 = tpu.matmul %333, %334, %cst_150 {dimension_numbers = #tpu.dot_dimension_numbers<[1], [0], [0], [1], [0, 0, 1, 1], [], []>} : vector<16x3xbf16>, vector<3x256xbf16>, vector<16x256xf32> -> vector<16x256xf32>
    %336 = arith.addf %323, %335 : vector<16x256xf32>
    %c15_i32_151 = arith.constant 15 : i32
    %337 = tpu.dynamic_rotate %289 by %c15_i32_151 dim 1 : vector<3x256xf32>, i32 -> vector<3x256xf32>
    %c16_i32_152 = arith.constant 16 : i32
    %338 = vector.broadcast %c16_i32_152 : i32 to vector<1x256xi32>
    %339 = arith.cmpi sge, %290, %338 : vector<1x256xi32>
    %c14_i32_153 = arith.constant 14 : i32
    %340 = vector.broadcast %c14_i32_153 : i32 to vector<1x256xi32>
    %341 = arith.cmpi sle, %306, %340 : vector<1x256xi32>
    %342 = arith.andi %339, %341 : vector<1x256xi1>
    %cst_154 = arith.constant 0.000000e+00 : f32
    %343 = vector.shape_cast %342 : vector<1x256xi1> to vector<1x256xi1>
    %344 = vector.broadcast %343 : vector<1x256xi1> to vector<3x256xi1>
    %345 = vector.broadcast %cst_154 : f32 to vector<3x256xf32>
    %346 = arith.select %344, %337, %345 : vector<3x256xi1>, vector<3x256xf32>
    %c2_155 = arith.constant 2 : index
    %c0_156 = arith.constant 0 : index
    %c0_157 = arith.constant 0 : index
    %347 = vector.load %arg5[%c2_155, %c0_156, %c0_157] : memref<9x16x3xf32, #tpu.memory_space<vmem>>, vector<1x16x3xf32>
    %348 = vector.shape_cast %347 : vector<1x16x3xf32> to vector<16x3xf32>
    %349 = arith.truncf %348 : vector<16x3xf32> to vector<16x3xbf16>
    %350 = arith.truncf %346 : vector<3x256xf32> to vector<3x256xbf16>
    %cst_158 = arith.constant dense<0.000000e+00> : vector<16x256xf32>
    %351 = tpu.matmul %349, %350, %cst_158 {dimension_numbers = #tpu.dot_dimension_numbers<[1], [0], [0], [1], [0, 0, 1, 1], [], []>} : vector<16x3xbf16>, vector<3x256xbf16>, vector<16x256xf32> -> vector<16x256xf32>
    %352 = arith.addf %336, %351 : vector<16x256xf32>
    %c1_i32_159 = arith.constant 1 : i32
    %353 = tpu.dynamic_rotate %289 by %c1_i32_159 dim 1 : vector<3x256xf32>, i32 -> vector<3x256xf32>
    %c1_i32_160 = arith.constant 1 : i32
    %354 = vector.broadcast %c1_i32_160 : i32 to vector<1x256xi32>
    %355 = arith.cmpi sge, %306, %354 : vector<1x256xi32>
    %cst_161 = arith.constant 0.000000e+00 : f32
    %356 = vector.shape_cast %355 : vector<1x256xi1> to vector<1x256xi1>
    %357 = vector.broadcast %356 : vector<1x256xi1> to vector<3x256xi1>
    %358 = vector.broadcast %cst_161 : f32 to vector<3x256xf32>
    %359 = arith.select %357, %353, %358 : vector<3x256xi1>, vector<3x256xf32>
    %c3_162 = arith.constant 3 : index
    %c0_163 = arith.constant 0 : index
    %c0_164 = arith.constant 0 : index
    %360 = vector.load %arg5[%c3_162, %c0_163, %c0_164] : memref<9x16x3xf32, #tpu.memory_space<vmem>>, vector<1x16x3xf32>
    %361 = vector.shape_cast %360 : vector<1x16x3xf32> to vector<16x3xf32>
    %362 = arith.truncf %361 : vector<16x3xf32> to vector<16x3xbf16>
    %363 = arith.truncf %359 : vector<3x256xf32> to vector<3x256xbf16>
    %cst_165 = arith.constant dense<0.000000e+00> : vector<16x256xf32>
    %364 = tpu.matmul %362, %363, %cst_165 {dimension_numbers = #tpu.dot_dimension_numbers<[1], [0], [0], [1], [0, 0, 1, 1], [], []>} : vector<16x3xbf16>, vector<3x256xbf16>, vector<16x256xf32> -> vector<16x256xf32>
    %365 = arith.addf %352, %364 : vector<16x256xf32>
    %c4_166 = arith.constant 4 : index
    %c0_167 = arith.constant 0 : index
    %c0_168 = arith.constant 0 : index
    %366 = vector.load %arg5[%c4_166, %c0_167, %c0_168] : memref<9x16x3xf32, #tpu.memory_space<vmem>>, vector<1x16x3xf32>
    %367 = vector.shape_cast %366 : vector<1x16x3xf32> to vector<16x3xf32>
    %368 = arith.truncf %367 : vector<16x3xf32> to vector<16x3xbf16>
    %369 = arith.truncf %289 : vector<3x256xf32> to vector<3x256xbf16>
    %cst_169 = arith.constant dense<0.000000e+00> : vector<16x256xf32>
    %370 = tpu.matmul %368, %369, %cst_169 {dimension_numbers = #tpu.dot_dimension_numbers<[1], [0], [0], [1], [0, 0, 1, 1], [], []>} : vector<16x3xbf16>, vector<3x256xbf16>, vector<16x256xf32> -> vector<16x256xf32>
    %371 = arith.addf %365, %370 : vector<16x256xf32>
    %c255_i32_170 = arith.constant 255 : i32
    %372 = tpu.dynamic_rotate %289 by %c255_i32_170 dim 1 : vector<3x256xf32>, i32 -> vector<3x256xf32>
    %c14_i32_171 = arith.constant 14 : i32
    %373 = vector.broadcast %c14_i32_171 : i32 to vector<1x256xi32>
    %374 = arith.cmpi sle, %306, %373 : vector<1x256xi32>
    %cst_172 = arith.constant 0.000000e+00 : f32
    %375 = vector.shape_cast %374 : vector<1x256xi1> to vector<1x256xi1>
    %376 = vector.broadcast %375 : vector<1x256xi1> to vector<3x256xi1>
    %377 = vector.broadcast %cst_172 : f32 to vector<3x256xf32>
    %378 = arith.select %376, %372, %377 : vector<3x256xi1>, vector<3x256xf32>
    %c5_173 = arith.constant 5 : index
    %c0_174 = arith.constant 0 : index
    %c0_175 = arith.constant 0 : index
    %379 = vector.load %arg5[%c5_173, %c0_174, %c0_175] : memref<9x16x3xf32, #tpu.memory_space<vmem>>, vector<1x16x3xf32>
    %380 = vector.shape_cast %379 : vector<1x16x3xf32> to vector<16x3xf32>
    %381 = arith.truncf %380 : vector<16x3xf32> to vector<16x3xbf16>
    %382 = arith.truncf %378 : vector<3x256xf32> to vector<3x256xbf16>
    %cst_176 = arith.constant dense<0.000000e+00> : vector<16x256xf32>
    %383 = tpu.matmul %381, %382, %cst_176 {dimension_numbers = #tpu.dot_dimension_numbers<[1], [0], [0], [1], [0, 0, 1, 1], [], []>} : vector<16x3xbf16>, vector<3x256xbf16>, vector<16x256xf32> -> vector<16x256xf32>
    %384 = arith.addf %371, %383 : vector<16x256xf32>
    %c241_i32_177 = arith.constant 241 : i32
    %385 = tpu.dynamic_rotate %289 by %c241_i32_177 dim 1 : vector<3x256xf32>, i32 -> vector<3x256xf32>
    %c240_i32_178 = arith.constant 240 : i32
    %386 = vector.broadcast %c240_i32_178 : i32 to vector<1x256xi32>
    %387 = arith.cmpi slt, %290, %386 : vector<1x256xi32>
    %c1_i32_179 = arith.constant 1 : i32
    %388 = vector.broadcast %c1_i32_179 : i32 to vector<1x256xi32>
    %389 = arith.cmpi sge, %306, %388 : vector<1x256xi32>
    %390 = arith.andi %387, %389 : vector<1x256xi1>
    %cst_180 = arith.constant 0.000000e+00 : f32
    %391 = vector.shape_cast %390 : vector<1x256xi1> to vector<1x256xi1>
    %392 = vector.broadcast %391 : vector<1x256xi1> to vector<3x256xi1>
    %393 = vector.broadcast %cst_180 : f32 to vector<3x256xf32>
    %394 = arith.select %392, %385, %393 : vector<3x256xi1>, vector<3x256xf32>
    %c6_181 = arith.constant 6 : index
    %c0_182 = arith.constant 0 : index
    %c0_183 = arith.constant 0 : index
    %395 = vector.load %arg5[%c6_181, %c0_182, %c0_183] : memref<9x16x3xf32, #tpu.memory_space<vmem>>, vector<1x16x3xf32>
    %396 = vector.shape_cast %395 : vector<1x16x3xf32> to vector<16x3xf32>
    %397 = arith.truncf %396 : vector<16x3xf32> to vector<16x3xbf16>
    %398 = arith.truncf %394 : vector<3x256xf32> to vector<3x256xbf16>
    %cst_184 = arith.constant dense<0.000000e+00> : vector<16x256xf32>
    %399 = tpu.matmul %397, %398, %cst_184 {dimension_numbers = #tpu.dot_dimension_numbers<[1], [0], [0], [1], [0, 0, 1, 1], [], []>} : vector<16x3xbf16>, vector<3x256xbf16>, vector<16x256xf32> -> vector<16x256xf32>
    %400 = arith.addf %384, %399 : vector<16x256xf32>
    %c240_i32_185 = arith.constant 240 : i32
    %401 = tpu.dynamic_rotate %289 by %c240_i32_185 dim 1 : vector<3x256xf32>, i32 -> vector<3x256xf32>
    %c240_i32_186 = arith.constant 240 : i32
    %402 = vector.broadcast %c240_i32_186 : i32 to vector<1x256xi32>
    %403 = arith.cmpi slt, %290, %402 : vector<1x256xi32>
    %cst_187 = arith.constant 0.000000e+00 : f32
    %404 = vector.shape_cast %403 : vector<1x256xi1> to vector<1x256xi1>
    %405 = vector.broadcast %404 : vector<1x256xi1> to vector<3x256xi1>
    %406 = vector.broadcast %cst_187 : f32 to vector<3x256xf32>
    %407 = arith.select %405, %401, %406 : vector<3x256xi1>, vector<3x256xf32>
    %c7_188 = arith.constant 7 : index
    %c0_189 = arith.constant 0 : index
    %c0_190 = arith.constant 0 : index
    %408 = vector.load %arg5[%c7_188, %c0_189, %c0_190] : memref<9x16x3xf32, #tpu.memory_space<vmem>>, vector<1x16x3xf32>
    %409 = vector.shape_cast %408 : vector<1x16x3xf32> to vector<16x3xf32>
    %410 = arith.truncf %409 : vector<16x3xf32> to vector<16x3xbf16>
    %411 = arith.truncf %407 : vector<3x256xf32> to vector<3x256xbf16>
    %cst_191 = arith.constant dense<0.000000e+00> : vector<16x256xf32>
    %412 = tpu.matmul %410, %411, %cst_191 {dimension_numbers = #tpu.dot_dimension_numbers<[1], [0], [0], [1], [0, 0, 1, 1], [], []>} : vector<16x3xbf16>, vector<3x256xbf16>, vector<16x256xf32> -> vector<16x256xf32>
    %413 = arith.addf %400, %412 : vector<16x256xf32>
    %c239_i32_192 = arith.constant 239 : i32
    %414 = tpu.dynamic_rotate %289 by %c239_i32_192 dim 1 : vector<3x256xf32>, i32 -> vector<3x256xf32>
    %c240_i32_193 = arith.constant 240 : i32
    %415 = vector.broadcast %c240_i32_193 : i32 to vector<1x256xi32>
    %416 = arith.cmpi slt, %290, %415 : vector<1x256xi32>
    %c14_i32_194 = arith.constant 14 : i32
    %417 = vector.broadcast %c14_i32_194 : i32 to vector<1x256xi32>
    %418 = arith.cmpi sle, %306, %417 : vector<1x256xi32>
    %419 = arith.andi %416, %418 : vector<1x256xi1>
    %cst_195 = arith.constant 0.000000e+00 : f32
    %420 = vector.shape_cast %419 : vector<1x256xi1> to vector<1x256xi1>
    %421 = vector.broadcast %420 : vector<1x256xi1> to vector<3x256xi1>
    %422 = vector.broadcast %cst_195 : f32 to vector<3x256xf32>
    %423 = arith.select %421, %414, %422 : vector<3x256xi1>, vector<3x256xf32>
    %c8_196 = arith.constant 8 : index
    %c0_197 = arith.constant 0 : index
    %c0_198 = arith.constant 0 : index
    %424 = vector.load %arg5[%c8_196, %c0_197, %c0_198] : memref<9x16x3xf32, #tpu.memory_space<vmem>>, vector<1x16x3xf32>
    %425 = vector.shape_cast %424 : vector<1x16x3xf32> to vector<16x3xf32>
    %426 = arith.truncf %425 : vector<16x3xf32> to vector<16x3xbf16>
    %427 = arith.truncf %423 : vector<3x256xf32> to vector<3x256xbf16>
    %cst_199 = arith.constant dense<0.000000e+00> : vector<16x256xf32>
    %428 = tpu.matmul %426, %427, %cst_199 {dimension_numbers = #tpu.dot_dimension_numbers<[1], [0], [0], [1], [0, 0, 1, 1], [], []>} : vector<16x3xbf16>, vector<3x256xbf16>, vector<16x256xf32> -> vector<16x256xf32>
    %429 = arith.addf %413, %428 : vector<16x256xf32>
    %c0_200 = arith.constant 0 : index
    %c0_201 = arith.constant 0 : index
    %430 = vector.load %arg6[%c0_200, %c0_201] : memref<16x1xf32, #tpu.memory_space<vmem>>, vector<16x1xf32>
    %431 = vector.broadcast %430 : vector<16x1xf32> to vector<16x256xf32>
    %432 = arith.addf %429, %431 : vector<16x256xf32>
    %cst_202 = arith.constant 0.000000e+00 : f32
    %433 = vector.broadcast %cst_202 : f32 to vector<16x256xf32>
    %434 = arith.maximumf %432, %433 : vector<16x256xf32>
    %435 = tpu.iota {dimensions = array<i32: 1>} : vector<1x256xi32>
    %c16_i32_203 = arith.constant 16 : i32
    %c0_i32_204 = arith.constant 0 : i32
    %436 = arith.cmpi eq, %c16_i32_203, %c0_i32_204 : i32
    %c1_i32_205 = arith.constant 1 : i32
    %437 = arith.select %436, %c1_i32_205, %c16_i32_203 : i32
    %438 = vector.broadcast %437 : i32 to vector<1x256xi32>
    %439 = arith.remsi %435, %438 : vector<1x256xi32>
    %c0_i32_206 = arith.constant 0 : i32
    %440 = vector.broadcast %c0_i32_206 : i32 to vector<1x256xi32>
    %441 = arith.cmpi ne, %439, %440 : vector<1x256xi32>
    %c0_i32_207 = arith.constant 0 : i32
    %442 = vector.broadcast %c0_i32_207 : i32 to vector<1x256xi32>
    %443 = arith.cmpi slt, %439, %442 : vector<1x256xi32>
    %c0_i32_208 = arith.constant 0 : i32
    %444 = arith.cmpi slt, %437, %c0_i32_208 : i32
    %445 = vector.broadcast %444 : i1 to vector<1x256xi1>
    %446 = vector.broadcast %445 : vector<1x256xi1> to vector<1x256xi1>
    %447 = arith.xori %443, %446 : vector<1x256xi1>
    %448 = arith.andi %447, %441 : vector<1x256xi1>
    %449 = vector.broadcast %437 : i32 to vector<1x256xi32>
    %450 = arith.addi %439, %449 : vector<1x256xi32>
    %451 = arith.select %448, %450, %439 : vector<1x256xi1>, vector<1x256xi32>
    %cst_209 = arith.constant 0.000000e+00 : f32
    %452 = vector.broadcast %cst_209 : f32 to vector<16x256xf32>
    %c17_i32_210 = arith.constant 17 : i32
    %453 = tpu.dynamic_rotate %434 by %c17_i32_210 dim 1 : vector<16x256xf32>, i32 -> vector<16x256xf32>
    %c16_i32_211 = arith.constant 16 : i32
    %454 = vector.broadcast %c16_i32_211 : i32 to vector<1x256xi32>
    %455 = arith.cmpi sge, %435, %454 : vector<1x256xi32>
    %c1_i32_212 = arith.constant 1 : i32
    %456 = vector.broadcast %c1_i32_212 : i32 to vector<1x256xi32>
    %457 = arith.cmpi sge, %451, %456 : vector<1x256xi32>
    %458 = arith.andi %455, %457 : vector<1x256xi1>
    %cst_213 = arith.constant 0.000000e+00 : f32
    %459 = vector.shape_cast %458 : vector<1x256xi1> to vector<1x256xi1>
    %460 = vector.broadcast %459 : vector<1x256xi1> to vector<16x256xi1>
    %461 = vector.broadcast %cst_213 : f32 to vector<16x256xf32>
    %462 = arith.select %460, %453, %461 : vector<16x256xi1>, vector<16x256xf32>
    %c0_214 = arith.constant 0 : index
    %c0_215 = arith.constant 0 : index
    %c0_216 = arith.constant 0 : index
    %463 = vector.load %arg7[%c0_214, %c0_215, %c0_216] : memref<9x16x16xf32, #tpu.memory_space<vmem>>, vector<1x16x16xf32>
    %464 = vector.shape_cast %463 : vector<1x16x16xf32> to vector<16x16xf32>
    %465 = arith.truncf %464 : vector<16x16xf32> to vector<16x16xbf16>
    %466 = arith.truncf %462 : vector<16x256xf32> to vector<16x256xbf16>
    %cst_217 = arith.constant dense<0.000000e+00> : vector<16x256xf32>
    %467 = tpu.matmul %465, %466, %cst_217 {dimension_numbers = #tpu.dot_dimension_numbers<[1], [0], [0], [1], [0, 0, 1, 1], [], []>} : vector<16x16xbf16>, vector<16x256xbf16>, vector<16x256xf32> -> vector<16x256xf32>
    %468 = arith.addf %452, %467 : vector<16x256xf32>
    %c16_i32_218 = arith.constant 16 : i32
    %469 = tpu.dynamic_rotate %434 by %c16_i32_218 dim 1 : vector<16x256xf32>, i32 -> vector<16x256xf32>
    %c16_i32_219 = arith.constant 16 : i32
    %470 = vector.broadcast %c16_i32_219 : i32 to vector<1x256xi32>
    %471 = arith.cmpi sge, %435, %470 : vector<1x256xi32>
    %cst_220 = arith.constant 0.000000e+00 : f32
    %472 = vector.shape_cast %471 : vector<1x256xi1> to vector<1x256xi1>
    %473 = vector.broadcast %472 : vector<1x256xi1> to vector<16x256xi1>
    %474 = vector.broadcast %cst_220 : f32 to vector<16x256xf32>
    %475 = arith.select %473, %469, %474 : vector<16x256xi1>, vector<16x256xf32>
    %c1_221 = arith.constant 1 : index
    %c0_222 = arith.constant 0 : index
    %c0_223 = arith.constant 0 : index
    %476 = vector.load %arg7[%c1_221, %c0_222, %c0_223] : memref<9x16x16xf32, #tpu.memory_space<vmem>>, vector<1x16x16xf32>
    %477 = vector.shape_cast %476 : vector<1x16x16xf32> to vector<16x16xf32>
    %478 = arith.truncf %477 : vector<16x16xf32> to vector<16x16xbf16>
    %479 = arith.truncf %475 : vector<16x256xf32> to vector<16x256xbf16>
    %cst_224 = arith.constant dense<0.000000e+00> : vector<16x256xf32>
    %480 = tpu.matmul %478, %479, %cst_224 {dimension_numbers = #tpu.dot_dimension_numbers<[1], [0], [0], [1], [0, 0, 1, 1], [], []>} : vector<16x16xbf16>, vector<16x256xbf16>, vector<16x256xf32> -> vector<16x256xf32>
    %481 = arith.addf %468, %480 : vector<16x256xf32>
    %c15_i32_225 = arith.constant 15 : i32
    %482 = tpu.dynamic_rotate %434 by %c15_i32_225 dim 1 : vector<16x256xf32>, i32 -> vector<16x256xf32>
    %c16_i32_226 = arith.constant 16 : i32
    %483 = vector.broadcast %c16_i32_226 : i32 to vector<1x256xi32>
    %484 = arith.cmpi sge, %435, %483 : vector<1x256xi32>
    %c14_i32_227 = arith.constant 14 : i32
    %485 = vector.broadcast %c14_i32_227 : i32 to vector<1x256xi32>
    %486 = arith.cmpi sle, %451, %485 : vector<1x256xi32>
    %487 = arith.andi %484, %486 : vector<1x256xi1>
    %cst_228 = arith.constant 0.000000e+00 : f32
    %488 = vector.shape_cast %487 : vector<1x256xi1> to vector<1x256xi1>
    %489 = vector.broadcast %488 : vector<1x256xi1> to vector<16x256xi1>
    %490 = vector.broadcast %cst_228 : f32 to vector<16x256xf32>
    %491 = arith.select %489, %482, %490 : vector<16x256xi1>, vector<16x256xf32>
    %c2_229 = arith.constant 2 : index
    %c0_230 = arith.constant 0 : index
    %c0_231 = arith.constant 0 : index
    %492 = vector.load %arg7[%c2_229, %c0_230, %c0_231] : memref<9x16x16xf32, #tpu.memory_space<vmem>>, vector<1x16x16xf32>
    %493 = vector.shape_cast %492 : vector<1x16x16xf32> to vector<16x16xf32>
    %494 = arith.truncf %493 : vector<16x16xf32> to vector<16x16xbf16>
    %495 = arith.truncf %491 : vector<16x256xf32> to vector<16x256xbf16>
    %cst_232 = arith.constant dense<0.000000e+00> : vector<16x256xf32>
    %496 = tpu.matmul %494, %495, %cst_232 {dimension_numbers = #tpu.dot_dimension_numbers<[1], [0], [0], [1], [0, 0, 1, 1], [], []>} : vector<16x16xbf16>, vector<16x256xbf16>, vector<16x256xf32> -> vector<16x256xf32>
    %497 = arith.addf %481, %496 : vector<16x256xf32>
    %c1_i32_233 = arith.constant 1 : i32
    %498 = tpu.dynamic_rotate %434 by %c1_i32_233 dim 1 : vector<16x256xf32>, i32 -> vector<16x256xf32>
    %c1_i32_234 = arith.constant 1 : i32
    %499 = vector.broadcast %c1_i32_234 : i32 to vector<1x256xi32>
    %500 = arith.cmpi sge, %451, %499 : vector<1x256xi32>
    %cst_235 = arith.constant 0.000000e+00 : f32
    %501 = vector.shape_cast %500 : vector<1x256xi1> to vector<1x256xi1>
    %502 = vector.broadcast %501 : vector<1x256xi1> to vector<16x256xi1>
    %503 = vector.broadcast %cst_235 : f32 to vector<16x256xf32>
    %504 = arith.select %502, %498, %503 : vector<16x256xi1>, vector<16x256xf32>
    %c3_236 = arith.constant 3 : index
    %c0_237 = arith.constant 0 : index
    %c0_238 = arith.constant 0 : index
    %505 = vector.load %arg7[%c3_236, %c0_237, %c0_238] : memref<9x16x16xf32, #tpu.memory_space<vmem>>, vector<1x16x16xf32>
    %506 = vector.shape_cast %505 : vector<1x16x16xf32> to vector<16x16xf32>
    %507 = arith.truncf %506 : vector<16x16xf32> to vector<16x16xbf16>
    %508 = arith.truncf %504 : vector<16x256xf32> to vector<16x256xbf16>
    %cst_239 = arith.constant dense<0.000000e+00> : vector<16x256xf32>
    %509 = tpu.matmul %507, %508, %cst_239 {dimension_numbers = #tpu.dot_dimension_numbers<[1], [0], [0], [1], [0, 0, 1, 1], [], []>} : vector<16x16xbf16>, vector<16x256xbf16>, vector<16x256xf32> -> vector<16x256xf32>
    %510 = arith.addf %497, %509 : vector<16x256xf32>
    %c4_240 = arith.constant 4 : index
    %c0_241 = arith.constant 0 : index
    %c0_242 = arith.constant 0 : index
    %511 = vector.load %arg7[%c4_240, %c0_241, %c0_242] : memref<9x16x16xf32, #tpu.memory_space<vmem>>, vector<1x16x16xf32>
    %512 = vector.shape_cast %511 : vector<1x16x16xf32> to vector<16x16xf32>
    %513 = arith.truncf %512 : vector<16x16xf32> to vector<16x16xbf16>
    %514 = arith.truncf %434 : vector<16x256xf32> to vector<16x256xbf16>
    %cst_243 = arith.constant dense<0.000000e+00> : vector<16x256xf32>
    %515 = tpu.matmul %513, %514, %cst_243 {dimension_numbers = #tpu.dot_dimension_numbers<[1], [0], [0], [1], [0, 0, 1, 1], [], []>} : vector<16x16xbf16>, vector<16x256xbf16>, vector<16x256xf32> -> vector<16x256xf32>
    %516 = arith.addf %510, %515 : vector<16x256xf32>
    %c255_i32_244 = arith.constant 255 : i32
    %517 = tpu.dynamic_rotate %434 by %c255_i32_244 dim 1 : vector<16x256xf32>, i32 -> vector<16x256xf32>
    %c14_i32_245 = arith.constant 14 : i32
    %518 = vector.broadcast %c14_i32_245 : i32 to vector<1x256xi32>
    %519 = arith.cmpi sle, %451, %518 : vector<1x256xi32>
    %cst_246 = arith.constant 0.000000e+00 : f32
    %520 = vector.shape_cast %519 : vector<1x256xi1> to vector<1x256xi1>
    %521 = vector.broadcast %520 : vector<1x256xi1> to vector<16x256xi1>
    %522 = vector.broadcast %cst_246 : f32 to vector<16x256xf32>
    %523 = arith.select %521, %517, %522 : vector<16x256xi1>, vector<16x256xf32>
    %c5_247 = arith.constant 5 : index
    %c0_248 = arith.constant 0 : index
    %c0_249 = arith.constant 0 : index
    %524 = vector.load %arg7[%c5_247, %c0_248, %c0_249] : memref<9x16x16xf32, #tpu.memory_space<vmem>>, vector<1x16x16xf32>
    %525 = vector.shape_cast %524 : vector<1x16x16xf32> to vector<16x16xf32>
    %526 = arith.truncf %525 : vector<16x16xf32> to vector<16x16xbf16>
    %527 = arith.truncf %523 : vector<16x256xf32> to vector<16x256xbf16>
    %cst_250 = arith.constant dense<0.000000e+00> : vector<16x256xf32>
    %528 = tpu.matmul %526, %527, %cst_250 {dimension_numbers = #tpu.dot_dimension_numbers<[1], [0], [0], [1], [0, 0, 1, 1], [], []>} : vector<16x16xbf16>, vector<16x256xbf16>, vector<16x256xf32> -> vector<16x256xf32>
    %529 = arith.addf %516, %528 : vector<16x256xf32>
    %c241_i32_251 = arith.constant 241 : i32
    %530 = tpu.dynamic_rotate %434 by %c241_i32_251 dim 1 : vector<16x256xf32>, i32 -> vector<16x256xf32>
    %c240_i32_252 = arith.constant 240 : i32
    %531 = vector.broadcast %c240_i32_252 : i32 to vector<1x256xi32>
    %532 = arith.cmpi slt, %435, %531 : vector<1x256xi32>
    %c1_i32_253 = arith.constant 1 : i32
    %533 = vector.broadcast %c1_i32_253 : i32 to vector<1x256xi32>
    %534 = arith.cmpi sge, %451, %533 : vector<1x256xi32>
    %535 = arith.andi %532, %534 : vector<1x256xi1>
    %cst_254 = arith.constant 0.000000e+00 : f32
    %536 = vector.shape_cast %535 : vector<1x256xi1> to vector<1x256xi1>
    %537 = vector.broadcast %536 : vector<1x256xi1> to vector<16x256xi1>
    %538 = vector.broadcast %cst_254 : f32 to vector<16x256xf32>
    %539 = arith.select %537, %530, %538 : vector<16x256xi1>, vector<16x256xf32>
    %c6_255 = arith.constant 6 : index
    %c0_256 = arith.constant 0 : index
    %c0_257 = arith.constant 0 : index
    %540 = vector.load %arg7[%c6_255, %c0_256, %c0_257] : memref<9x16x16xf32, #tpu.memory_space<vmem>>, vector<1x16x16xf32>
    %541 = vector.shape_cast %540 : vector<1x16x16xf32> to vector<16x16xf32>
    %542 = arith.truncf %541 : vector<16x16xf32> to vector<16x16xbf16>
    %543 = arith.truncf %539 : vector<16x256xf32> to vector<16x256xbf16>
    %cst_258 = arith.constant dense<0.000000e+00> : vector<16x256xf32>
    %544 = tpu.matmul %542, %543, %cst_258 {dimension_numbers = #tpu.dot_dimension_numbers<[1], [0], [0], [1], [0, 0, 1, 1], [], []>} : vector<16x16xbf16>, vector<16x256xbf16>, vector<16x256xf32> -> vector<16x256xf32>
    %545 = arith.addf %529, %544 : vector<16x256xf32>
    %c240_i32_259 = arith.constant 240 : i32
    %546 = tpu.dynamic_rotate %434 by %c240_i32_259 dim 1 : vector<16x256xf32>, i32 -> vector<16x256xf32>
    %c240_i32_260 = arith.constant 240 : i32
    %547 = vector.broadcast %c240_i32_260 : i32 to vector<1x256xi32>
    %548 = arith.cmpi slt, %435, %547 : vector<1x256xi32>
    %cst_261 = arith.constant 0.000000e+00 : f32
    %549 = vector.shape_cast %548 : vector<1x256xi1> to vector<1x256xi1>
    %550 = vector.broadcast %549 : vector<1x256xi1> to vector<16x256xi1>
    %551 = vector.broadcast %cst_261 : f32 to vector<16x256xf32>
    %552 = arith.select %550, %546, %551 : vector<16x256xi1>, vector<16x256xf32>
    %c7_262 = arith.constant 7 : index
    %c0_263 = arith.constant 0 : index
    %c0_264 = arith.constant 0 : index
    %553 = vector.load %arg7[%c7_262, %c0_263, %c0_264] : memref<9x16x16xf32, #tpu.memory_space<vmem>>, vector<1x16x16xf32>
    %554 = vector.shape_cast %553 : vector<1x16x16xf32> to vector<16x16xf32>
    %555 = arith.truncf %554 : vector<16x16xf32> to vector<16x16xbf16>
    %556 = arith.truncf %552 : vector<16x256xf32> to vector<16x256xbf16>
    %cst_265 = arith.constant dense<0.000000e+00> : vector<16x256xf32>
    %557 = tpu.matmul %555, %556, %cst_265 {dimension_numbers = #tpu.dot_dimension_numbers<[1], [0], [0], [1], [0, 0, 1, 1], [], []>} : vector<16x16xbf16>, vector<16x256xbf16>, vector<16x256xf32> -> vector<16x256xf32>
    %558 = arith.addf %545, %557 : vector<16x256xf32>
    %c239_i32_266 = arith.constant 239 : i32
    %559 = tpu.dynamic_rotate %434 by %c239_i32_266 dim 1 : vector<16x256xf32>, i32 -> vector<16x256xf32>
    %c240_i32_267 = arith.constant 240 : i32
    %560 = vector.broadcast %c240_i32_267 : i32 to vector<1x256xi32>
    %561 = arith.cmpi slt, %435, %560 : vector<1x256xi32>
    %c14_i32_268 = arith.constant 14 : i32
    %562 = vector.broadcast %c14_i32_268 : i32 to vector<1x256xi32>
    %563 = arith.cmpi sle, %451, %562 : vector<1x256xi32>
    %564 = arith.andi %561, %563 : vector<1x256xi1>
    %cst_269 = arith.constant 0.000000e+00 : f32
    %565 = vector.shape_cast %564 : vector<1x256xi1> to vector<1x256xi1>
    %566 = vector.broadcast %565 : vector<1x256xi1> to vector<16x256xi1>
    %567 = vector.broadcast %cst_269 : f32 to vector<16x256xf32>
    %568 = arith.select %566, %559, %567 : vector<16x256xi1>, vector<16x256xf32>
    %c8_270 = arith.constant 8 : index
    %c0_271 = arith.constant 0 : index
    %c0_272 = arith.constant 0 : index
    %569 = vector.load %arg7[%c8_270, %c0_271, %c0_272] : memref<9x16x16xf32, #tpu.memory_space<vmem>>, vector<1x16x16xf32>
    %570 = vector.shape_cast %569 : vector<1x16x16xf32> to vector<16x16xf32>
    %571 = arith.truncf %570 : vector<16x16xf32> to vector<16x16xbf16>
    %572 = arith.truncf %568 : vector<16x256xf32> to vector<16x256xbf16>
    %cst_273 = arith.constant dense<0.000000e+00> : vector<16x256xf32>
    %573 = tpu.matmul %571, %572, %cst_273 {dimension_numbers = #tpu.dot_dimension_numbers<[1], [0], [0], [1], [0, 0, 1, 1], [], []>} : vector<16x16xbf16>, vector<16x256xbf16>, vector<16x256xf32> -> vector<16x256xf32>
    %574 = arith.addf %558, %573 : vector<16x256xf32>
    %c0_274 = arith.constant 0 : index
    %c0_275 = arith.constant 0 : index
    %575 = vector.load %arg8[%c0_274, %c0_275] : memref<16x1xf32, #tpu.memory_space<vmem>>, vector<16x1xf32>
    %576 = vector.broadcast %575 : vector<16x1xf32> to vector<16x256xf32>
    %577 = arith.addf %574, %576 : vector<16x256xf32>
    %578 = arith.addf %577, %434 : vector<16x256xf32>
    %cst_276 = arith.constant 0.000000e+00 : f32
    %579 = vector.broadcast %cst_276 : f32 to vector<16x256xf32>
    %580 = arith.maximumf %578, %579 : vector<16x256xf32>
    %cst_277 = arith.constant dense<0.000000e+00> : vector<16xf32>
    %581 = vector.multi_reduction <add>, %580, %cst_277 [1] : vector<16x256xf32> to vector<16xf32>
    %582 = vector.shape_cast %581 : vector<16xf32> to vector<16x1xf32>
    %cst_278 = arith.constant 2.560000e+02 : f32
    %583 = vector.broadcast %cst_278 : f32 to vector<16x1xf32>
    %584 = arith.divf %582, %583 : vector<16x1xf32>
    %c0_279 = arith.constant 0 : index
    %c0_280 = arith.constant 0 : index
    %585 = vector.load %arg9[%c0_279, %c0_280] : memref<2x16xf32, #tpu.memory_space<vmem>>, vector<2x16xf32>
    %586 = arith.truncf %585 : vector<2x16xf32> to vector<2x16xbf16>
    %587 = arith.truncf %584 : vector<16x1xf32> to vector<16x1xbf16>
    %cst_281 = arith.constant dense<0.000000e+00> : vector<2x1xf32>
    %588 = tpu.matmul %586, %587, %cst_281 {dimension_numbers = #tpu.dot_dimension_numbers<[1], [0], [0], [1], [0, 0, 1, 1], [], []>} : vector<2x16xbf16>, vector<16x1xbf16>, vector<2x1xf32> -> vector<2x1xf32>
    %c0_282 = arith.constant 0 : index
    %c0_283 = arith.constant 0 : index
    %589 = vector.load %arg10[%c0_282, %c0_283] : memref<2x1xf32, #tpu.memory_space<vmem>>, vector<2x1xf32>
    %590 = arith.addf %588, %589 : vector<2x1xf32>
    %c0_284 = arith.constant 0 : index
    %c0_285 = arith.constant 0 : index
    %591 = vector.load %arg11[%c0_284, %c0_285] : memref<2x1xf32, #tpu.memory_space<vmem>>, vector<2x1xf32>
    tpu.vector_store %arg11[%c0_284, %c0_285], %590 {strides = array<i32>} : memref<2x1xf32, #tpu.memory_space<vmem>>, vector<2x1xf32>,
    return
  }
}

module attributes {stable_mosaic.version = 11 : i64} {
  func.func @_classifier_kernel(%arg0: memref<3x256xf32, #tpu.memory_space<vmem>>, %arg1: memref<9x16x3xf32, #tpu.memory_space<vmem>>, %arg2: memref<16x1xf32, #tpu.memory_space<vmem>>, %arg3: memref<9x16x16xf32, #tpu.memory_space<vmem>>, %arg4: memref<16x1xf32, #tpu.memory_space<vmem>>, %arg5: memref<2x16xf32, #tpu.memory_space<vmem>>, %arg6: memref<2x1xf32, #tpu.memory_space<vmem>>, %arg7: memref<2x1xf32, #tpu.memory_space<vmem>>) attributes {dimension_semantics = [], scalar_prefetch = 0 : i64, scratch_operands = 0 : i64, tpu.core_type = #tpu.core_type<tc>} {
    %c0 = arith.constant 0 : index
    %c0_0 = arith.constant 0 : index
    %0 = vector.load %arg0[%c0, %c0_0] : memref<3x256xf32, #tpu.memory_space<vmem>>, vector<3x256xf32>
    %1 = tpu.iota {dimensions = array<i32: 1>} : vector<1x256xi32>
    %c16_i32 = arith.constant 16 : i32
    %c0_i32 = arith.constant 0 : i32
    %2 = arith.cmpi eq, %c16_i32, %c0_i32 : i32
    %c1_i32 = arith.constant 1 : i32
    %3 = arith.select %2, %c1_i32, %c16_i32 : i32
    %4 = vector.broadcast %3 : i32 to vector<1x256xi32>
    %5 = arith.remsi %1, %4 : vector<1x256xi32>
    %c0_i32_1 = arith.constant 0 : i32
    %6 = vector.broadcast %c0_i32_1 : i32 to vector<1x256xi32>
    %7 = arith.cmpi ne, %5, %6 : vector<1x256xi32>
    %c0_i32_2 = arith.constant 0 : i32
    %8 = vector.broadcast %c0_i32_2 : i32 to vector<1x256xi32>
    %9 = arith.cmpi slt, %5, %8 : vector<1x256xi32>
    %c0_i32_3 = arith.constant 0 : i32
    %10 = arith.cmpi slt, %3, %c0_i32_3 : i32
    %11 = vector.broadcast %10 : i1 to vector<1x256xi1>
    %12 = vector.broadcast %11 : vector<1x256xi1> to vector<1x256xi1>
    %13 = arith.xori %9, %12 : vector<1x256xi1>
    %14 = arith.andi %13, %7 : vector<1x256xi1>
    %15 = vector.broadcast %3 : i32 to vector<1x256xi32>
    %16 = arith.addi %5, %15 : vector<1x256xi32>
    %17 = arith.select %14, %16, %5 : vector<1x256xi1>, vector<1x256xi32>
    %cst = arith.constant 0.000000e+00 : f32
    %18 = vector.broadcast %cst : f32 to vector<16x256xf32>
    %c17_i32 = arith.constant 17 : i32
    %19 = tpu.dynamic_rotate %0 by %c17_i32 dim 1 : vector<3x256xf32>, i32 -> vector<3x256xf32>
    %c16_i32_4 = arith.constant 16 : i32
    %20 = vector.broadcast %c16_i32_4 : i32 to vector<1x256xi32>
    %21 = arith.cmpi sge, %1, %20 : vector<1x256xi32>
    %c1_i32_5 = arith.constant 1 : i32
    %22 = vector.broadcast %c1_i32_5 : i32 to vector<1x256xi32>
    %23 = arith.cmpi sge, %17, %22 : vector<1x256xi32>
    %24 = arith.andi %21, %23 : vector<1x256xi1>
    %cst_6 = arith.constant 0.000000e+00 : f32
    %25 = vector.shape_cast %24 : vector<1x256xi1> to vector<1x256xi1>
    %26 = vector.broadcast %25 : vector<1x256xi1> to vector<3x256xi1>
    %27 = vector.broadcast %cst_6 : f32 to vector<3x256xf32>
    %28 = arith.select %26, %19, %27 : vector<3x256xi1>, vector<3x256xf32>
    %c0_7 = arith.constant 0 : index
    %c0_8 = arith.constant 0 : index
    %c0_9 = arith.constant 0 : index
    %29 = vector.load %arg1[%c0_7, %c0_8, %c0_9] : memref<9x16x3xf32, #tpu.memory_space<vmem>>, vector<1x16x3xf32>
    %30 = vector.shape_cast %29 : vector<1x16x3xf32> to vector<16x3xf32>
    %31 = arith.truncf %30 : vector<16x3xf32> to vector<16x3xbf16>
    %32 = arith.truncf %28 : vector<3x256xf32> to vector<3x256xbf16>
    %cst_10 = arith.constant dense<0.000000e+00> : vector<16x256xf32>
    %33 = tpu.matmul %31, %32, %cst_10 {dimension_numbers = #tpu.dot_dimension_numbers<[1], [0], [0], [1], [0, 0, 1, 1], [], []>} : vector<16x3xbf16>, vector<3x256xbf16>, vector<16x256xf32> -> vector<16x256xf32>
    %34 = arith.addf %18, %33 : vector<16x256xf32>
    %c16_i32_11 = arith.constant 16 : i32
    %35 = tpu.dynamic_rotate %0 by %c16_i32_11 dim 1 : vector<3x256xf32>, i32 -> vector<3x256xf32>
    %c16_i32_12 = arith.constant 16 : i32
    %36 = vector.broadcast %c16_i32_12 : i32 to vector<1x256xi32>
    %37 = arith.cmpi sge, %1, %36 : vector<1x256xi32>
    %cst_13 = arith.constant 0.000000e+00 : f32
    %38 = vector.shape_cast %37 : vector<1x256xi1> to vector<1x256xi1>
    %39 = vector.broadcast %38 : vector<1x256xi1> to vector<3x256xi1>
    %40 = vector.broadcast %cst_13 : f32 to vector<3x256xf32>
    %41 = arith.select %39, %35, %40 : vector<3x256xi1>, vector<3x256xf32>
    %c1 = arith.constant 1 : index
    %c0_14 = arith.constant 0 : index
    %c0_15 = arith.constant 0 : index
    %42 = vector.load %arg1[%c1, %c0_14, %c0_15] : memref<9x16x3xf32, #tpu.memory_space<vmem>>, vector<1x16x3xf32>
    %43 = vector.shape_cast %42 : vector<1x16x3xf32> to vector<16x3xf32>
    %44 = arith.truncf %43 : vector<16x3xf32> to vector<16x3xbf16>
    %45 = arith.truncf %41 : vector<3x256xf32> to vector<3x256xbf16>
    %cst_16 = arith.constant dense<0.000000e+00> : vector<16x256xf32>
    %46 = tpu.matmul %44, %45, %cst_16 {dimension_numbers = #tpu.dot_dimension_numbers<[1], [0], [0], [1], [0, 0, 1, 1], [], []>} : vector<16x3xbf16>, vector<3x256xbf16>, vector<16x256xf32> -> vector<16x256xf32>
    %47 = arith.addf %34, %46 : vector<16x256xf32>
    %c15_i32 = arith.constant 15 : i32
    %48 = tpu.dynamic_rotate %0 by %c15_i32 dim 1 : vector<3x256xf32>, i32 -> vector<3x256xf32>
    %c16_i32_17 = arith.constant 16 : i32
    %49 = vector.broadcast %c16_i32_17 : i32 to vector<1x256xi32>
    %50 = arith.cmpi sge, %1, %49 : vector<1x256xi32>
    %c14_i32 = arith.constant 14 : i32
    %51 = vector.broadcast %c14_i32 : i32 to vector<1x256xi32>
    %52 = arith.cmpi sle, %17, %51 : vector<1x256xi32>
    %53 = arith.andi %50, %52 : vector<1x256xi1>
    %cst_18 = arith.constant 0.000000e+00 : f32
    %54 = vector.shape_cast %53 : vector<1x256xi1> to vector<1x256xi1>
    %55 = vector.broadcast %54 : vector<1x256xi1> to vector<3x256xi1>
    %56 = vector.broadcast %cst_18 : f32 to vector<3x256xf32>
    %57 = arith.select %55, %48, %56 : vector<3x256xi1>, vector<3x256xf32>
    %c2 = arith.constant 2 : index
    %c0_19 = arith.constant 0 : index
    %c0_20 = arith.constant 0 : index
    %58 = vector.load %arg1[%c2, %c0_19, %c0_20] : memref<9x16x3xf32, #tpu.memory_space<vmem>>, vector<1x16x3xf32>
    %59 = vector.shape_cast %58 : vector<1x16x3xf32> to vector<16x3xf32>
    %60 = arith.truncf %59 : vector<16x3xf32> to vector<16x3xbf16>
    %61 = arith.truncf %57 : vector<3x256xf32> to vector<3x256xbf16>
    %cst_21 = arith.constant dense<0.000000e+00> : vector<16x256xf32>
    %62 = tpu.matmul %60, %61, %cst_21 {dimension_numbers = #tpu.dot_dimension_numbers<[1], [0], [0], [1], [0, 0, 1, 1], [], []>} : vector<16x3xbf16>, vector<3x256xbf16>, vector<16x256xf32> -> vector<16x256xf32>
    %63 = arith.addf %47, %62 : vector<16x256xf32>
    %c1_i32_22 = arith.constant 1 : i32
    %64 = tpu.dynamic_rotate %0 by %c1_i32_22 dim 1 : vector<3x256xf32>, i32 -> vector<3x256xf32>
    %c1_i32_23 = arith.constant 1 : i32
    %65 = vector.broadcast %c1_i32_23 : i32 to vector<1x256xi32>
    %66 = arith.cmpi sge, %17, %65 : vector<1x256xi32>
    %cst_24 = arith.constant 0.000000e+00 : f32
    %67 = vector.shape_cast %66 : vector<1x256xi1> to vector<1x256xi1>
    %68 = vector.broadcast %67 : vector<1x256xi1> to vector<3x256xi1>
    %69 = vector.broadcast %cst_24 : f32 to vector<3x256xf32>
    %70 = arith.select %68, %64, %69 : vector<3x256xi1>, vector<3x256xf32>
    %c3 = arith.constant 3 : index
    %c0_25 = arith.constant 0 : index
    %c0_26 = arith.constant 0 : index
    %71 = vector.load %arg1[%c3, %c0_25, %c0_26] : memref<9x16x3xf32, #tpu.memory_space<vmem>>, vector<1x16x3xf32>
    %72 = vector.shape_cast %71 : vector<1x16x3xf32> to vector<16x3xf32>
    %73 = arith.truncf %72 : vector<16x3xf32> to vector<16x3xbf16>
    %74 = arith.truncf %70 : vector<3x256xf32> to vector<3x256xbf16>
    %cst_27 = arith.constant dense<0.000000e+00> : vector<16x256xf32>
    %75 = tpu.matmul %73, %74, %cst_27 {dimension_numbers = #tpu.dot_dimension_numbers<[1], [0], [0], [1], [0, 0, 1, 1], [], []>} : vector<16x3xbf16>, vector<3x256xbf16>, vector<16x256xf32> -> vector<16x256xf32>
    %76 = arith.addf %63, %75 : vector<16x256xf32>
    %c4 = arith.constant 4 : index
    %c0_28 = arith.constant 0 : index
    %c0_29 = arith.constant 0 : index
    %77 = vector.load %arg1[%c4, %c0_28, %c0_29] : memref<9x16x3xf32, #tpu.memory_space<vmem>>, vector<1x16x3xf32>
    %78 = vector.shape_cast %77 : vector<1x16x3xf32> to vector<16x3xf32>
    %79 = arith.truncf %78 : vector<16x3xf32> to vector<16x3xbf16>
    %80 = arith.truncf %0 : vector<3x256xf32> to vector<3x256xbf16>
    %cst_30 = arith.constant dense<0.000000e+00> : vector<16x256xf32>
    %81 = tpu.matmul %79, %80, %cst_30 {dimension_numbers = #tpu.dot_dimension_numbers<[1], [0], [0], [1], [0, 0, 1, 1], [], []>} : vector<16x3xbf16>, vector<3x256xbf16>, vector<16x256xf32> -> vector<16x256xf32>
    %82 = arith.addf %76, %81 : vector<16x256xf32>
    %c255_i32 = arith.constant 255 : i32
    %83 = tpu.dynamic_rotate %0 by %c255_i32 dim 1 : vector<3x256xf32>, i32 -> vector<3x256xf32>
    %c14_i32_31 = arith.constant 14 : i32
    %84 = vector.broadcast %c14_i32_31 : i32 to vector<1x256xi32>
    %85 = arith.cmpi sle, %17, %84 : vector<1x256xi32>
    %cst_32 = arith.constant 0.000000e+00 : f32
    %86 = vector.shape_cast %85 : vector<1x256xi1> to vector<1x256xi1>
    %87 = vector.broadcast %86 : vector<1x256xi1> to vector<3x256xi1>
    %88 = vector.broadcast %cst_32 : f32 to vector<3x256xf32>
    %89 = arith.select %87, %83, %88 : vector<3x256xi1>, vector<3x256xf32>
    %c5 = arith.constant 5 : index
    %c0_33 = arith.constant 0 : index
    %c0_34 = arith.constant 0 : index
    %90 = vector.load %arg1[%c5, %c0_33, %c0_34] : memref<9x16x3xf32, #tpu.memory_space<vmem>>, vector<1x16x3xf32>
    %91 = vector.shape_cast %90 : vector<1x16x3xf32> to vector<16x3xf32>
    %92 = arith.truncf %91 : vector<16x3xf32> to vector<16x3xbf16>
    %93 = arith.truncf %89 : vector<3x256xf32> to vector<3x256xbf16>
    %cst_35 = arith.constant dense<0.000000e+00> : vector<16x256xf32>
    %94 = tpu.matmul %92, %93, %cst_35 {dimension_numbers = #tpu.dot_dimension_numbers<[1], [0], [0], [1], [0, 0, 1, 1], [], []>} : vector<16x3xbf16>, vector<3x256xbf16>, vector<16x256xf32> -> vector<16x256xf32>
    %95 = arith.addf %82, %94 : vector<16x256xf32>
    %c241_i32 = arith.constant 241 : i32
    %96 = tpu.dynamic_rotate %0 by %c241_i32 dim 1 : vector<3x256xf32>, i32 -> vector<3x256xf32>
    %c240_i32 = arith.constant 240 : i32
    %97 = vector.broadcast %c240_i32 : i32 to vector<1x256xi32>
    %98 = arith.cmpi slt, %1, %97 : vector<1x256xi32>
    %c1_i32_36 = arith.constant 1 : i32
    %99 = vector.broadcast %c1_i32_36 : i32 to vector<1x256xi32>
    %100 = arith.cmpi sge, %17, %99 : vector<1x256xi32>
    %101 = arith.andi %98, %100 : vector<1x256xi1>
    %cst_37 = arith.constant 0.000000e+00 : f32
    %102 = vector.shape_cast %101 : vector<1x256xi1> to vector<1x256xi1>
    %103 = vector.broadcast %102 : vector<1x256xi1> to vector<3x256xi1>
    %104 = vector.broadcast %cst_37 : f32 to vector<3x256xf32>
    %105 = arith.select %103, %96, %104 : vector<3x256xi1>, vector<3x256xf32>
    %c6 = arith.constant 6 : index
    %c0_38 = arith.constant 0 : index
    %c0_39 = arith.constant 0 : index
    %106 = vector.load %arg1[%c6, %c0_38, %c0_39] : memref<9x16x3xf32, #tpu.memory_space<vmem>>, vector<1x16x3xf32>
    %107 = vector.shape_cast %106 : vector<1x16x3xf32> to vector<16x3xf32>
    %108 = arith.truncf %107 : vector<16x3xf32> to vector<16x3xbf16>
    %109 = arith.truncf %105 : vector<3x256xf32> to vector<3x256xbf16>
    %cst_40 = arith.constant dense<0.000000e+00> : vector<16x256xf32>
    %110 = tpu.matmul %108, %109, %cst_40 {dimension_numbers = #tpu.dot_dimension_numbers<[1], [0], [0], [1], [0, 0, 1, 1], [], []>} : vector<16x3xbf16>, vector<3x256xbf16>, vector<16x256xf32> -> vector<16x256xf32>
    %111 = arith.addf %95, %110 : vector<16x256xf32>
    %c240_i32_41 = arith.constant 240 : i32
    %112 = tpu.dynamic_rotate %0 by %c240_i32_41 dim 1 : vector<3x256xf32>, i32 -> vector<3x256xf32>
    %c240_i32_42 = arith.constant 240 : i32
    %113 = vector.broadcast %c240_i32_42 : i32 to vector<1x256xi32>
    %114 = arith.cmpi slt, %1, %113 : vector<1x256xi32>
    %cst_43 = arith.constant 0.000000e+00 : f32
    %115 = vector.shape_cast %114 : vector<1x256xi1> to vector<1x256xi1>
    %116 = vector.broadcast %115 : vector<1x256xi1> to vector<3x256xi1>
    %117 = vector.broadcast %cst_43 : f32 to vector<3x256xf32>
    %118 = arith.select %116, %112, %117 : vector<3x256xi1>, vector<3x256xf32>
    %c7 = arith.constant 7 : index
    %c0_44 = arith.constant 0 : index
    %c0_45 = arith.constant 0 : index
    %119 = vector.load %arg1[%c7, %c0_44, %c0_45] : memref<9x16x3xf32, #tpu.memory_space<vmem>>, vector<1x16x3xf32>
    %120 = vector.shape_cast %119 : vector<1x16x3xf32> to vector<16x3xf32>
    %121 = arith.truncf %120 : vector<16x3xf32> to vector<16x3xbf16>
    %122 = arith.truncf %118 : vector<3x256xf32> to vector<3x256xbf16>
    %cst_46 = arith.constant dense<0.000000e+00> : vector<16x256xf32>
    %123 = tpu.matmul %121, %122, %cst_46 {dimension_numbers = #tpu.dot_dimension_numbers<[1], [0], [0], [1], [0, 0, 1, 1], [], []>} : vector<16x3xbf16>, vector<3x256xbf16>, vector<16x256xf32> -> vector<16x256xf32>
    %124 = arith.addf %111, %123 : vector<16x256xf32>
    %c239_i32 = arith.constant 239 : i32
    %125 = tpu.dynamic_rotate %0 by %c239_i32 dim 1 : vector<3x256xf32>, i32 -> vector<3x256xf32>
    %c240_i32_47 = arith.constant 240 : i32
    %126 = vector.broadcast %c240_i32_47 : i32 to vector<1x256xi32>
    %127 = arith.cmpi slt, %1, %126 : vector<1x256xi32>
    %c14_i32_48 = arith.constant 14 : i32
    %128 = vector.broadcast %c14_i32_48 : i32 to vector<1x256xi32>
    %129 = arith.cmpi sle, %17, %128 : vector<1x256xi32>
    %130 = arith.andi %127, %129 : vector<1x256xi1>
    %cst_49 = arith.constant 0.000000e+00 : f32
    %131 = vector.shape_cast %130 : vector<1x256xi1> to vector<1x256xi1>
    %132 = vector.broadcast %131 : vector<1x256xi1> to vector<3x256xi1>
    %133 = vector.broadcast %cst_49 : f32 to vector<3x256xf32>
    %134 = arith.select %132, %125, %133 : vector<3x256xi1>, vector<3x256xf32>
    %c8 = arith.constant 8 : index
    %c0_50 = arith.constant 0 : index
    %c0_51 = arith.constant 0 : index
    %135 = vector.load %arg1[%c8, %c0_50, %c0_51] : memref<9x16x3xf32, #tpu.memory_space<vmem>>, vector<1x16x3xf32>
    %136 = vector.shape_cast %135 : vector<1x16x3xf32> to vector<16x3xf32>
    %137 = arith.truncf %136 : vector<16x3xf32> to vector<16x3xbf16>
    %138 = arith.truncf %134 : vector<3x256xf32> to vector<3x256xbf16>
    %cst_52 = arith.constant dense<0.000000e+00> : vector<16x256xf32>
    %139 = tpu.matmul %137, %138, %cst_52 {dimension_numbers = #tpu.dot_dimension_numbers<[1], [0], [0], [1], [0, 0, 1, 1], [], []>} : vector<16x3xbf16>, vector<3x256xbf16>, vector<16x256xf32> -> vector<16x256xf32>
    %140 = arith.addf %124, %139 : vector<16x256xf32>
    %c0_53 = arith.constant 0 : index
    %c0_54 = arith.constant 0 : index
    %141 = vector.load %arg2[%c0_53, %c0_54] : memref<16x1xf32, #tpu.memory_space<vmem>>, vector<16x1xf32>
    %142 = vector.broadcast %141 : vector<16x1xf32> to vector<16x256xf32>
    %143 = arith.addf %140, %142 : vector<16x256xf32>
    %cst_55 = arith.constant 0.000000e+00 : f32
    %144 = vector.broadcast %cst_55 : f32 to vector<16x256xf32>
    %145 = arith.maximumf %143, %144 : vector<16x256xf32>
    %146 = tpu.iota {dimensions = array<i32: 1>} : vector<1x256xi32>
    %c16_i32_56 = arith.constant 16 : i32
    %c0_i32_57 = arith.constant 0 : i32
    %147 = arith.cmpi eq, %c16_i32_56, %c0_i32_57 : i32
    %c1_i32_58 = arith.constant 1 : i32
    %148 = arith.select %147, %c1_i32_58, %c16_i32_56 : i32
    %149 = vector.broadcast %148 : i32 to vector<1x256xi32>
    %150 = arith.remsi %146, %149 : vector<1x256xi32>
    %c0_i32_59 = arith.constant 0 : i32
    %151 = vector.broadcast %c0_i32_59 : i32 to vector<1x256xi32>
    %152 = arith.cmpi ne, %150, %151 : vector<1x256xi32>
    %c0_i32_60 = arith.constant 0 : i32
    %153 = vector.broadcast %c0_i32_60 : i32 to vector<1x256xi32>
    %154 = arith.cmpi slt, %150, %153 : vector<1x256xi32>
    %c0_i32_61 = arith.constant 0 : i32
    %155 = arith.cmpi slt, %148, %c0_i32_61 : i32
    %156 = vector.broadcast %155 : i1 to vector<1x256xi1>
    %157 = vector.broadcast %156 : vector<1x256xi1> to vector<1x256xi1>
    %158 = arith.xori %154, %157 : vector<1x256xi1>
    %159 = arith.andi %158, %152 : vector<1x256xi1>
    %160 = vector.broadcast %148 : i32 to vector<1x256xi32>
    %161 = arith.addi %150, %160 : vector<1x256xi32>
    %162 = arith.select %159, %161, %150 : vector<1x256xi1>, vector<1x256xi32>
    %cst_62 = arith.constant 0.000000e+00 : f32
    %163 = vector.broadcast %cst_62 : f32 to vector<16x256xf32>
    %c17_i32_63 = arith.constant 17 : i32
    %164 = tpu.dynamic_rotate %145 by %c17_i32_63 dim 1 : vector<16x256xf32>, i32 -> vector<16x256xf32>
    %c16_i32_64 = arith.constant 16 : i32
    %165 = vector.broadcast %c16_i32_64 : i32 to vector<1x256xi32>
    %166 = arith.cmpi sge, %146, %165 : vector<1x256xi32>
    %c1_i32_65 = arith.constant 1 : i32
    %167 = vector.broadcast %c1_i32_65 : i32 to vector<1x256xi32>
    %168 = arith.cmpi sge, %162, %167 : vector<1x256xi32>
    %169 = arith.andi %166, %168 : vector<1x256xi1>
    %cst_66 = arith.constant 0.000000e+00 : f32
    %170 = vector.shape_cast %169 : vector<1x256xi1> to vector<1x256xi1>
    %171 = vector.broadcast %170 : vector<1x256xi1> to vector<16x256xi1>
    %172 = vector.broadcast %cst_66 : f32 to vector<16x256xf32>
    %173 = arith.select %171, %164, %172 : vector<16x256xi1>, vector<16x256xf32>
    %c0_67 = arith.constant 0 : index
    %c0_68 = arith.constant 0 : index
    %c0_69 = arith.constant 0 : index
    %174 = vector.load %arg3[%c0_67, %c0_68, %c0_69] : memref<9x16x16xf32, #tpu.memory_space<vmem>>, vector<1x16x16xf32>
    %175 = vector.shape_cast %174 : vector<1x16x16xf32> to vector<16x16xf32>
    %176 = arith.truncf %175 : vector<16x16xf32> to vector<16x16xbf16>
    %177 = arith.truncf %173 : vector<16x256xf32> to vector<16x256xbf16>
    %cst_70 = arith.constant dense<0.000000e+00> : vector<16x256xf32>
    %178 = tpu.matmul %176, %177, %cst_70 {dimension_numbers = #tpu.dot_dimension_numbers<[1], [0], [0], [1], [0, 0, 1, 1], [], []>} : vector<16x16xbf16>, vector<16x256xbf16>, vector<16x256xf32> -> vector<16x256xf32>
    %179 = arith.addf %163, %178 : vector<16x256xf32>
    %c16_i32_71 = arith.constant 16 : i32
    %180 = tpu.dynamic_rotate %145 by %c16_i32_71 dim 1 : vector<16x256xf32>, i32 -> vector<16x256xf32>
    %c16_i32_72 = arith.constant 16 : i32
    %181 = vector.broadcast %c16_i32_72 : i32 to vector<1x256xi32>
    %182 = arith.cmpi sge, %146, %181 : vector<1x256xi32>
    %cst_73 = arith.constant 0.000000e+00 : f32
    %183 = vector.shape_cast %182 : vector<1x256xi1> to vector<1x256xi1>
    %184 = vector.broadcast %183 : vector<1x256xi1> to vector<16x256xi1>
    %185 = vector.broadcast %cst_73 : f32 to vector<16x256xf32>
    %186 = arith.select %184, %180, %185 : vector<16x256xi1>, vector<16x256xf32>
    %c1_74 = arith.constant 1 : index
    %c0_75 = arith.constant 0 : index
    %c0_76 = arith.constant 0 : index
    %187 = vector.load %arg3[%c1_74, %c0_75, %c0_76] : memref<9x16x16xf32, #tpu.memory_space<vmem>>, vector<1x16x16xf32>
    %188 = vector.shape_cast %187 : vector<1x16x16xf32> to vector<16x16xf32>
    %189 = arith.truncf %188 : vector<16x16xf32> to vector<16x16xbf16>
    %190 = arith.truncf %186 : vector<16x256xf32> to vector<16x256xbf16>
    %cst_77 = arith.constant dense<0.000000e+00> : vector<16x256xf32>
    %191 = tpu.matmul %189, %190, %cst_77 {dimension_numbers = #tpu.dot_dimension_numbers<[1], [0], [0], [1], [0, 0, 1, 1], [], []>} : vector<16x16xbf16>, vector<16x256xbf16>, vector<16x256xf32> -> vector<16x256xf32>
    %192 = arith.addf %179, %191 : vector<16x256xf32>
    %c15_i32_78 = arith.constant 15 : i32
    %193 = tpu.dynamic_rotate %145 by %c15_i32_78 dim 1 : vector<16x256xf32>, i32 -> vector<16x256xf32>
    %c16_i32_79 = arith.constant 16 : i32
    %194 = vector.broadcast %c16_i32_79 : i32 to vector<1x256xi32>
    %195 = arith.cmpi sge, %146, %194 : vector<1x256xi32>
    %c14_i32_80 = arith.constant 14 : i32
    %196 = vector.broadcast %c14_i32_80 : i32 to vector<1x256xi32>
    %197 = arith.cmpi sle, %162, %196 : vector<1x256xi32>
    %198 = arith.andi %195, %197 : vector<1x256xi1>
    %cst_81 = arith.constant 0.000000e+00 : f32
    %199 = vector.shape_cast %198 : vector<1x256xi1> to vector<1x256xi1>
    %200 = vector.broadcast %199 : vector<1x256xi1> to vector<16x256xi1>
    %201 = vector.broadcast %cst_81 : f32 to vector<16x256xf32>
    %202 = arith.select %200, %193, %201 : vector<16x256xi1>, vector<16x256xf32>
    %c2_82 = arith.constant 2 : index
    %c0_83 = arith.constant 0 : index
    %c0_84 = arith.constant 0 : index
    %203 = vector.load %arg3[%c2_82, %c0_83, %c0_84] : memref<9x16x16xf32, #tpu.memory_space<vmem>>, vector<1x16x16xf32>
    %204 = vector.shape_cast %203 : vector<1x16x16xf32> to vector<16x16xf32>
    %205 = arith.truncf %204 : vector<16x16xf32> to vector<16x16xbf16>
    %206 = arith.truncf %202 : vector<16x256xf32> to vector<16x256xbf16>
    %cst_85 = arith.constant dense<0.000000e+00> : vector<16x256xf32>
    %207 = tpu.matmul %205, %206, %cst_85 {dimension_numbers = #tpu.dot_dimension_numbers<[1], [0], [0], [1], [0, 0, 1, 1], [], []>} : vector<16x16xbf16>, vector<16x256xbf16>, vector<16x256xf32> -> vector<16x256xf32>
    %208 = arith.addf %192, %207 : vector<16x256xf32>
    %c1_i32_86 = arith.constant 1 : i32
    %209 = tpu.dynamic_rotate %145 by %c1_i32_86 dim 1 : vector<16x256xf32>, i32 -> vector<16x256xf32>
    %c1_i32_87 = arith.constant 1 : i32
    %210 = vector.broadcast %c1_i32_87 : i32 to vector<1x256xi32>
    %211 = arith.cmpi sge, %162, %210 : vector<1x256xi32>
    %cst_88 = arith.constant 0.000000e+00 : f32
    %212 = vector.shape_cast %211 : vector<1x256xi1> to vector<1x256xi1>
    %213 = vector.broadcast %212 : vector<1x256xi1> to vector<16x256xi1>
    %214 = vector.broadcast %cst_88 : f32 to vector<16x256xf32>
    %215 = arith.select %213, %209, %214 : vector<16x256xi1>, vector<16x256xf32>
    %c3_89 = arith.constant 3 : index
    %c0_90 = arith.constant 0 : index
    %c0_91 = arith.constant 0 : index
    %216 = vector.load %arg3[%c3_89, %c0_90, %c0_91] : memref<9x16x16xf32, #tpu.memory_space<vmem>>, vector<1x16x16xf32>
    %217 = vector.shape_cast %216 : vector<1x16x16xf32> to vector<16x16xf32>
    %218 = arith.truncf %217 : vector<16x16xf32> to vector<16x16xbf16>
    %219 = arith.truncf %215 : vector<16x256xf32> to vector<16x256xbf16>
    %cst_92 = arith.constant dense<0.000000e+00> : vector<16x256xf32>
    %220 = tpu.matmul %218, %219, %cst_92 {dimension_numbers = #tpu.dot_dimension_numbers<[1], [0], [0], [1], [0, 0, 1, 1], [], []>} : vector<16x16xbf16>, vector<16x256xbf16>, vector<16x256xf32> -> vector<16x256xf32>
    %221 = arith.addf %208, %220 : vector<16x256xf32>
    %c4_93 = arith.constant 4 : index
    %c0_94 = arith.constant 0 : index
    %c0_95 = arith.constant 0 : index
    %222 = vector.load %arg3[%c4_93, %c0_94, %c0_95] : memref<9x16x16xf32, #tpu.memory_space<vmem>>, vector<1x16x16xf32>
    %223 = vector.shape_cast %222 : vector<1x16x16xf32> to vector<16x16xf32>
    %224 = arith.truncf %223 : vector<16x16xf32> to vector<16x16xbf16>
    %225 = arith.truncf %145 : vector<16x256xf32> to vector<16x256xbf16>
    %cst_96 = arith.constant dense<0.000000e+00> : vector<16x256xf32>
    %226 = tpu.matmul %224, %225, %cst_96 {dimension_numbers = #tpu.dot_dimension_numbers<[1], [0], [0], [1], [0, 0, 1, 1], [], []>} : vector<16x16xbf16>, vector<16x256xbf16>, vector<16x256xf32> -> vector<16x256xf32>
    %227 = arith.addf %221, %226 : vector<16x256xf32>
    %c255_i32_97 = arith.constant 255 : i32
    %228 = tpu.dynamic_rotate %145 by %c255_i32_97 dim 1 : vector<16x256xf32>, i32 -> vector<16x256xf32>
    %c14_i32_98 = arith.constant 14 : i32
    %229 = vector.broadcast %c14_i32_98 : i32 to vector<1x256xi32>
    %230 = arith.cmpi sle, %162, %229 : vector<1x256xi32>
    %cst_99 = arith.constant 0.000000e+00 : f32
    %231 = vector.shape_cast %230 : vector<1x256xi1> to vector<1x256xi1>
    %232 = vector.broadcast %231 : vector<1x256xi1> to vector<16x256xi1>
    %233 = vector.broadcast %cst_99 : f32 to vector<16x256xf32>
    %234 = arith.select %232, %228, %233 : vector<16x256xi1>, vector<16x256xf32>
    %c5_100 = arith.constant 5 : index
    %c0_101 = arith.constant 0 : index
    %c0_102 = arith.constant 0 : index
    %235 = vector.load %arg3[%c5_100, %c0_101, %c0_102] : memref<9x16x16xf32, #tpu.memory_space<vmem>>, vector<1x16x16xf32>
    %236 = vector.shape_cast %235 : vector<1x16x16xf32> to vector<16x16xf32>
    %237 = arith.truncf %236 : vector<16x16xf32> to vector<16x16xbf16>
    %238 = arith.truncf %234 : vector<16x256xf32> to vector<16x256xbf16>
    %cst_103 = arith.constant dense<0.000000e+00> : vector<16x256xf32>
    %239 = tpu.matmul %237, %238, %cst_103 {dimension_numbers = #tpu.dot_dimension_numbers<[1], [0], [0], [1], [0, 0, 1, 1], [], []>} : vector<16x16xbf16>, vector<16x256xbf16>, vector<16x256xf32> -> vector<16x256xf32>
    %240 = arith.addf %227, %239 : vector<16x256xf32>
    %c241_i32_104 = arith.constant 241 : i32
    %241 = tpu.dynamic_rotate %145 by %c241_i32_104 dim 1 : vector<16x256xf32>, i32 -> vector<16x256xf32>
    %c240_i32_105 = arith.constant 240 : i32
    %242 = vector.broadcast %c240_i32_105 : i32 to vector<1x256xi32>
    %243 = arith.cmpi slt, %146, %242 : vector<1x256xi32>
    %c1_i32_106 = arith.constant 1 : i32
    %244 = vector.broadcast %c1_i32_106 : i32 to vector<1x256xi32>
    %245 = arith.cmpi sge, %162, %244 : vector<1x256xi32>
    %246 = arith.andi %243, %245 : vector<1x256xi1>
    %cst_107 = arith.constant 0.000000e+00 : f32
    %247 = vector.shape_cast %246 : vector<1x256xi1> to vector<1x256xi1>
    %248 = vector.broadcast %247 : vector<1x256xi1> to vector<16x256xi1>
    %249 = vector.broadcast %cst_107 : f32 to vector<16x256xf32>
    %250 = arith.select %248, %241, %249 : vector<16x256xi1>, vector<16x256xf32>
    %c6_108 = arith.constant 6 : index
    %c0_109 = arith.constant 0 : index
    %c0_110 = arith.constant 0 : index
    %251 = vector.load %arg3[%c6_108, %c0_109, %c0_110] : memref<9x16x16xf32, #tpu.memory_space<vmem>>, vector<1x16x16xf32>
    %252 = vector.shape_cast %251 : vector<1x16x16xf32> to vector<16x16xf32>
    %253 = arith.truncf %252 : vector<16x16xf32> to vector<16x16xbf16>
    %254 = arith.truncf %250 : vector<16x256xf32> to vector<16x256xbf16>
    %cst_111 = arith.constant dense<0.000000e+00> : vector<16x256xf32>
    %255 = tpu.matmul %253, %254, %cst_111 {dimension_numbers = #tpu.dot_dimension_numbers<[1], [0], [0], [1], [0, 0, 1, 1], [], []>} : vector<16x16xbf16>, vector<16x256xbf16>, vector<16x256xf32> -> vector<16x256xf32>
    %256 = arith.addf %240, %255 : vector<16x256xf32>
    %c240_i32_112 = arith.constant 240 : i32
    %257 = tpu.dynamic_rotate %145 by %c240_i32_112 dim 1 : vector<16x256xf32>, i32 -> vector<16x256xf32>
    %c240_i32_113 = arith.constant 240 : i32
    %258 = vector.broadcast %c240_i32_113 : i32 to vector<1x256xi32>
    %259 = arith.cmpi slt, %146, %258 : vector<1x256xi32>
    %cst_114 = arith.constant 0.000000e+00 : f32
    %260 = vector.shape_cast %259 : vector<1x256xi1> to vector<1x256xi1>
    %261 = vector.broadcast %260 : vector<1x256xi1> to vector<16x256xi1>
    %262 = vector.broadcast %cst_114 : f32 to vector<16x256xf32>
    %263 = arith.select %261, %257, %262 : vector<16x256xi1>, vector<16x256xf32>
    %c7_115 = arith.constant 7 : index
    %c0_116 = arith.constant 0 : index
    %c0_117 = arith.constant 0 : index
    %264 = vector.load %arg3[%c7_115, %c0_116, %c0_117] : memref<9x16x16xf32, #tpu.memory_space<vmem>>, vector<1x16x16xf32>
    %265 = vector.shape_cast %264 : vector<1x16x16xf32> to vector<16x16xf32>
    %266 = arith.truncf %265 : vector<16x16xf32> to vector<16x16xbf16>
    %267 = arith.truncf %263 : vector<16x256xf32> to vector<16x256xbf16>
    %cst_118 = arith.constant dense<0.000000e+00> : vector<16x256xf32>
    %268 = tpu.matmul %266, %267, %cst_118 {dimension_numbers = #tpu.dot_dimension_numbers<[1], [0], [0], [1], [0, 0, 1, 1], [], []>} : vector<16x16xbf16>, vector<16x256xbf16>, vector<16x256xf32> -> vector<16x256xf32>
    %269 = arith.addf %256, %268 : vector<16x256xf32>
    %c239_i32_119 = arith.constant 239 : i32
    %270 = tpu.dynamic_rotate %145 by %c239_i32_119 dim 1 : vector<16x256xf32>, i32 -> vector<16x256xf32>
    %c240_i32_120 = arith.constant 240 : i32
    %271 = vector.broadcast %c240_i32_120 : i32 to vector<1x256xi32>
    %272 = arith.cmpi slt, %146, %271 : vector<1x256xi32>
    %c14_i32_121 = arith.constant 14 : i32
    %273 = vector.broadcast %c14_i32_121 : i32 to vector<1x256xi32>
    %274 = arith.cmpi sle, %162, %273 : vector<1x256xi32>
    %275 = arith.andi %272, %274 : vector<1x256xi1>
    %cst_122 = arith.constant 0.000000e+00 : f32
    %276 = vector.shape_cast %275 : vector<1x256xi1> to vector<1x256xi1>
    %277 = vector.broadcast %276 : vector<1x256xi1> to vector<16x256xi1>
    %278 = vector.broadcast %cst_122 : f32 to vector<16x256xf32>
    %279 = arith.select %277, %270, %278 : vector<16x256xi1>, vector<16x256xf32>
    %c8_123 = arith.constant 8 : index
    %c0_124 = arith.constant 0 : index
    %c0_125 = arith.constant 0 : index
    %280 = vector.load %arg3[%c8_123, %c0_124, %c0_125] : memref<9x16x16xf32, #tpu.memory_space<vmem>>, vector<1x16x16xf32>
    %281 = vector.shape_cast %280 : vector<1x16x16xf32> to vector<16x16xf32>
    %282 = arith.truncf %281 : vector<16x16xf32> to vector<16x16xbf16>
    %283 = arith.truncf %279 : vector<16x256xf32> to vector<16x256xbf16>
    %cst_126 = arith.constant dense<0.000000e+00> : vector<16x256xf32>
    %284 = tpu.matmul %282, %283, %cst_126 {dimension_numbers = #tpu.dot_dimension_numbers<[1], [0], [0], [1], [0, 0, 1, 1], [], []>} : vector<16x16xbf16>, vector<16x256xbf16>, vector<16x256xf32> -> vector<16x256xf32>
    %285 = arith.addf %269, %284 : vector<16x256xf32>
    %c0_127 = arith.constant 0 : index
    %c0_128 = arith.constant 0 : index
    %286 = vector.load %arg4[%c0_127, %c0_128] : memref<16x1xf32, #tpu.memory_space<vmem>>, vector<16x1xf32>
    %287 = vector.broadcast %286 : vector<16x1xf32> to vector<16x256xf32>
    %288 = arith.addf %285, %287 : vector<16x256xf32>
    %289 = arith.addf %288, %145 : vector<16x256xf32>
    %cst_129 = arith.constant 0.000000e+00 : f32
    %290 = vector.broadcast %cst_129 : f32 to vector<16x256xf32>
    %291 = arith.maximumf %289, %290 : vector<16x256xf32>
    %cst_130 = arith.constant dense<0.000000e+00> : vector<16xf32>
    %292 = vector.multi_reduction <add>, %291, %cst_130 [1] : vector<16x256xf32> to vector<16xf32>
    %293 = vector.shape_cast %292 : vector<16xf32> to vector<16x1xf32>
    %cst_131 = arith.constant 2.560000e+02 : f32
    %294 = vector.broadcast %cst_131 : f32 to vector<16x1xf32>
    %295 = arith.divf %293, %294 : vector<16x1xf32>
    %c0_132 = arith.constant 0 : index
    %c0_133 = arith.constant 0 : index
    %296 = vector.load %arg5[%c0_132, %c0_133] : memref<2x16xf32, #tpu.memory_space<vmem>>, vector<2x16xf32>
    %297 = arith.truncf %296 : vector<2x16xf32> to vector<2x16xbf16>
    %298 = arith.truncf %295 : vector<16x1xf32> to vector<16x1xbf16>
    %cst_134 = arith.constant dense<0.000000e+00> : vector<2x1xf32>
    %299 = tpu.matmul %297, %298, %cst_134 {dimension_numbers = #tpu.dot_dimension_numbers<[1], [0], [0], [1], [0, 0, 1, 1], [], []>} : vector<2x16xbf16>, vector<16x1xbf16>, vector<2x1xf32> -> vector<2x1xf32>
    %c0_135 = arith.constant 0 : index
    %c0_136 = arith.constant 0 : index
    %300 = vector.load %arg6[%c0_135, %c0_136] : memref<2x1xf32, #tpu.memory_space<vmem>>, vector<2x1xf32>
    %301 = arith.addf %299, %300 : vector<2x1xf32>
    %c0_137 = arith.constant 0 : index
    %c0_138 = arith.constant 0 : index
    %302 = vector.load %arg7[%c0_137, %c0_138] : memref<2x1xf32, #tpu.memory_space<vmem>>, vector<2x1xf32>
    tpu.vector_store %arg7[%c0_137, %c0_138], %301 {strides = array<i32>} : memref<2x1xf32, #tpu.memory_space<vmem>>, vector<2x1xf32>,
    return
  }
}

</mosaic_0001>

<bundles_post_ra>
// kernel: squeeze.32
= control target key start
LH: loop header
LB: loop body
LE: loop exit
PB: predicated region body
PF: predicated region fallthrough
CT: control target
= control target key end

     0   :  { %2 = vsyncpa [#allocation1], 0  ;;  %s202_s6 = smov [#allocation0]   ;;  %s247_s0 = inlined_call_operand.hbm [shape: f32[1,3,16,16], index: 0, kind: input, shape index: {}]   ;;  %s248_s1 = inlined_call_operand.vmem [shape: f32[3,256], index: 1, kind: output, shape index: {}]  }
   0x1   :  { %s7_s7 = sshll.u32 %s202_s6, 4  ;;  %s8_s7 = int_to_ptr.vmem [resolvable:$true] %s7_s7 }
   0x2   :  { %s188_s8 = scalar_lea.vmem %s8_s7, 768  ;;  %p193_p1 = scmp.lt.s32.totalorder %s8_s7, %s8_s7 }
   0x3   :  { %p189_p0 = scmp.ne.s32.totalorder %s8_s7, %s188_s8  ;;  %p194_p2 = scmp.lt.s32.totalorder %s188_s8, %s188_s8 }
   0x5   :  { %p195_p3 = por %p194_p2, %p193_p1 }
   0x7   :  { %p196_p4 = pnand %p195_p3, %p189_p0 }
   0x9   :  { %199 = shalt.err (!%p196_p4)
}
   0xa   :  { %10 = dma.hbm_to_vmem [thread:$0]  %s247_s0, 768, %s8_s7, [#allocation1]  }
   0xb   :  { %200 = dma.done.wait [#allocation1], 768  }
   0xc   :  { %201 = vsyncadd [#allocation1], 4294966528  ;;  %s24_s0 = smov 3  ;;  %s27_s11 = smov 12  ;;  %vm29_vm0 = vcmask 1043458   ;;  %vm15_vm1 = vcmask 1045508  }
   0xd   :  { %s32_s12 = smov 48  ;;  %s62_s13 = smov 3  ;;  %v25_v0 = vld [vmem:[#allocation0 + $0x7] ss:$16 sm:%s24_s0]   ;;  %vm17_vm2 = vcmask 130048   ;;  %vm38_vm3 = vcmask 1048448  }
   0xe   :  { %s65_s14 = smov 12  ;;  %s70_s15 = smov 48  ;;  %v28_v1 = vld [vmem:[#allocation0 + $0x57] ss:$-24 sm:%s27_s11]   ;;  %v63_v4 = vld [vmem:[#allocation0 + $0x5] ss:$16 sm:%s62_s13]  }
   0xf   :  { %s43_s16 = smov 3  ;;  %s46_s17 = smov 12  ;;  %v33_v2 = vld [vmem:[#allocation0 - $0x21] ss:$16 sm:%s32_s12]   ;;  %v30_v3 = vsel %vm29_vm0, %v28_v1, %v25_v0  ;;  %v66_v5 = vld [vmem:[#allocation0 + $0x55] ss:$-24 sm:%s65_s14]  }
  0x10   :  { %s51_s18 = smov 48  ;;  %s81_s19 = smov 3  ;;  %v71_v6 = vld [vmem:[#allocation0 - $0x23] ss:$16 sm:%s70_s15]   ;;  %v35_v7 = vsel %vm15_vm1, %v33_v2, %v30_v3  ;;  %v68_v8 = vsel %vm29_vm0, %v66_v5, %v63_v4  ;;  %v44_v9 = vld [vmem:[#allocation0 + $0x6] ss:$16 sm:%s43_s16]  }
  0x11   :  { %s84_s20 = smov 12  ;;  %v47_v10 = vld [vmem:[#allocation0 + $0x56] ss:$-24 sm:%s46_s17]   ;;  %s203_s21 = smov 112   ;;  %v73_v12 = vsel %vm15_vm1, %v71_v6, %v68_v8  ;;  %v82_v14 = vld [vmem:[#allocation0 + $0x4] ss:$16 sm:%s81_s19]  }
  0x12   :  { %v52_v11 = vld [vmem:[#allocation0 - $0x22] ss:$16 sm:%s51_s18]   ;;  %36 = vrot.lane.b32.xlu0 %v35_v7, %s203_s21  ;;  %v49_v13 = vsel %vm29_vm0, %v47_v10, %v44_v9  ;;  %v85_v15 = vld [vmem:[#allocation0 + $0x54] ss:$-24 sm:%s84_s20]   ;;  %s89_s22 = smov 48  ;;  %s204_s23 = smov 80  }
  0x13   :  { %74 = vrot.lane.b32.xlu1 %v73_v12, %s204_s23  ;;  %v54_v16 = vsel %vm15_vm1, %v52_v11, %v49_v13  ;;  %v87_v17 = vsel %vm29_vm0, %v85_v15, %v82_v14  ;;  %v90_v18 = vld [vmem:[#allocation0 - $0x24] ss:$16 sm:%s89_s22]   ;;  %s100_s24 = smov 3  ;;  %s103_s25 = smov 12  ;;  %vm57_vm4 = vcmask 917248   ;;  %vm76_vm5 = vcmask 786048  }
  0x14   :  { %v92_v19 = vsel %vm15_vm1, %v90_v18, %v87_v17  ;;  %v101_v20 = vld [vmem:[#allocation0 + $0x3] ss:$16 sm:%s100_s24]   ;;  %s108_s26 = smov 48  ;;  %s119_s27 = smov 3  ;;  %vm95_vm6 = vcmask 654848   ;;  %vm114_vm7 = vcmask 523648  }
  0x15   :  { %v104_v21 = vld [vmem:[#allocation0 + $0x53] ss:$-24 sm:%s103_s25]   ;;  %s122_s28 = smov 12  ;;  %s205_s29 = smov 96   ;;  %v120_v24 = vld [vmem:[#allocation0 + $0x2] ss:$16 sm:%s119_s27]  }
  0x16   :  { %v106_v22 = vsel %vm29_vm0, %v104_v21, %v101_v20  ;;  %v109_v23 = vld [vmem:[#allocation0 - $0x25] ss:$16 sm:%s108_s26]   ;;  %55 = vrot.lane.b32.xlu0 %v54_v16, %s205_s29  ;;  %v123_v25 = vld [vmem:[#allocation0 + $0x52] ss:$-24 sm:%s122_s28]   ;;  %s127_s30 = smov 48  ;;  %s206_s2 = smov 64  }
  0x17   :  { %93 = vrot.lane.b32.xlu1 %v92_v19, %s206_s2  ;;  %v111_v26 = vsel %vm15_vm1, %v109_v23, %v106_v22  ;;  %v125_v27 = vsel %vm29_vm0, %v123_v25, %v120_v24  ;;  %v128_v28 = vld [vmem:[#allocation0 - $0x26] ss:$16 sm:%s127_s30]   ;;  %s138_s3 = smov 3  ;;  %s141_s4 = smov 12  ;;  %vm133_vm8 = vcmask 392448   ;;  %vm152_vm9 = vcmask 261248  }
  0x18   :  { %v130_v29 = vsel %vm15_vm1, %v128_v28, %v125_v27  ;;  %v139_v30 = vld [vmem:[#allocation0 + $0x1] ss:$16 sm:%s138_s3]   ;;  %s146_s5 = smov 48  ;;  %s13_s6 = smov 48 }
  0x19   :  { %v142_v31 = vld [vmem:[#allocation0 + $0x51] ss:$-24 sm:%s141_s4]   ;;  %v12_v34 = vld [vmem:[#allocation0] ss:$8 sm:$0xf]   ;;  %s207_s7 = smov 48  }
  0x1a   :  { %v144_v32 = vsel %vm29_vm0, %v142_v31, %v139_v30  ;;  %v147_v33 = vld [vmem:[#allocation0 - $0x27] ss:$16 sm:%s146_s5]   ;;  %112 = vrot.lane.b32.xlu0 %v111_v26, %s207_s7  ;;  %v14_v35 = vld [vmem:[#allocation0] ss:$8 sm:%s13_s6]   ;;  %s208_s8 = smov 32   ;;  %s209_s9 = smov 16  }
  0x1b   :  { %131 = vrot.lane.b32.xlu1 %v130_v29, %s208_s8  ;;  %v149_v36 = vsel %vm15_vm1, %v147_v33, %v144_v32  ;;  %v16_v37 = vsel %vm15_vm1, %v14_v35, %v12_v34 }
  0x1c   :  { %18 = vst.msk [vmem:[#allocation2] ss:$8 sm:$0x3] %vm17_vm2, %v16_v37   ;;  %20 = vst.msk [vmem:[#allocation2 - $0xf] ss:$8 sm:$0xc] %vm17_vm2, %v16_v37  }
  0x1d   :  { %22 = vst.msk [vmem:[#allocation2 - $0x1e] ss:$8 sm:$0x30] %vm17_vm2, %v16_v37  }
  0x1e   :  { %150 = vrot.lane.b32.xlu0 %v149_v36, %s209_s9 }
  0x84   :  { %v37_v38 = vpop.permute.xlu0 %36  }
  0x85   :  { %v75_v39 = vpop.permute.xlu1 %74   ;;  %39 = vst.msk [vmem:[#allocation2] sm:$0x7] %vm38_vm3, %v37_v38   ;;  %41 = vst.msk [vmem:[#allocation2 + $0x5] sm:$0x38] %vm38_vm3, %v37_v38  }
  0x88   :  { %v56_v40 = vpop.permute.xlu0 %55  }
  0x89   :  { %58 = vst.msk [vmem:[#allocation2] sm:$0x7] %vm57_vm4, %v56_v40   ;;  %60 = vst.msk [vmem:[#allocation2 + $0x5] sm:$0x38] %vm57_vm4, %v56_v40   ;;  %v94_v41 = vpop.permute.xlu1 %93  }
  0x8a   :  { %77 = vst.msk [vmem:[#allocation2] sm:$0x7] %vm76_vm5, %v75_v39   ;;  %79 = vst.msk [vmem:[#allocation2 + $0x5] sm:$0x38] %vm76_vm5, %v75_v39  }
  0x8b   :  { %96 = vst.msk [vmem:[#allocation2] sm:$0x7] %vm95_vm6, %v94_v41   ;;  %98 = vst.msk [vmem:[#allocation2 + $0x5] sm:$0x38] %vm95_vm6, %v94_v41  }
  0x8c   :  { %v113_v42 = vpop.permute.xlu0 %112  }
  0x8d   :  { %115 = vst.msk [vmem:[#allocation2] sm:$0x7] %vm114_vm7, %v113_v42   ;;  %117 = vst.msk [vmem:[#allocation2 + $0x5] sm:$0x38] %vm114_vm7, %v113_v42   ;;  %v132_v43 = vpop.permute.xlu1 %131  }
  0x8e   :  { %134 = vst.msk [vmem:[#allocation2] sm:$0x7] %vm133_vm8, %v132_v43   ;;  %136 = vst.msk [vmem:[#allocation2 + $0x5] sm:$0x38] %vm133_vm8, %v132_v43  }
  0x90   :  { %v151_v44 = vpop.permute.xlu0 %150  }
  0x91   :  { %153 = vst.msk [vmem:[#allocation2] sm:$0x7] %vm152_vm9, %v151_v44   ;;  %155 = vst.msk [vmem:[#allocation2 + $0x5] sm:$0x38] %vm152_vm9, %v151_v44  }
  0x98   :  { %v160_v45 = vld [vmem:[#allocation2] sm:$0xf]  ;;  %v165_v46 = vld [vmem:[#allocation2 + $0x8] sm:$0xf] }
  0x99   :  { %163 = vst [vmem:[%s248_s1] sm:$0xf] %v160_v45  ;;  %171 = vst [vmem:[%s248_s1 + $0x4] sm:$0xf] %v165_v46 }
  0x9a   :  { %170 = vsyncpa [#allocation1], 1 }

// kernel: squeeze.33
= control target key start
LH: loop header
LB: loop body
LE: loop exit
PB: predicated region body
PF: predicated region fallthrough
CT: control target
= control target key end

     0   :  { %2 = vsyncpa [#allocation1], 0  ;;  %s399_s6 = smov [#allocation0]   ;;  %s538_s0 = inlined_call_operand.hbm [shape: f32[1,8,16,16], index: 0, kind: input, shape index: {}]   ;;  %s539_s1 = inlined_call_operand.vmem [shape: f32[8,256], index: 1, kind: output, shape index: {}]  }
   0x1   :  { %s7_s7 = sshll.u32 %s399_s6, 4  ;;  %s8_s7 = int_to_ptr.vmem [resolvable:$true] %s7_s7 }
   0x2   :  { %s385_s8 = scalar_lea.vmem %s8_s7, 2048  ;;  %p390_p1 = scmp.lt.s32.totalorder %s8_s7, %s8_s7 }
   0x3   :  { %p386_p0 = scmp.ne.s32.totalorder %s8_s7, %s385_s8  ;;  %p391_p2 = scmp.lt.s32.totalorder %s385_s8, %s385_s8 }
   0x5   :  { %p392_p3 = por %p391_p2, %p390_p1 }
   0x7   :  { %p393_p4 = pnand %p392_p3, %p386_p0 }
   0x9   :  { %396 = shalt.err (!%p393_p4)
}
   0xa   :  { %10 = dma.hbm_to_vmem [thread:$0]  %s538_s0, 2048, %s8_s7, [#allocation1]  }
   0xb   :  { %397 = dma.done.wait [#allocation1], 2048  }
   0xc   :  { %398 = vsyncadd [#allocation1], 4294965248  ;;  %s85_s0 = smov 3  ;;  %s88_s11 = smov 12  ;;  %vm45_vm0 = vcmask 1043458   ;;  %vm50_vm1 = vcmask 1045508  }
   0xd   :  { %s93_s12 = smov 48  ;;  %s98_s13 = smov 192  ;;  %vm55_vm2 = vcmask 1047558   ;;  %v86_v0 = vld [vmem:[#allocation0 + $0x6] ss:$16 sm:%s85_s0]   ;;  %vm14_vm3 = vcmask 1047556  }
   0xe   :  { %s40_s14 = smov 3  ;;  %s43_s15 = smov 12  ;;  %v89_v1 = vld [vmem:[#allocation0 + $0x6] ss:$16 sm:%s88_s11]   ;;  %vm16_vm4 = vcmask 130048   ;;  %vm59_vm5 = vcmask 1048448  }
   0xf   :  { %s48_s16 = smov 48  ;;  %s53_s17 = smov 192  ;;  %v94_v2 = vld [vmem:[#allocation0 + $0x6] ss:$16 sm:%s93_s12]   ;;  %v91_v3 = vsel %vm45_vm0, %v89_v1, %v86_v0  ;;  %v41_v5 = vld [vmem:[#allocation0 + $0x7] ss:$16 sm:%s40_s14]  }
  0x10   :  { %s107_s18 = smov 3  ;;  %s110_s19 = smov 12  ;;  %v99_v4 = vld [vmem:[#allocation0 + $0x6] ss:$16 sm:%s98_s13]   ;;  %v44_v6 = vld [vmem:[#allocation0 + $0x7] ss:$16 sm:%s43_s15]   ;;  %v96_v7 = vsel %vm50_vm1, %v94_v2, %v91_v3 }
  0x11   :  { %s115_s20 = smov 48  ;;  %v46_v8 = vsel %vm45_vm0, %v44_v6, %v41_v5  ;;  %v49_v9 = vld [vmem:[#allocation0 + $0x7] ss:$16 sm:%s48_s16]   ;;  %v108_v11 = vld [vmem:[#allocation0 + $0xe] ss:$16 sm:%s107_s18]   ;;  %v101_v12 = vsel %vm55_vm2, %v99_v4, %v96_v7  ;;  %s120_s21 = smov 192 }
  0x12   :  { %v54_v10 = vld [vmem:[#allocation0 + $0x7] ss:$16 sm:%s53_s17]   ;;  %v51_v13 = vsel %vm50_vm1, %v49_v9, %v46_v8  ;;  %v111_v14 = vld [vmem:[#allocation0 + $0xe] ss:$16 sm:%s110_s19]   ;;  %s62_s22 = smov 3  ;;  %s400_s23 = smov 96  }
  0x13   :  { %v116_v15 = vld [vmem:[#allocation0 + $0xe] ss:$16 sm:%s115_s20]   ;;  %102 = vrot.lane.b32.xlu1 %v101_v12, %s400_s23  ;;  %v56_v16 = vsel %vm55_vm2, %v54_v10, %v51_v13  ;;  %v113_v17 = vsel %vm45_vm0, %v111_v14, %v108_v11  ;;  %v63_v19 = vld [vmem:[#allocation0 + $0xf] ss:$16 sm:%s62_s22]   ;;  %s65_s24 = smov 12  ;;  %s70_s25 = smov 48 }
  0x14   :  { %v121_v18 = vld [vmem:[#allocation0 + $0xe] ss:$16 sm:%s120_s21]   ;;  %s401_s26 = smov 112   ;;  %v118_v20 = vsel %vm50_vm1, %v116_v15, %v113_v17  ;;  %v66_v21 = vld [vmem:[#allocation0 + $0xf] ss:$16 sm:%s65_s24]   ;;  %s75_s27 = smov 192 }
  0x15   :  { %57 = vrot.lane.b32.xlu0 %v56_v16, %s401_s26  ;;  %v71_v22 = vld [vmem:[#allocation0 + $0xf] ss:$16 sm:%s70_s25]   ;;  %v123_v23 = vsel %vm55_vm2, %v121_v18, %v118_v20  ;;  %v68_v24 = vsel %vm45_vm0, %v66_v21, %v63_v19  ;;  %s152_s28 = smov 3  ;;  %s155_s29 = smov 12  ;;  %vm104_vm6 = vcmask 917248   ;;  %vm149_vm7 = vcmask 786048  }
  0x16   :  { %v76_v25 = vld [vmem:[#allocation0 + $0xf] ss:$16 sm:%s75_s27]   ;;  %v73_v26 = vsel %vm50_vm1, %v71_v22, %v68_v24  ;;  %v153_v27 = vld [vmem:[#allocation0 + $0xd] ss:$16 sm:%s152_s28]   ;;  %s160_s30 = smov 48  ;;  %s165_s2 = smov 192 }
  0x17   :  { %v156_v28 = vld [vmem:[#allocation0 + $0xd] ss:$16 sm:%s155_s29]   ;;  %124 = vrot.lane.b32.xlu1 %v123_v23, %s400_s23  ;;  %v78_v29 = vsel %vm55_vm2, %v76_v25, %v73_v26  ;;  %s130_s3 = smov 3  ;;  %s133_s4 = smov 12  ;;  %vm194_vm8 = vcmask 654848   ;;  %vm239_vm9 = vcmask 523648  }
  0x18   :  { %v158_v30 = vsel %vm45_vm0, %v156_v28, %v153_v27  ;;  %v161_v31 = vld [vmem:[#allocation0 + $0xd] ss:$16 sm:%s160_s30]   ;;  %v131_v34 = vld [vmem:[#allocation0 + $0x5] ss:$16 sm:%s130_s3]   ;;  %s138_s5 = smov 48  ;;  %s143_s6 = smov 192 }
  0x19   :  { %v166_v32 = vld [vmem:[#allocation0 + $0xd] ss:$16 sm:%s165_s2]   ;;  %79 = vrot.lane.b32.xlu0 %v78_v29, %s401_s26  ;;  %v163_v33 = vsel %vm50_vm1, %v161_v31, %v158_v30  ;;  %v134_v35 = vld [vmem:[#allocation0 + $0x5] ss:$16 sm:%s133_s4]   ;;  %s197_s7 = smov 3  ;;  %s200_s8 = smov 12 }
  0x1a   :  { %v168_v36 = vsel %vm55_vm2, %v166_v32, %v163_v33  ;;  %v136_v37 = vsel %vm45_vm0, %v134_v35, %v131_v34  ;;  %v139_v38 = vld [vmem:[#allocation0 + $0x5] ss:$16 sm:%s138_s5]   ;;  %v198_v41 = vld [vmem:[#allocation0 + $0xc] ss:$16 sm:%s197_s7]   ;;  %s205_s9 = smov 48  ;;  %s402_s10 = smov 80  }
  0x1b   :  { %v144_v39 = vld [vmem:[#allocation0 + $0x5] ss:$16 sm:%s143_s6]   ;;  %v141_v40 = vsel %vm50_vm1, %v139_v38, %v136_v37  ;;  %169 = vrot.lane.b32.xlu1 %v168_v36, %s402_s10  ;;  %v201_v43 = vld [vmem:[#allocation0 + $0xc] ss:$16 sm:%s200_s8]   ;;  %s210_s0 = smov 192  ;;  %s175_s11 = smov 3 }
  0x1c   :  { %v146_v42 = vsel %vm55_vm2, %v144_v39, %v141_v40  ;;  %v206_v44 = vld [vmem:[#allocation0 + $0xc] ss:$16 sm:%s205_s9]   ;;  %v203_v45 = vsel %vm45_vm0, %v201_v43, %v198_v41  ;;  %v176_v47 = vld [vmem:[#allocation0 + $0x4] ss:$16 sm:%s175_s11]   ;;  %s178_s12 = smov 12  ;;  %s183_s13 = smov 48 }
  0x1d   :  { %147 = vrot.lane.b32.xlu0 %v146_v42, %s402_s10  ;;  %v211_v46 = vld [vmem:[#allocation0 + $0xc] ss:$16 sm:%s210_s0]   ;;  %v208_v48 = vsel %vm50_vm1, %v206_v44, %v203_v45  ;;  %v179_v49 = vld [vmem:[#allocation0 + $0x4] ss:$16 sm:%s178_s12]   ;;  %s188_s14 = smov 192  ;;  %s242_s15 = smov 3 }
  0x1e   :  { %v184_v50 = vld [vmem:[#allocation0 + $0x4] ss:$16 sm:%s183_s13]   ;;  %v213_v51 = vsel %vm55_vm2, %v211_v46, %v208_v48  ;;  %v181_v52 = vsel %vm45_vm0, %v179_v49, %v176_v47  ;;  %s245_s16 = smov 12  ;;  %s403_s17 = smov 64   ;;  %v243_v55 = vld [vmem:[#allocation0 + $0xb] ss:$16 sm:%s242_s15]  }
  0x1f   :  { %v189_v53 = vld [vmem:[#allocation0 + $0x4] ss:$16 sm:%s188_s14]   ;;  %214 = vrot.lane.b32.xlu1 %v213_v51, %s403_s17  ;;  %v186_v54 = vsel %vm50_vm1, %v184_v50, %v181_v52  ;;  %v246_v56 = vld [vmem:[#allocation0 + $0xb] ss:$16 sm:%s245_s16]   ;;  %s250_s18 = smov 48  ;;  %s255_s19 = smov 192 }
  0x20   :  { %v191_v57 = vsel %vm55_vm2, %v189_v53, %v186_v54  ;;  %v248_v58 = vsel %vm45_vm0, %v246_v56, %v243_v55  ;;  %v251_v59 = vld [vmem:[#allocation0 + $0xb] ss:$16 sm:%s250_s18]   ;;  %s220_s20 = smov 3  ;;  %s223_s21 = smov 12  ;;  %vm284_vm10 = vcmask 392448   ;;  %vm329_vm11 = vcmask 261248  }
  0x21   :  { %v256_v60 = vld [vmem:[#allocation0 + $0xb] ss:$16 sm:%s255_s19]   ;;  %192 = vrot.lane.b32.xlu0 %v191_v57, %s403_s17  ;;  %v253_v61 = vsel %vm50_vm1, %v251_v59, %v248_v58  ;;  %v221_v62 = vld [vmem:[#allocation0 + $0x3] ss:$16 sm:%s220_s20]   ;;  %s228_s22 = smov 48  ;;  %s233_s23 = smov 192 }
  0x22   :  { %v224_v63 = vld [vmem:[#allocation0 + $0x3] ss:$16 sm:%s223_s21]   ;;  %v258_v0 = vsel %vm55_vm2, %v256_v60, %v253_v61  ;;  %s287_s24 = smov 3  ;;  %s404_s25 = smov 48  }
  0x23   :  { %v226_v1 = vsel %vm45_vm0, %v224_v63, %v221_v62  ;;  %v229_v2 = vld [vmem:[#allocation0 + $0x3] ss:$16 sm:%s228_s22]   ;;  %259 = vrot.lane.b32.xlu1 %v258_v0, %s404_s25  ;;  %v288_v5 = vld [vmem:[#allocation0 + $0xa] ss:$16 sm:%s287_s24]   ;;  %s290_s26 = smov 12  ;;  %s295_s27 = smov 48 }
  0x24   :  { %v234_v3 = vld [vmem:[#allocation0 + $0x3] ss:$16 sm:%s233_s23]   ;;  %v231_v4 = vsel %vm50_vm1, %v229_v2, %v226_v1  ;;  %v291_v7 = vld [vmem:[#allocation0 + $0xa] ss:$16 sm:%s290_s26]   ;;  %s300_s28 = smov 192  ;;  %s265_s29 = smov 3 }
  0x25   :  { %v236_v6 = vsel %vm55_vm2, %v234_v3, %v231_v4  ;;  %v296_v8 = vld [vmem:[#allocation0 + $0xa] ss:$16 sm:%s295_s27]   ;;  %v293_v9 = vsel %vm45_vm0, %v291_v7, %v288_v5  ;;  %v266_v11 = vld [vmem:[#allocation0 + $0x2] ss:$16 sm:%s265_s29]   ;;  %s268_s30 = smov 12  ;;  %s273_s2 = smov 48 }
  0x26   :  { %237 = vrot.lane.b32.xlu0 %v236_v6, %s404_s25  ;;  %v301_v10 = vld [vmem:[#allocation0 + $0xa] ss:$16 sm:%s300_s28]   ;;  %v298_v12 = vsel %vm50_vm1, %v296_v8, %v293_v9  ;;  %v269_v13 = vld [vmem:[#allocation0 + $0x2] ss:$16 sm:%s268_s30]   ;;  %s278_s3 = smov 192  ;;  %s332_s4 = smov 3 }
  0x27   :  { %v274_v14 = vld [vmem:[#allocation0 + $0x2] ss:$16 sm:%s273_s2]   ;;  %v303_v15 = vsel %vm55_vm2, %v301_v10, %v298_v12  ;;  %v271_v16 = vsel %vm45_vm0, %v269_v13, %v266_v11  ;;  %s335_s5 = smov 12  ;;  %s405_s6 = smov 32   ;;  %v333_v19 = vld [vmem:[#allocation0 + $0x9] ss:$16 sm:%s332_s4]  }
  0x28   :  { %v279_v17 = vld [vmem:[#allocation0 + $0x2] ss:$16 sm:%s278_s3]   ;;  %304 = vrot.lane.b32.xlu1 %v303_v15, %s405_s6  ;;  %v276_v18 = vsel %vm50_vm1, %v274_v14, %v271_v16  ;;  %v336_v20 = vld [vmem:[#allocation0 + $0x9] ss:$16 sm:%s335_s5]   ;;  %s340_s7 = smov 48  ;;  %s345_s8 = smov 192 }
  0x29   :  { %v281_v21 = vsel %vm55_vm2, %v279_v17, %v276_v18  ;;  %v338_v22 = vsel %vm45_vm0, %v336_v20, %v333_v19  ;;  %v341_v23 = vld [vmem:[#allocation0 + $0x9] ss:$16 sm:%s340_s7]   ;;  %s310_s9 = smov 3  ;;  %s313_s10 = smov 12 }
  0x2a   :  { %v346_v24 = vld [vmem:[#allocation0 + $0x9] ss:$16 sm:%s345_s8]   ;;  %282 = vrot.lane.b32.xlu0 %v281_v21, %s405_s6  ;;  %v343_v25 = vsel %vm50_vm1, %v341_v23, %v338_v22  ;;  %v311_v26 = vld [vmem:[#allocation0 + $0x1] ss:$16 sm:%s310_s9]   ;;  %s318_s0 = smov 48  ;;  %s323_s11 = smov 192 }
  0x2b   :  { %v314_v27 = vld [vmem:[#allocation0 + $0x1] ss:$16 sm:%s313_s10]   ;;  %v348_v28 = vsel %vm55_vm2, %v346_v24, %v343_v25  ;;  %s406_s12 = smov 16   ;;  %v12_v33 = vld [vmem:[#allocation0] ss:$8 sm:$0xf]  }
  0x2c   :  { %v316_v29 = vsel %vm45_vm0, %v314_v27, %v311_v26  ;;  %v319_v30 = vld [vmem:[#allocation0 + $0x1] ss:$16 sm:%s318_s0]   ;;  %349 = vrot.lane.b32.xlu1 %v348_v28, %s406_s12  ;;  %v13_v34 = vld [vmem:[#allocation0] ss:$8 sm:$0xf0]  }
  0x2d   :  { %v324_v31 = vld [vmem:[#allocation0 + $0x1] ss:$16 sm:%s323_s11]   ;;  %v321_v32 = vsel %vm50_vm1, %v319_v30, %v316_v29  ;;  %v15_v36 = vsel %vm14_vm3, %v13_v34, %v12_v33  ;;  %v25_v37 = vld [vmem:[#allocation0 + $0x40] ss:$8 sm:$0xf]  }
  0x2e   :  { %v326_v35 = vsel %vm55_vm2, %v324_v31, %v321_v32  ;;  %v27_v38 = vld [vmem:[#allocation0 + $0x40] ss:$8 sm:$0xf0]   ;;  %17 = vst.msk [vmem:[%s539_s1] ss:$8 sm:$0x3] %vm16_vm4, %v15_v36  }
  0x2f   :  { %327 = vrot.lane.b32.xlu0 %v326_v35, %s406_s12  ;;  %355 = vst.msk [vmem:[%s539_s1 - $0xf] ss:$8 sm:$0xc] %vm16_vm4, %v15_v36   ;;  %356 = vst.msk [vmem:[%s539_s1 - $0x1e] ss:$8 sm:$0x30] %vm16_vm4, %v15_v36   ;;  %v29_v39 = vsel %vm14_vm3, %v27_v38, %v25_v37 }
  0x30   :  { %357 = vst.msk [vmem:[%s539_s1 - $0x2d] ss:$8 sm:$0xc0] %vm16_vm4, %v15_v36   ;;  %358 = vst.msk [vmem:[%s539_s1 + $0x4] ss:$8 sm:$0x3] %vm16_vm4, %v29_v39  }
  0x31   :  { %359 = vst.msk [vmem:[%s539_s1 - $0xb] ss:$8 sm:$0xc] %vm16_vm4, %v29_v39   ;;  %360 = vst.msk [vmem:[%s539_s1 - $0x1a] ss:$8 sm:$0x30] %vm16_vm4, %v29_v39  }
  0x32   :  { %361 = vst.msk [vmem:[%s539_s1 - $0x29] ss:$8 sm:$0xc0] %vm16_vm4, %v29_v39  }
  0x85   :  { %v103_v40 = vpop.permute.xlu1 %102  }
  0x87   :  { %v58_v41 = vpop.permute.xlu0 %57  }
  0x88   :  { %60 = vst.msk [vmem:[%s539_s1] sm:$0xff] %vm59_vm5, %v58_v41  }
  0x89   :  { %105 = vst.msk [vmem:[%s539_s1] sm:$0xff] %vm104_vm6, %v103_v40   ;;  %v125_v42 = vpop.permute.xlu1 %124  }
  0x8b   :  { %v80_v43 = vpop.permute.xlu0 %79  }
  0x8c   :  { %362 = vst.msk [vmem:[%s539_s1 + $0x8] sm:$0xff] %vm59_vm5, %v80_v43  }
  0x8d   :  { %363 = vst.msk [vmem:[%s539_s1 + $0x8] sm:$0xff] %vm104_vm6, %v125_v42   ;;  %v170_v44 = vpop.permute.xlu1 %169  }
  0x8e   :  { %364 = vst.msk [vmem:[%s539_s1 + $0x8] sm:$0xff] %vm149_vm7, %v170_v44  }
  0x8f   :  { %v148_v45 = vpop.permute.xlu0 %147  }
  0x90   :  { %150 = vst.msk [vmem:[%s539_s1] sm:$0xff] %vm149_vm7, %v148_v45  }
  0x91   :  { %v215_v46 = vpop.permute.xlu1 %214  }
  0x92   :  { %365 = vst.msk [vmem:[%s539_s1 + $0x8] sm:$0xff] %vm194_vm8, %v215_v46  }
  0x93   :  { %v193_v47 = vpop.permute.xlu0 %192  }
  0x94   :  { %195 = vst.msk [vmem:[%s539_s1] sm:$0xff] %vm194_vm8, %v193_v47  }
  0x95   :  { %v260_v48 = vpop.permute.xlu1 %259  }
  0x96   :  { %366 = vst.msk [vmem:[%s539_s1 + $0x8] sm:$0xff] %vm239_vm9, %v260_v48  }
  0x98   :  { %v238_v49 = vpop.permute.xlu0 %237  }
  0x99   :  { %240 = vst.msk [vmem:[%s539_s1] sm:$0xff] %vm239_vm9, %v238_v49  }
  0x9a   :  { %v305_v50 = vpop.permute.xlu1 %304  }
  0x9b   :  { %367 = vst.msk [vmem:[%s539_s1 + $0x8] sm:$0xff] %vm284_vm10, %v305_v50  }
  0x9c   :  { %v283_v51 = vpop.permute.xlu0 %282  }
  0x9d   :  { %285 = vst.msk [vmem:[%s539_s1] sm:$0xff] %vm284_vm10, %v283_v51  }
  0x9e   :  { %v350_v52 = vpop.permute.xlu1 %349  }
  0x9f   :  { %368 = vst.msk [vmem:[%s539_s1 + $0x8] sm:$0xff] %vm329_vm11, %v350_v52  }
  0xa1   :  { %v328_v53 = vpop.permute.xlu0 %327  }
  0xa2   :  { %330 = vst.msk [vmem:[%s539_s1] sm:$0xff] %vm329_vm11, %v328_v53  }
  0xa3   :  { %354 = vsyncpa [#allocation1], 1 }

// kernel: branch_1_fun.1
= control target key start
LH: loop header
LB: loop body
LE: loop exit
PB: predicated region body
PF: predicated region fallthrough
CT: control target
= control target key end

     0   :  { %v1698_v2 = vmov 0   ;;  %s1699_s26 = smov 16   ;;  %s1701_s27 = smov 17   ;;  %v28_v6 = vlaneseq  ;;  %vm105_vm0 = vcmask 1040384   ;;  %vm106_vm1 = vcmask 1041408   ;;  %s2277_s0 = inlined_call_operand.vmem [shape: f32[3,256], index: 0, kind: input, shape index: {}]   ;;  %s2278_s2 = inlined_call_operand.vmem [shape: f32[16,1], index: 2, kind: input, shape index: {}]   ;;  %s2279_s1 = inlined_call_operand.vmem [shape: f32[9,16,3], index: 1, kind: input, shape index: {}]   ;;  %s2280_s4 = inlined_call_operand.vmem [shape: f32[16,1], index: 4, kind: input, shape index: {}]   ;;  %s2281_s3 = inlined_call_operand.vmem [shape: f32[9,16,16], index: 3, kind: input, shape index: {}]   ;;  %s2282_s5 = inlined_call_operand.vmem [shape: f32[2,16], index: 5, kind: input, shape index: {}]   ;;  %s2283_s6 = inlined_call_operand.vmem [shape: f32[2,1], index: 6, kind: input, shape index: {}]   ;;  %s2284_s7 = inlined_call_operand.vmem [shape: f32[2,1], index: 7, kind: output, shape index: {}]  }
   0x1   :  { %v1753_v0 = vld [vmem:[%s2277_s0] sm:$0x77]  ;;  %147 = vmatprep.mubr.bf16.mxu0 %v1698_v2  ;;  %199 = vmatprep.mubr.bf16.mxu1 %v1698_v2  ;;  %s1700_s0 = smov 15   ;;  %s1702_s28 = smov 1   ;;  %v733_v5 = vld [vmem:[%s2278_s2 + $0x8] sm:$0xff]  ;;  %v1707_v9 = vmov 65535  }
   0x2   :  { %v1757_v1 = vcombine.high %v1753_v0, %v1753_v0  ;;  %1615 = vset.pattern.permute.xlu0 %v1698_v2  ;;  %1616 = vset.pattern.permute.xlu1 %v1698_v2  ;;  %s1703_s29 = smov 127   ;;  %s1704_s30 = smov 113   ;;  %v732_v4 = vld [vmem:[%s2278_s2] sm:$0xff]  ;;  %v1779_v7 = vand.u32 127, %v28_v6  ;;  %v107_v10 = vsel %vm105_vm0, 4294967295, %v1707_v9  ;;  %v1788_v12 = vld [vmem:[%s2279_s1 + $0x10] sm:$0xff] }
   0x3   :  { %s1705_s8 = smov 112   ;;  %s1706_s9 = smov 111   ;;  %v1793_v13 = vld [vmem:[%s2279_s1 + $0x18] sm:$0xff]  ;;  %v1798_v14 = vld [vmem:[%s2279_s1] sm:$0xff]  ;;  %v1803_v15 = vld [vmem:[%s2279_s1 + $0x8] sm:$0xff]  ;;  %v1809_v17 = vsel %vm106_vm1, %v107_v10, 0 }
   0x4   :  { %v1575_v3 = vpack.i.bf16 %v1757_v1, %v1753_v0  ;;  %v1782_v8 = vadd.s32 128, %v1779_v7  ;;  %v35_v11 = vand.u32 15, %v1779_v7  ;;  %v369_v19 = vpack.c.bf16 %v1757_v1, %v1757_v1  ;;  %v1518_v31 = vld [vmem:[%s2281_s3 + $0x40] sm:$0xff]  ;;  %v1521_v23 = vld [vmem:[%s2281_s3 + $0x50] sm:$0xff] }
   0x5   :  { %vm65_vm3 = vcmp.ge.s32.totalorder %v1779_v7, 16  ;;  %vm214_vm4 = vcmp.lt.s32.totalorder %v1779_v7, 15  ;;  %vm86_vm5 = vcmp.lt.s32.totalorder %v1779_v7, 16  ;;  %v98_v20 = vpack.c.bf16 %v1793_v13, %v1788_v12  ;;  %v1467_v12 = vld [vmem:[%s2279_s1 + $0x28] sm:$0xff] }
   0x6   :  { %1576 = vrot.lane.b32.xlu0 %v1575_v3, %s1699_s26  ;;  %1586 = vrot.lane.b32.xlu1 %v1575_v3, %s1700_s0  ;;  %vm1805_vm2 = vcmp.le.s32.totalorder %v35_v11, 14  ;;  %v42_v18 = vand.u32 15, %v1782_v8  ;;  %vm2286_vm6 = vcmp.lt.s32.totalorder %v1779_v7, 1  ;;  %vm62_vm7 = vcmp.lt.s32.totalorder %v1779_v7, 17 }
   0x7   :  { %v79_v24 = vpack.c.bf16 %v1803_v15, %v1798_v14  ;;  %vm1831_vm9 = vmand %vm65_vm3, %vm1805_vm2  ;;  %vm101_vm10 = vcmask 23552   ;;  %vm1835_vm11 = vcmp.ge.s32.totalorder %v35_v11, 1  ;;  %vm2285_vm13 = vcmp.lt.s32.totalorder %v1779_v7, 127 }
   0x8   :  { %vm1821_vm8 = vcmp.le.s32.totalorder %v42_v18, 14  ;;  %vm1839_vm12 = vcmp.ge.s32.totalorder %v42_v18, 1  ;;  %v1845_v32 = vand.u32 %v369_v19, %v1809_v17  ;;  %vm2287_vm14 = vcmp.lt.s32.totalorder %v1779_v7, 113  ;;  %vm1867_vm0 = vmand %vm65_vm3, %vm1835_vm11 }
   0x9   :  { %vm509_vm15 = vcmp.lt.s32.totalorder %v1782_v8, 240  ;;  %vm584_vm1 = vcmp.lt.s32.totalorder %v1779_v7, 112 }
   0xa   :  { %1581 = vrot.lane.b32.xlu0 %v1575_v3, %s1701_s27  ;;  %1591 = vrot.lane.b32.xlu1 %v1575_v3, %s1702_s28 }
   0xe   :  { %1596 = vrot.lane.b32.xlu0 %v1575_v3, %s1703_s29  ;;  %1601 = vrot.lane.b32.xlu1 %v1575_v3, %s1704_s30 }
  0x12   :  { %1606 = vrot.lane.b32.xlu0 %v1575_v3, %s1705_s8  ;;  %1611 = vrot.lane.b32.xlu1 %v1575_v3, %s1706_s9 }
  0x16   :  { %736 = vperm.xlu0 %1615, %v732_v4   ;;  %741 = vperm.xlu1 %1616, %v733_v5  }
  0x78   :  { %v1577_v21 = vpop.permute.xlu0 %1576  ;;  %v1587_v22 = vpop.permute.xlu1 %1586 }
  0x79   :  { %v1579_v25 = vunpack.i.h.bf16 %v1577_v21  ;;  %v1578_v26 = vunpack.i.l.bf16 %v1577_v21  ;;  %v1589_v28 = vunpack.i.h.bf16 %v1587_v22  ;;  %v1588_v29 = vunpack.i.l.bf16 %v1587_v22 }
  0x7b   :  { %v215_v33 = vsel %vm214_vm4, %v1588_v29, %v1589_v28  ;;  %v216_v34 = vsel %vm214_vm4, %v1589_v28, %v1588_v29  ;;  %v87_v35 = vsel %vm86_vm5, %v1578_v26, %v1579_v25  ;;  %v88_v36 = vsel %vm86_vm5, %v1579_v25, %v1578_v26  ;;  %v1466_v28 = vld [vmem:[%s2279_s1 + $0x20] sm:$0xff] }
  0x7c   :  { %v1582_v37 = vpop.permute.xlu0 %1581  ;;  %v225_v38 = vsel %vm1831_vm9, %v216_v34, 0.0  ;;  %v100_v39 = vpack.c.bf16 %v87_v35, %v87_v35  ;;  %v93_v40 = vsel %vm65_vm3, %v88_v36, 0.0  ;;  %v1592_v41 = vpop.permute.xlu1 %1591  ;;  %v226_v42 = vsel %vm1821_vm8, %v215_v33, 0.0 }
  0x7d   :  { %v1584_v43 = vunpack.i.h.bf16 %v1582_v37  ;;  %v1583_v44 = vunpack.i.l.bf16 %v1582_v37  ;;  %v231_v45 = vpack.c.bf16 %v225_v38, %v225_v38  ;;  %v99_v46 = vpack.c.bf16 %v93_v40, %v93_v40 }
  0x7e   :  { %v113_v48 = vand.u32 %v1809_v17, %v100_v39  ;;  %v1594_v49 = vunpack.i.h.bf16 %v1592_v41  ;;  %v1593_v50 = vunpack.i.l.bf16 %v1592_v41  ;;  %v232_v51 = vpack.c.bf16 %v226_v42, %v226_v42 }
  0x7f   :  { %v110_v52 = vand.u32 %v1809_v17, %v99_v46  ;;  %v63_v53 = vsel %vm62_vm7, %v1583_v44, %v1584_v43  ;;  %v64_v54 = vsel %vm62_vm7, %v1584_v43, %v1583_v44  ;;  %v237_v55 = vand.u32 %v231_v45, %v1809_v17 }
  0x80   :  { %129 = vmatprep.subr.bf16.mxu0 %v113_v48  ;;  %v294_v56 = vsel %vm2286_vm6, %v1593_v50, %v1594_v49  ;;  %v295_v57 = vsel %vm2286_vm6, %v1594_v49, %v1593_v50  ;;  %v76_v58 = vsel %vm1839_vm12, %v63_v53, 0.0  ;;  %v75_v59 = vsel %vm1867_vm0, %v64_v54, 0.0  ;;  %v1597_v60 = vpop.permute.xlu0 %1596  ;;  %v1602_v61 = vpop.permute.xlu1 %1601  ;;  %vm1922_vm6 = vmand %vm509_vm15, %vm1839_vm12  ;;  %v1470_v50 = vld [vmem:[%s2279_s1 + $0x38] sm:$0xff]  ;;  %v1545_v49 = vld [vmem:[%s2281_s3 + $0x80] sm:$0xff] }
  0x81   :  { %130 = vmatpush1.bf16.msra.mxu0 %v110_v52  ;;  %v300_v62 = vsel %vm1835_vm11, %v295_v57, 0.0  ;;  %v81_v63 = vpack.c.bf16 %v76_v58, %v76_v58  ;;  %v80_v1 = vpack.c.bf16 %v75_v59, %v75_v59  ;;  %v240_v3 = vand.u32 %v232_v51, %v1809_v17  ;;  %v1472_v58 = vld [vmem:[%s2279_s1 + $0x40] sm:$0xff]  ;;  %v1473_v59 = vld [vmem:[%s2279_s1 + $0x48] sm:$0xff] }
  0x82   :  { %v306_v4 = vpack.c.bf16 %v300_v62, %v300_v62  ;;  %v1599_v5 = vunpack.i.h.bf16 %v1597_v60  ;;  %v1598_v6 = vunpack.i.l.bf16 %v1597_v60  ;;  %v301_v9 = vsel %vm1839_vm12, %v294_v56, 0.0 }
  0x83   :  { %v165_v10 = vand.u32 %v1809_v17, %v81_v63  ;;  %v162_v11 = vand.u32 %v1809_v17, %v80_v1  ;;  %256 = vmatprep.subr.bf16.mxu0 %v240_v3  ;;  %v307_v18 = vpack.c.bf16 %v301_v9, %v301_v9  ;;  %v1604_v19 = vunpack.i.h.bf16 %v1602_v61  ;;  %v1475_v9 = vld [vmem:[%s2279_s1 + $0x50] sm:$0xff] }
  0x84   :  { %1464 = vmatmul.mubr.msk.bf16.vlgmr.msra.gmra.mxu0 %vm101_vm10, %v98_v20  ;;  %v431_v21 = vsel %vm2285_vm13, %v1598_v6, %v1599_v5  ;;  %v432_v22 = vsel %vm2285_vm13, %v1599_v5, %v1598_v6  ;;  %v1603_v25 = vunpack.i.l.bf16 %v1602_v61  ;;  %v1607_v26 = vpop.permute.xlu0 %1606  ;;  %v368_v20 = vpack.c.bf16 %v1753_v0, %v1753_v0  ;;  %v1612_v34 = vpop.permute.xlu1 %1611 }
  0x85   :  { %181 = vmatprep.subr.bf16.mxu1 %v165_v10  ;;  %257 = vmatpush1.bf16.msra.mxu0 %v237_v55  ;;  %v315_v13 = vand.u32 %v307_v18, %v1809_v17  ;;  %v1609_v29 = vunpack.i.h.bf16 %v1607_v26  ;;  %v1608_v33 = vunpack.i.l.bf16 %v1607_v26  ;;  %v312_v36 = vand.u32 %v306_v4, %v1809_v17  ;;  %v1476_v10 = vld [vmem:[%s2279_s1 + $0x58] sm:$0xff] }
  0x86   :  { %182 = vmatpush1.bf16.msra.mxu1 %v162_v11  ;;  %274 = vmatprep.mubr.bf16.mxu0 %v1698_v2  ;;  %v507_v35 = vsel %vm2287_vm14, %v1604_v19, %v1603_v25  ;;  %v438_v37 = vsel %vm1821_vm8, %v432_v22, 0.0  ;;  %vm2288_vm13 = vcmp.lt.s32.totalorder %v1779_v7, 111  ;;  %v437_v38 = vsel %vm1805_vm2, %v431_v21, 0.0  ;;  %v1478_v21 = vld [vmem:[%s2279_s1 + $0x60] sm:$0xff]  ;;  %v1479_v22 = vld [vmem:[%s2279_s1 + $0x68] sm:$0xff] }
  0x87   :  { %331 = vmatprep.subr.bf16.mxu1 %v315_v13  ;;  %v506_v39 = vsel %vm2287_vm14, %v1603_v25, %v1604_v19  ;;  %393 = vmatprep.subr.bf16.mxu0 %v1845_v32  ;;  %v586_v40 = vsel %vm584_vm1, %v1609_v29, %v1608_v33  ;;  %v444_v41 = vpack.c.bf16 %v438_v37, %v438_v37  ;;  %v1614_v43 = vunpack.i.h.bf16 %v1612_v34  ;;  %vm1947_vm14 = vmand %vm509_vm15, %vm1821_vm8  ;;  %v1482_v13 = vld [vmem:[%s2279_s1 + $0x78] sm:$0xff] }
  0x88   :  { %v230_v42 = vpack.c.bf16 %v1467_v12, %v1466_v28  ;;  %v1613_v44 = vunpack.i.l.bf16 %v1612_v34  ;;  %v374_v45 = vand.u32 %v368_v20, %v1809_v17  ;;  %v517_v48 = vsel %vm1922_vm6, %v507_v35, 0.0  ;;  %v1481_v12 = vld [vmem:[%s2279_s1 + $0x70] sm:$0xff] }
  0x89   :  { %1465 = vmatmul.mubr.msk.bf16.vlgmr.msra.gmra.mxu1 %vm101_vm10, %v79_v24  ;;  %v452_v46 = vand.u32 %v444_v41, %v1809_v17  ;;  %v592_v32 = vsel %vm509_vm15, %v586_v40, 0.0  ;;  %v443_v14 = vpack.c.bf16 %v437_v38, %v437_v38  ;;  %v516_v15 = vsel %vm1835_vm11, %v506_v39, 0.0  ;;  %v1469_v24 = vld [vmem:[%s2279_s1 + $0x30] sm:$0xff] }
  0x8a   :  { %332 = vmatpush1.bf16.msra.mxu1 %v312_v36  ;;  %349 = vmatprep.mubr.bf16.mxu1 %v1698_v2  ;;  %v661_v51 = vsel %vm2288_vm13, %v1614_v43, %v1613_v44  ;;  %v523_v52 = vpack.c.bf16 %v517_v48, %v517_v48  ;;  %v598_v53 = vpack.c.bf16 %v592_v32, %v592_v32 }
  0x8b   :  { %468 = vmatprep.subr.bf16.mxu1 %v452_v46  ;;  %v669_v55 = vsel %vm1947_vm14, %v661_v51, 0.0  ;;  %v522_v56 = vpack.c.bf16 %v516_v15, %v516_v15  ;;  %v305_v57 = vpack.c.bf16 %v1470_v50, %v1469_v24  ;;  %v449_v60 = vand.u32 %v443_v14, %v1809_v17 }
  0x8c   :  { %1468 = vmatmul.mubr.msk.bf16.vlgmr.msra.gmra.mxu0 %vm101_vm10, %v230_v42  ;;  %v531_v54 = vand.u32 %v523_v52, %v1809_v17  ;;  %v675_v61 = vpack.c.bf16 %v669_v55, %v669_v55  ;;  %v585_v62 = vsel %vm584_vm1, %v1608_v33, %v1609_v29  ;;  %v660_v63 = vsel %vm2288_vm13, %v1613_v44, %v1614_v43  ;;  %v1485_v29 = vld [vmem:[%s2279_s1 + $0x88] sm:$0xff] }
  0x8d   :  { %394 = vmatpush1.bf16.msra.mxu0 %v374_v45  ;;  %411 = vmatprep.mubr.bf16.mxu0 %v1698_v2  ;;  %v606_v1 = vand.u32 %v598_v53, %v1809_v17  ;;  %v367_v3 = vpack.c.bf16 %v1473_v59, %v1472_v58  ;;  %v528_v4 = vand.u32 %v522_v56, %v1809_v17  ;;  %v668_v6 = vsel %vm1805_vm2, %v660_v63, 0.0 }
  0x8e   :  { %547 = vmatprep.subr.bf16.mxu0 %v531_v54  ;;  %v597_v5 = vpack.c.bf16 %v585_v62, %v585_v62  ;;  %v683_v11 = vand.u32 %v675_v61, %v1809_v17  ;;  %v674_v18 = vpack.c.bf16 %v668_v6, %v668_v6  ;;  %v442_v19 = vpack.c.bf16 %v1476_v10, %v1475_v9 }
  0x8f   :  { %v521_v26 = vpack.c.bf16 %v1479_v22, %v1478_v21  ;;  %v596_v20 = vpack.c.bf16 %v1482_v13, %v1481_v12 }
  0x90   :  { %v603_v25 = vand.u32 %v597_v5, %v1809_v17  ;;  %v680_v28 = vand.u32 %v674_v18, %v1809_v17  ;;  %v1484_v17 = vld [vmem:[%s2279_s1 + $0x80] sm:$0xff] }
  0x91   :  { %1471 = vmatmul.mubr.msk.bf16.vlgmr.msra.gmra.mxu1 %vm101_vm10, %v305_v57  ;;  %v673_v33 = vpack.c.bf16 %v1485_v29, %v1484_v17 }
  0x92   :  { %469 = vmatpush1.bf16.msra.mxu1 %v449_v60  ;;  %486 = vmatprep.mubr.bf16.mxu1 %v1698_v2 }
  0x93   :  { %622 = vmatprep.subr.bf16.mxu1 %v606_v1 }
  0x94   :  { %1474 = vmatmul.mubr.msk.bf16.vlgmr.msra.gmra.mxu0 %vm101_vm10, %v367_v3 }
  0x95   :  { %548 = vmatpush1.bf16.msra.mxu0 %v528_v4  ;;  %565 = vmatprep.mubr.bf16.mxu0 %v1698_v2 }
  0x96   :  { %699 = vmatprep.subr.bf16.mxu0 %v683_v11 }
  0x99   :  { %1477 = vmatmul.mubr.msk.bf16.vlgmr.msra.gmra.mxu1 %vm101_vm10, %v442_v19 }
  0x9a   :  { %623 = vmatpush1.bf16.msra.mxu1 %v603_v25  ;;  %640 = vmatprep.mubr.bf16.mxu1 %v1698_v2 }
  0x9c   :  { %1480 = vmatmul.mubr.msk.bf16.vlgmr.msra.gmra.mxu0 %vm101_vm10, %v521_v26 }
  0x9d   :  { %700 = vmatpush1.bf16.msra.mxu0 %v680_v28  ;;  %717 = vmatprep.mubr.bf16.mxu0 %v1698_v2 }
  0xa1   :  { %1483 = vmatmul.mubr.msk.bf16.vlgmr.msra.gmra.mxu1 %vm101_vm10, %v596_v20 }
  0xa2   :  { %831 = vmatprep.mubr.bf16.mxu1 %v1698_v2 }
  0xa4   :  { %1486 = vmatmul.mubr.msk.bf16.vlgmr.msra.gmra.mxu0 %vm101_vm10, %v673_v33  ;;  %vm1489_vm10 = vmpackc.low %vm65_vm3, %vm65_vm3  ;;  %vm795_vm3 = vcmask 130048  }
  0xa5   :  { %877 = vmatprep.mubr.bf16.mxu0 %v1698_v2 }
 0x144   :  { %v149_v34 = vpop.f32.mrf.mxu0 }
 0x146   :  { %v151_v35 = vpop.f32.mrf.mxu0 }
 0x148   :  { %v153_v36 = vpop.f32.mrf.mxu0 }
 0x149   :  { %v201_v37 = vpop.f32.mrf.mxu1 }
 0x14a   :  { %v155_v38 = vpop.f32.mrf.mxu0  ;;  %v202_v44 = vadd.f32 %v201_v37, %v149_v34 }
 0x14b   :  { %v203_v39 = vpop.f32.mrf.mxu1 }
 0x14c   :  { %v276_v40 = vpop.f32.mrf.mxu0  ;;  %v204_v48 = vadd.f32 %v203_v39, %v151_v35 }
 0x14d   :  { %v205_v41 = vpop.f32.mrf.mxu1  ;;  %v285_v15 = vadd.f32 %v276_v40, %v202_v44 }
 0x14e   :  { %v278_v42 = vpop.f32.mrf.mxu0  ;;  %v206_v24 = vadd.f32 %v205_v41, %v153_v36  ;;  %v737_v41 = vpop.permute.xlu0 %736 }
 0x14f   :  { %v207_v43 = vpop.f32.mrf.mxu1  ;;  %v286_v52 = vadd.f32 %v278_v42, %v204_v48  ;;  %v742_v48 = vpop.permute.xlu1 %741 }
 0x150   :  { %v280_v45 = vpop.f32.mrf.mxu0  ;;  %v208_v53 = vadd.f32 %v207_v43, %v155_v38 }
 0x151   :  { %v351_v46 = vpop.f32.mrf.mxu1  ;;  %v287_v57 = vadd.f32 %v280_v45, %v206_v24 }
 0x152   :  { %v282_v32 = vpop.f32.mrf.mxu0  ;;  %v360_v54 = vadd.f32 %v351_v46, %v285_v15 }
 0x153   :  { %v353_v14 = vpop.f32.mrf.mxu1  ;;  %v288_v61 = vadd.f32 %v282_v32, %v208_v53 }
 0x154   :  { %v413_v50 = vpop.f32.mrf.mxu0  ;;  %v361_v58 = vadd.f32 %v353_v14, %v286_v52 }
 0x155   :  { %v355_v51 = vpop.f32.mrf.mxu1  ;;  %v422_v62 = vadd.f32 %v413_v50, %v360_v54 }
 0x156   :  { %v415_v55 = vpop.f32.mrf.mxu0  ;;  %v362_v63 = vadd.f32 %v355_v51, %v287_v57 }
 0x157   :  { %v357_v56 = vpop.f32.mrf.mxu1  ;;  %v423_v4 = vadd.f32 %v415_v55, %v361_v58 }
 0x158   :  { %v417_v59 = vpop.f32.mrf.mxu0  ;;  %v363_v5 = vadd.f32 %v357_v56, %v288_v61 }
 0x159   :  { %v488_v60 = vpop.f32.mrf.mxu1  ;;  %v424_v11 = vadd.f32 %v417_v59, %v362_v63  ;;  %v1376_v59 = vld [vmem:[%s2280_s4] sm:$0xff] }
 0x15a   :  { %v419_v1 = vpop.f32.mrf.mxu0  ;;  %v497_v6 = vadd.f32 %v488_v60, %v422_v62  ;;  %v1377_v60 = vld [vmem:[%s2280_s4 + $0x8] sm:$0xff] }
 0x15b   :  { %v490_v3 = vpop.f32.mrf.mxu1  ;;  %v425_v22 = vadd.f32 %v419_v1, %v363_v5 }
 0x15c   :  { %v567_v9 = vpop.f32.mrf.mxu0  ;;  %v498_v18 = vadd.f32 %v490_v3, %v423_v4 }
 0x15d   :  { %v492_v10 = vpop.f32.mrf.mxu1  ;;  %v576_v25 = vadd.f32 %v567_v9, %v497_v6 }
 0x15e   :  { %v569_v19 = vpop.f32.mrf.mxu0  ;;  %v499_v26 = vadd.f32 %v492_v10, %v424_v11  ;;  %v1487_v10 = vld [vmem:[%s2281_s3 + $0x10] sm:$0xff]  ;;  %v1488_v11 = vld [vmem:[%s2281_s3 + $0x18] sm:$0xff] }
 0x15f   :  { %v494_v21 = vpop.f32.mrf.mxu1  ;;  %v577_v13 = vadd.f32 %v569_v19, %v498_v18 }
 0x160   :  { %v571_v28 = vpop.f32.mrf.mxu0  ;;  %v500_v20 = vadd.f32 %v494_v21, %v425_v22 }
 0x161   :  { %v642_v12 = vpop.f32.mrf.mxu1  ;;  %v578_v34 = vadd.f32 %v571_v28, %v499_v26 }
 0x162   :  { %v651_v17 = vadd.f32 %v642_v12, %v576_v25  ;;  %v573_v29 = vpop.f32.mrf.mxu0 }
 0x163   :  { %v644_v33 = vpop.f32.mrf.mxu1  ;;  %v579_v39 = vadd.f32 %v573_v29, %v500_v20 }
 0x164   :  { %v652_v35 = vadd.f32 %v644_v33, %v577_v13  ;;  %v719_v36 = vpop.f32.mrf.mxu0 }
 0x165   :  { %v728_v37 = vadd.f32 %v719_v36, %v651_v17  ;;  %v646_v38 = vpop.f32.mrf.mxu1  ;;  %v792_v17 = vpack.c.bf16 %v1488_v11, %v1487_v10  ;;  %v768_v36 = vld [vmem:[%s2281_s3] sm:$0xff] }
 0x166   :  { %v653_v40 = vadd.f32 %v646_v38, %v578_v34  ;;  %v721_v42 = vpop.f32.mrf.mxu0 }
 0x167   :  { %v729_v43 = vadd.f32 %v721_v42, %v652_v35  ;;  %v648_v44 = vpop.f32.mrf.mxu1  ;;  %v744_v32 = vadd.f32 %v737_v41, %v728_v37  ;;  %v769_v37 = vld [vmem:[%s2281_s3 + $0x8] sm:$0xff] }
 0x168   :  { %v654_v45 = vadd.f32 %v648_v44, %v579_v39  ;;  %v723_v46 = vpop.f32.mrf.mxu0 }
 0x169   :  { %v730_v14 = vadd.f32 %v723_v46, %v653_v40  ;;  %v745_v24 = vadd.f32 %v737_v41, %v729_v43  ;;  %v2021_v52 = vmax.f32 %v744_v32, 0.0  ;;  %v770_v46 = vpack.c.bf16 %v769_v37, %v768_v36 }
 0x16a   :  { %v725_v15 = vpop.f32.mrf.mxu0 }
 0x16b   :  { %v746_v50 = vadd.f32 %v742_v48, %v730_v14  ;;  %v731_v51 = vadd.f32 %v725_v15, %v654_v45  ;;  %v2025_v55 = vmax.f32 %v745_v24, 0.0  ;;  %v1500_v15 = vld [vmem:[%s2281_s3 + $0x20] sm:$0xff]  ;;  %v1501_v24 = vld [vmem:[%s2281_s3 + $0x28] sm:$0xff] }
 0x16d   :  { %v2023_v53 = vmax.f32 %v746_v50, 0.0  ;;  %v747_v54 = vadd.f32 %v742_v48, %v731_v51 }
 0x16f   :  { %v2027_v56 = vmax.f32 %v747_v54, 0.0  ;;  %v1617_v57 = vpack.i.bf16 %v2023_v53, %v2021_v52 }
 0x171   :  { %1618 = vrot.lane.b32.xlu1 %v1617_v57, %s1699_s26  ;;  %v1632_v58 = vpack.i.bf16 %v2027_v56, %v2025_v55 }
 0x173   :  { %1633 = vrot.lane.b32.xlu0 %v1632_v58, %s1699_s26 }
 0x175   :  { %1623 = vrot.lane.b32.xlu1 %v1617_v57, %s1701_s27 }
 0x177   :  { %1638 = vrot.lane.b32.xlu0 %v1632_v58, %s1701_s27 }
 0x179   :  { %1628 = vrot.lane.b32.xlu1 %v1617_v57, %s1700_s0 }
 0x17b   :  { %1643 = vrot.lane.b32.xlu0 %v1632_v58, %s1700_s0 }
 0x17d   :  { %1648 = vrot.lane.b32.xlu1 %v1617_v57, %s1702_s28 }
 0x17f   :  { %1653 = vrot.lane.b32.xlu0 %v1632_v58, %s1702_s28 }
 0x181   :  { %1658 = vrot.lane.b32.xlu1 %v1617_v57, %s1703_s29 }
 0x183   :  { %1678 = vrot.lane.b32.xlu0 %v1632_v58, %s1703_s29 }
 0x185   :  { %1663 = vrot.lane.b32.xlu1 %v1617_v57, %s1704_s30 }
 0x187   :  { %1683 = vrot.lane.b32.xlu0 %v1632_v58, %s1704_s30 }
 0x189   :  { %1668 = vrot.lane.b32.xlu1 %v1617_v57, %s1705_s8 }
 0x18b   :  { %1688 = vrot.lane.b32.xlu0 %v1632_v58, %s1705_s8 }
 0x18d   :  { %1673 = vrot.lane.b32.xlu1 %v1617_v57, %s1706_s9 }
 0x18f   :  { %1693 = vrot.lane.b32.xlu0 %v1632_v58, %s1706_s9 }
 0x191   :  { %1380 = vperm.xlu1 %1616, %v1376_v59  }
 0x193   :  { %1385 = vperm.xlu0 %1615, %v1377_v60  }
 0x1e3   :  { %v1619_v61 = vpop.permute.xlu1 %1618 }
 0x1e4   :  { %v1621_v63 = vunpack.i.h.bf16 %v1619_v61  ;;  %v1620_v1 = vunpack.i.l.bf16 %v1619_v61 }
 0x1e5   :  { %v1634_v62 = vpop.permute.xlu0 %1633 }
 0x1e6   :  { %v1636_v3 = vunpack.i.h.bf16 %v1634_v62  ;;  %v1635_v4 = vunpack.i.l.bf16 %v1634_v62  ;;  %v1037_v62 = vpack.c.bf16 %v2027_v56, %v2025_v55 }
 0x1e7   :  { %v1624_v5 = vpop.permute.xlu1 %1623 }
 0x1e8   :  { %v784_v6 = vsel %vm86_vm5, %v1636_v3, %v1621_v63  ;;  %v783_v9 = vsel %vm86_vm5, %v1635_v4, %v1620_v1  ;;  %v1626_v19 = vunpack.i.h.bf16 %v1624_v5  ;;  %v781_v22 = vsel %vm86_vm5, %v1620_v1, %v1635_v4 }
 0x1e9   :  { %v1490_v18 = vpack.c.bf16 %v784_v6, %v783_v9  ;;  %v1639_v21 = vpop.permute.xlu0 %1638  ;;  %v782_v25 = vsel %vm86_vm5, %v1621_v63, %v1636_v3  ;;  %v1625_v26 = vunpack.i.l.bf16 %v1624_v5  ;;  %vm1493_vm5 = vmpackc.low %vm1839_vm12, %vm1839_vm12  ;;  %v907_v63 = vpack.c.bf16 %v1501_v24, %v1500_v15  ;;  %v1509_v5 = vld [vmem:[%s2281_s3 + $0x30] sm:$0xff]  ;;  %v1510_v6 = vld [vmem:[%s2281_s3 + $0x38] sm:$0xff] }
 0x1ea   :  { %v1641_v28 = vunpack.i.h.bf16 %v1639_v21  ;;  %v1640_v12 = vunpack.i.l.bf16 %v1639_v21  ;;  %v794_v13 = vpack.c.bf16 %v782_v25, %v781_v22  ;;  %vm1526_vm12 = vmpackc.low %vm1805_vm2, %vm1805_vm2  ;;  %vm1709_vm2 = vmmov 0  }
 0x1eb   :  { %v1629_v20 = vpop.permute.xlu1 %1628 }
 0x1ec   :  { %v761_v29 = vsel %vm62_vm7, %v1626_v19, %v1641_v28  ;;  %v763_v33 = vsel %vm62_vm7, %v1641_v28, %v1626_v19  ;;  %v760_v34 = vsel %vm62_vm7, %v1625_v26, %v1640_v12  ;;  %v762_v35 = vsel %vm62_vm7, %v1640_v12, %v1625_v26  ;;  %813 = vmatprep.subr.bf16.mxu1 %v794_v13  ;;  %vm1496_vm7 = vmpackc.low %vm1867_vm0, %vm1867_vm0 }
 0x1ed   :  { %v1494_v38 = vpack.c.bf16 %v761_v29, %v760_v34  ;;  %v1497_v39 = vpack.c.bf16 %v763_v33, %v762_v35  ;;  %1491 = vmatpush1.bf16.msk.msra.mxu1 %vm1489_vm10, %v1490_v18  ;;  %v1644_v40 = vpop.permute.xlu0 %1643  ;;  %v1631_v41 = vunpack.i.h.bf16 %v1629_v20  ;;  %v1630_v42 = vunpack.i.l.bf16 %v1629_v20  ;;  %vm1502_vm0 = vmpackc.low %vm1821_vm8, %vm1821_vm8  ;;  %v1519_v29 = vld [vmem:[%s2281_s3 + $0x48] sm:$0xff] }
 0x1ee   :  { %v1646_v43 = vunpack.i.h.bf16 %v1644_v40  ;;  %v1645_v44 = vunpack.i.l.bf16 %v1644_v40  ;;  %vm2305_vm10 = vcmp.lt.s32.totalorder %v1779_v7, 1  ;;  %v1036_v26 = vpack.c.bf16 %v2023_v53, %v2021_v52  ;;  %vm1532_vm8 = vmpackc.low %vm1922_vm6, %vm1922_vm6 }
 0x1ef   :  { %v1649_v45 = vpop.permute.xlu1 %1648  ;;  %1495 = vmatprep.subr.msk.bf16.mxu0 %vm1493_vm5, %v1494_v38  ;;  %v979_v28 = vpack.c.bf16 %v1510_v6, %v1509_v5  ;;  %vm1541_vm6 = vmpackc.low %vm509_vm15, %vm509_vm15  ;;  %vm2317_vm15 = vcmp.lt.s32.totalorder %v1779_v7, 111 }
 0x1f0   :  { %v897_v48 = vsel %vm214_vm4, %v1631_v41, %v1646_v43  ;;  %v899_v32 = vsel %vm214_vm4, %v1646_v43, %v1631_v41  ;;  %v896_v14 = vsel %vm214_vm4, %v1630_v42, %v1645_v44  ;;  %v898_v47 = vsel %vm214_vm4, %v1645_v44, %v1630_v42  ;;  %1492 = vmatmul.mubr.msk.bf16.vlgmr.msra.gmra.mxu1 %vm795_vm3, %v792_v17  ;;  %vm1505_vm4 = vmpackc.low %vm1831_vm9, %vm1831_vm9 }
 0x1f1   :  { %v1503_v50 = vpack.c.bf16 %v897_v48, %v896_v14  ;;  %v1506_v51 = vpack.c.bf16 %v899_v32, %v898_v47  ;;  %1498 = vmatpush1.bf16.msk.msra.mxu0 %vm1496_vm7, %v1497_v39  ;;  %v1654_v54 = vpop.permute.xlu0 %1653  ;;  %945 = vmatprep.mubr.bf16.mxu1 %v1698_v2  ;;  %v1651_v57 = vunpack.i.h.bf16 %v1649_v45  ;;  %v1650_v58 = vunpack.i.l.bf16 %v1649_v45  ;;  %vm2306_vm7 = vmmov %vm2305_vm10 }
 0x1f2   :  { %v1656_v59 = vunpack.i.h.bf16 %v1654_v54  ;;  %v1655_v60 = vunpack.i.l.bf16 %v1654_v54  ;;  %vm2307_vm13 = vmmov %vm2306_vm7  ;;  %v1035_v41 = vpack.c.bf16 %v1519_v29, %v1518_v31 }
 0x1f3   :  { %v1659_v61 = vpop.permute.xlu1 %1658  ;;  %1504 = vmatprep.subr.msk.bf16.mxu1 %vm1502_vm0, %v1503_v50  ;;  %vm2308_vm9 = vmmov %vm2306_vm7 }
 0x1f4   :  { %v969_v1 = vsel %vm2305_vm10, %v1651_v57, %v1656_v59  ;;  %v971_v3 = vsel %vm2306_vm7, %v1656_v59, %v1651_v57  ;;  %v968_v27 = vsel %vm2307_vm13, %v1650_v58, %v1655_v60  ;;  %v970_v4 = vsel %vm2308_vm9, %v1655_v60, %v1650_v58  ;;  %1499 = vmatmul.mubr.msk.bf16.vlgmr.msra.gmra.mxu0 %vm795_vm3, %v770_v46  ;;  %vm1514_vm13 = vmpackc.low %vm1835_vm11, %vm1835_vm11  ;;  %v1522_v46 = vld [vmem:[%s2281_s3 + $0x58] sm:$0xff]  ;;  %v1530_v60 = vld [vmem:[%s2281_s3 + $0x60] sm:$0xff] }
 0x1f5   :  { %v1512_v9 = vpack.c.bf16 %v969_v1, %v968_v27  ;;  %v1515_v10 = vpack.c.bf16 %v971_v3, %v970_v4  ;;  %1507 = vmatpush1.bf16.msk.msra.mxu1 %vm1505_vm4, %v1506_v51  ;;  %v1679_v11 = vpop.permute.xlu0 %1678  ;;  %1017 = vmatprep.mubr.bf16.mxu0 %v1698_v2  ;;  %v1661_v18 = vunpack.i.h.bf16 %v1659_v61  ;;  %v1660_v19 = vunpack.i.l.bf16 %v1659_v61  ;;  %v1531_v61 = vld [vmem:[%s2281_s3 + $0x68] sm:$0xff] }
 0x1f6   :  { %v1681_v21 = vunpack.i.h.bf16 %v1679_v11  ;;  %v1680_v22 = vunpack.i.l.bf16 %v1679_v11  ;;  %1055 = vmatprep.subr.bf16.mxu1 %v1037_v62  ;;  %vm2309_vm4 = vcmp.lt.s32.totalorder %v1779_v7, 127  ;;  %v1107_v51 = vpack.c.bf16 %v1522_v46, %v1521_v23 }
 0x1f7   :  { %v1664_v25 = vpop.permute.xlu1 %1663  ;;  %1513 = vmatprep.subr.msk.bf16.mxu0 %vm1493_vm5, %v1512_v9  ;;  %vm2310_vm10 = vmmov %vm2309_vm4  ;;  %vm2313_vm5 = vcmp.lt.s32.totalorder %v1779_v7, 113  ;;  %v1179_v5 = vpack.c.bf16 %v1531_v61, %v1530_v60  ;;  %v1540_v7 = vld [vmem:[%s2281_s3 + $0x78] sm:$0xff] }
 0x1f8   :  { %v1097_v12 = vsel %vm2309_vm4, %v1661_v18, %v1681_v21  ;;  %v1099_v13 = vsel %vm2310_vm10, %v1681_v21, %v1661_v18  ;;  %vm2311_vm7 = vmmov %vm2309_vm4  ;;  %1508 = vmatmul.mubr.msk.bf16.vlgmr.msra.gmra.mxu1 %vm795_vm3, %v907_v63  ;;  %1516 = vmatpush1.bf16.msk.msra.mxu0 %vm1514_vm13, %v1515_v10  ;;  %v1666_v36 = vunpack.i.h.bf16 %v1664_v25  ;;  %v1665_v37 = vunpack.i.l.bf16 %v1664_v25 }
 0x1f9   :  { %v1096_v20 = vsel %vm2311_vm7, %v1660_v19, %v1680_v22  ;;  %vm2312_vm9 = vmmov %vm2309_vm4  ;;  %1056 = vmatpush1.bf16.msra.mxu1 %v1036_v26  ;;  %v1684_v35 = vpop.permute.xlu0 %1683  ;;  %1073 = vmatprep.mubr.bf16.mxu1 %v1698_v2 }
 0x1fa   :  { %v1098_v17 = vsel %vm2312_vm9, %v1680_v22, %v1660_v19  ;;  %v1527_v34 = vpack.c.bf16 %v1097_v12, %v1096_v20  ;;  %v1686_v38 = vunpack.i.h.bf16 %v1684_v35  ;;  %v1685_v39 = vunpack.i.l.bf16 %v1684_v35  ;;  %vm2314_vm4 = vmmov %vm2313_vm5  ;;  %v1539_v19 = vld [vmem:[%s2281_s3 + $0x70] sm:$0xff]  ;;  %v1546_v22 = vld [vmem:[%s2281_s3 + $0x88] sm:$0xff] }
 0x1fb   :  { %v1524_v33 = vpack.c.bf16 %v1099_v13, %v1098_v17  ;;  %v1669_v40 = vpop.permute.xlu1 %1668  ;;  %vm2315_vm10 = vmmov %vm2314_vm4  ;;  %v1251_v21 = vpack.c.bf16 %v1540_v7, %v1539_v19  ;;  %v1323_v25 = vpack.c.bf16 %v1546_v22, %v1545_v49 }
 0x1fc   :  { %v1169_v42 = vsel %vm2313_vm5, %v1666_v36, %v1686_v38  ;;  %v1171_v43 = vsel %vm2314_vm4, %v1686_v38, %v1666_v36  ;;  %v1168_v44 = vsel %vm2315_vm10, %v1665_v37, %v1685_v39  ;;  %vm2316_vm7 = vmmov %vm2314_vm4  ;;  %1517 = vmatmul.mubr.msk.bf16.vlgmr.msra.gmra.mxu0 %vm795_vm3, %v979_v28  ;;  %v1671_v0 = vunpack.i.h.bf16 %v1669_v40 }
 0x1fd   :  { %1525 = vmatprep.subr.msk.bf16.mxu0 %vm1502_vm0, %v1524_v33  ;;  %v1170_v45 = vsel %vm2316_vm7, %v1685_v39, %v1665_v37  ;;  %v1536_v32 = vpack.c.bf16 %v1169_v42, %v1168_v44  ;;  %v1689_v14 = vpop.permute.xlu0 %1688  ;;  %1145 = vmatprep.mubr.bf16.mxu0 %v1698_v2  ;;  %v1670_v47 = vunpack.i.l.bf16 %v1669_v40 }
 0x1fe   :  { %v1533_v48 = vpack.c.bf16 %v1171_v43, %v1170_v45  ;;  %1528 = vmatpush1.bf16.msk.msra.mxu0 %vm1526_vm12, %v1527_v34  ;;  %v1691_v15 = vunpack.i.h.bf16 %v1689_v14  ;;  %v1690_v24 = vunpack.i.l.bf16 %v1689_v14 }
 0x1ff   :  { %v1674_v50 = vpop.permute.xlu1 %1673 }
 0x200   :  { %1534 = vmatprep.subr.msk.bf16.mxu1 %vm1532_vm8, %v1533_v48  ;;  %v1241_v54 = vsel %vm584_vm1, %v1671_v0, %v1691_v15  ;;  %v1243_v57 = vsel %vm584_vm1, %v1691_v15, %v1671_v0  ;;  %v1240_v58 = vsel %vm584_vm1, %v1670_v47, %v1690_v24  ;;  %v1242_v59 = vsel %vm584_vm1, %v1690_v24, %v1670_v47  ;;  %vm2318_vm1 = vmmov %vm2317_vm15 }
 0x201   :  { %1520 = vmatmul.mubr.msk.bf16.vlgmr.msra.gmra.mxu1 %vm795_vm3, %v1035_v41  ;;  %v1252_v62 = vpack.c.bf16 %v1241_v54, %v1240_v58  ;;  %v1542_v63 = vpack.c.bf16 %v1243_v57, %v1242_v59  ;;  %v1694_v1 = vpop.permute.xlu0 %1693  ;;  %v1676_v8 = vunpack.i.h.bf16 %v1674_v50  ;;  %v1675_v3 = vunpack.i.l.bf16 %v1674_v50  ;;  %vm2319_vm0 = vmmov %vm2318_vm1 }
 0x202   :  { %1537 = vmatpush1.bf16.msk.msra.mxu1 %vm1514_vm13, %v1536_v32  ;;  %1217 = vmatprep.mubr.bf16.mxu1 %v1698_v2  ;;  %v1696_v27 = vunpack.i.h.bf16 %v1694_v1  ;;  %v1695_v4 = vunpack.i.l.bf16 %v1694_v1  ;;  %vm2320_vm11 = vmmov %vm2319_vm0 }
 0x203   :  { %1543 = vmatprep.subr.msk.bf16.mxu0 %vm1541_vm6, %v1542_v63  ;;  %vm1547_vm13 = vmpackc.low %vm1947_vm14, %vm1947_vm14  ;;  %vm1456_vm14 = vcmask 1024  }
 0x204   :  { %v1313_v6 = vsel %vm2317_vm15, %v1676_v8, %v1696_v27  ;;  %v1315_v9 = vsel %vm2318_vm1, %v1696_v27, %v1676_v8  ;;  %v1312_v30 = vsel %vm2319_vm0, %v1675_v3, %v1695_v4  ;;  %v1314_v10 = vsel %vm2320_vm11, %v1695_v4, %v1675_v3  ;;  %1529 = vmatmul.mubr.msk.bf16.vlgmr.msra.gmra.mxu0 %vm795_vm3, %v1107_v51 }
 0x205   :  { %v1548_v11 = vpack.c.bf16 %v1315_v9, %v1314_v10  ;;  %v1551_v18 = vpack.c.bf16 %v1313_v6, %v1312_v30  ;;  %1272 = vmatpush1.bf16.msra.mxu0 %v1252_v62  ;;  %1289 = vmatprep.mubr.bf16.mxu0 %v1698_v2 }
 0x207   :  { %1549 = vmatprep.subr.msk.bf16.mxu1 %vm1547_vm13, %v1548_v11 }
 0x209   :  { %1538 = vmatmul.mubr.msk.bf16.vlgmr.msra.gmra.mxu1 %vm795_vm3, %v1179_v5 }
 0x20a   :  { %1552 = vmatpush1.bf16.msk.msra.mxu1 %vm1526_vm12, %v1551_v18  ;;  %1361 = vmatprep.mubr.bf16.mxu1 %v1698_v2 }
 0x20c   :  { %1544 = vmatmul.mubr.msk.bf16.vlgmr.msra.gmra.mxu0 %vm795_vm3, %v1251_v21  ;;  %v1381_v19 = vpop.permute.xlu1 %1380 }
 0x211   :  { %1553 = vmatmul.mubr.msk.bf16.vlgmr.msra.gmra.mxu1 %vm795_vm3, %v1323_v25 }
 0x2b0   :  { %v833_v26 = vpop.f32.mrf.mxu1 }
 0x2b2   :  { %v835_v28 = vpop.f32.mrf.mxu1 }
 0x2b4   :  { %v837_v16 = vpop.f32.mrf.mxu1  ;;  %v879_v12 = vpop.f32.mrf.mxu0 }
 0x2b5   :  { %v880_v41 = vadd.f32 %v879_v12, %v833_v26 }
 0x2b6   :  { %v839_v13 = vpop.f32.mrf.mxu1  ;;  %v881_v20 = vpop.f32.mrf.mxu0 }
 0x2b7   :  { %v882_v44 = vadd.f32 %v881_v20, %v835_v28 }
 0x2b8   :  { %v883_v2 = vpop.f32.mrf.mxu0  ;;  %v947_v17 = vpop.f32.mrf.mxu1 }
 0x2b9   :  { %v956_v45 = vadd.f32 %v947_v17, %v880_v41  ;;  %v884_v48 = vadd.f32 %v883_v2, %v837_v16 }
 0x2ba   :  { %v885_v31 = vpop.f32.mrf.mxu0  ;;  %v949_v29 = vpop.f32.mrf.mxu1 }
 0x2bb   :  { %v957_v32 = vadd.f32 %v949_v29, %v882_v44  ;;  %v886_v15 = vadd.f32 %v885_v31, %v839_v13 }
 0x2bc   :  { %v951_v33 = vpop.f32.mrf.mxu1  ;;  %v1019_v34 = vpop.f32.mrf.mxu0 }
 0x2bd   :  { %v1028_v14 = vadd.f32 %v1019_v34, %v956_v45  ;;  %v958_v24 = vadd.f32 %v951_v33, %v884_v48  ;;  %v1386_v33 = vpop.permute.xlu0 %1385 }
 0x2be   :  { %v953_v35 = vpop.f32.mrf.mxu1  ;;  %v1021_v36 = vpop.f32.mrf.mxu0 }
 0x2bf   :  { %v1029_v50 = vadd.f32 %v1021_v36, %v957_v32  ;;  %v959_v58 = vadd.f32 %v953_v35, %v886_v15 }
 0x2c0   :  { %v1023_v37 = vpop.f32.mrf.mxu0 }
 0x2c1   :  { %v1075_v38 = vpop.f32.mrf.mxu1  ;;  %v1030_v59 = vadd.f32 %v1023_v37, %v958_v24 }
 0x2c2   :  { %v1025_v39 = vpop.f32.mrf.mxu0  ;;  %v1084_v51 = vadd.f32 %v1075_v38, %v1028_v14 }
 0x2c3   :  { %v1077_v40 = vpop.f32.mrf.mxu1  ;;  %v1031_v1 = vadd.f32 %v1025_v39, %v959_v58 }
 0x2c4   :  { %v1147_v43 = vpop.f32.mrf.mxu0  ;;  %v1085_v60 = vadd.f32 %v1077_v40, %v1029_v50 }
 0x2c5   :  { %v1079_v42 = vpop.f32.mrf.mxu1  ;;  %v1156_v61 = vadd.f32 %v1147_v43, %v1084_v51 }
 0x2c6   :  { %v1149_v46 = vpop.f32.mrf.mxu0  ;;  %v1086_v8 = vadd.f32 %v1079_v42, %v1030_v59 }
 0x2c7   :  { %v1081_v23 = vpop.f32.mrf.mxu1  ;;  %v1157_v3 = vadd.f32 %v1149_v46, %v1085_v60 }
 0x2c8   :  { %v1151_v0 = vpop.f32.mrf.mxu0  ;;  %v1087_v6 = vadd.f32 %v1081_v23, %v1031_v1 }
 0x2c9   :  { %v1219_v47 = vpop.f32.mrf.mxu1  ;;  %v1158_v9 = vadd.f32 %v1151_v0, %v1086_v8 }
 0x2ca   :  { %v1153_v54 = vpop.f32.mrf.mxu0  ;;  %v1228_v27 = vadd.f32 %v1219_v47, %v1156_v61 }
 0x2cb   :  { %v1221_v57 = vpop.f32.mrf.mxu1  ;;  %v1159_v7 = vadd.f32 %v1153_v54, %v1087_v6 }
 0x2cc   :  { %v1291_v63 = vpop.f32.mrf.mxu0  ;;  %v1229_v30 = vadd.f32 %v1221_v57, %v1157_v3 }
 0x2cd   :  { %v1223_v62 = vpop.f32.mrf.mxu1  ;;  %v1300_v10 = vadd.f32 %v1291_v63, %v1228_v27 }
 0x2ce   :  { %v1293_v5 = vpop.f32.mrf.mxu0  ;;  %v1230_v21 = vadd.f32 %v1223_v62, %v1158_v9 }
 0x2cf   :  { %v1225_v4 = vpop.f32.mrf.mxu1  ;;  %v1301_v49 = vadd.f32 %v1293_v5, %v1229_v30 }
 0x2d0   :  { %v1295_v11 = vpop.f32.mrf.mxu0  ;;  %v1231_v28 = vadd.f32 %v1225_v4, %v1159_v7 }
 0x2d1   :  { %v1363_v18 = vpop.f32.mrf.mxu1  ;;  %v1302_v16 = vadd.f32 %v1295_v11, %v1230_v21 }
 0x2d2   :  { %v1372_v22 = vadd.f32 %v1363_v18, %v1300_v10  ;;  %v1297_v25 = vpop.f32.mrf.mxu0 }
 0x2d3   :  { %v1365_v26 = vpop.f32.mrf.mxu1  ;;  %v1303_v2 = vadd.f32 %v1297_v25, %v1231_v28 }
 0x2d4   :  { %v1388_v12 = vadd.f32 %v1381_v19, %v1372_v22  ;;  %v1373_v13 = vadd.f32 %v1365_v26, %v1301_v49 }
 0x2d5   :  { %v1367_v20 = vpop.f32.mrf.mxu1 }
 0x2d6   :  { %v1389_v17 = vadd.f32 %v1381_v19, %v1373_v13  ;;  %v1374_v31 = vadd.f32 %v1367_v20, %v1302_v16  ;;  %v1392_v29 = vadd.f32 %v1388_v12, %v2021_v52  ;;  %v1708_v52 = vmov 0.0  }
 0x2d7   :  { %v1369_v34 = vpop.f32.mrf.mxu1  ;;  %1557 = vmatprep.subr.bf16.mxu0 %v1708_v52  ;;  %1559 = vmatprep.mubr.msk.bf16.mxu0 %vm1709_vm2, %v1708_v52 }
 0x2d8   :  { %v1390_v35 = vadd.f32 %v1386_v33, %v1374_v31  ;;  %v1375_v36 = vadd.f32 %v1369_v34, %v1303_v2  ;;  %v1393_v37 = vadd.f32 %v1389_v17, %v2025_v55  ;;  %v1396_v39 = vmax.f32 %v1392_v29, 0.0 }
 0x2da   :  { %v1391_v38 = vadd.f32 %v1386_v33, %v1375_v36  ;;  %v1397_v40 = vmax.f32 %v1393_v37, 0.0  ;;  %v1394_v41 = vadd.f32 %v1390_v35, %v2023_v53  ;;  %v1409_v53 = vld [vmem:[%s2282_s5] sm:$0x3] }
 0x2db   :  { %v1410_v0 = vpack.c.bf16 %v1409_v53, %v1409_v53 }
 0x2dc   :  { %v1400_v42 = vadd.f32 %v1397_v40, %v1396_v39  ;;  %v1395_v43 = vadd.f32 %v1391_v38, %v2027_v56  ;;  %v1398_v44 = vmax.f32 %v1394_v41, 0.0  ;;  %v1412_v56 = vld [vmem:[%s2283_s6] sm:$0x3] }
 0x2de   :  { %1401 = vadd.xlane.f32.xlu1 %v1400_v42  ;;  %v1399_v45 = vmax.f32 %v1395_v43, 0.0 }
 0x2e0   :  { %v1403_v23 = vadd.f32 %v1399_v45, %v1398_v44 }
 0x2e2   :  { %1404 = vadd.xlane.f32.xlu0 %v1403_v23 }
 0x367   :  { %v1402_v46 = vpop.xlane.xlu1 %1401 }
 0x368   :  { %v1407_v55 = vmul.f32 0.00390625, %v1402_v46 }
 0x36b   :  { %v1405_v48 = vpop.xlane.xlu0 %1404 }
 0x36c   :  { %v1408_v32 = vmul.f32 0.00390625, %v1405_v48 }
 0x36e   :  { %v1411_v14 = vpack.c.bf16 %v1408_v32, %v1407_v55 }
 0x370   :  { %1558 = vmatpush3.bf16.msra.mxu0 %v1411_v14 }
 0x373   :  { %1560 = vmatmul.mubr.msk.bf16.vlgmr.msra.gmra.mxu0 %vm795_vm3, %v1410_v0 }
 0x433   :  { %v1450_v47 = vpop.f32.mrf.mxu0 }
 0x434   :  { %v1451_v15 = vadd.f32 %v1450_v47, %v1412_v56 }
 0x435   :  { %v1561_v24 = vpop.f32.mrf.mxu0 }
 0x436   :  { %1457 = vst.msk [vmem:[%s2284_s7] sm:$0x3] %vm1456_vm14, %v1451_v15 }
 0x437   :  { %v1453_v50 = vpop.f32.mrf.mxu0 }
 0x439   :  { %v1562_v51 = vpop.f32.mrf.mxu0 }

// kernel: inspector_forward.1
= control target key start
LH: loop header
LB: loop body
LE: loop exit
PB: predicated region body
PF: predicated region fallthrough
CT: control target
= control target key end

     0   :  { %s3251_s25 = smov 17   ;;  %s3252_s26 = smov 16   ;;  %v3254_v6 = vmov 0   ;;  %v43_v11 = vlaneseq  ;;  %vm133_vm0 = vcmask 1044480   ;;  %vm134_vm1 = vcmask 1045504   ;;  %s4333_s0 = inlined_call_operand.vmem [shape: f32[11,256], index: 0, kind: input, shape index: {}]   ;;  %s4334_s2 = inlined_call_operand.vmem [shape: f32[16,1], index: 2, kind: input, shape index: {}]   ;;  %s4335_s1 = inlined_call_operand.vmem [shape: f32[9,16,11], index: 1, kind: input, shape index: {}]   ;;  %s4336_s4 = inlined_call_operand.vmem [shape: f32[3,1], index: 4, kind: input, shape index: {}]   ;;  %s4337_s3 = inlined_call_operand.vmem [shape: f32[9,3,16], index: 3, kind: input, shape index: {}]   ;;  %s4338_s6 = inlined_call_operand.vmem [shape: f32[16,1], index: 6, kind: input, shape index: {}]   ;;  %s4339_s5 = inlined_call_operand.vmem [shape: f32[9,16,3], index: 5, kind: input, shape index: {}]   ;;  %s4340_s8 = inlined_call_operand.vmem [shape: f32[16,1], index: 8, kind: input, shape index: {}]   ;;  %s4341_s7 = inlined_call_operand.vmem [shape: f32[9,16,16], index: 7, kind: input, shape index: {}]   ;;  %s4342_s9 = inlined_call_operand.vmem [shape: f32[2,16], index: 9, kind: input, shape index: {}]   ;;  %s4343_s10 = inlined_call_operand.vmem [shape: f32[2,1], index: 10, kind: input, shape index: {}]   ;;  %s4344_s11 = inlined_call_operand.vmem [shape: f32[2,1], index: 11, kind: output, shape index: {}]  }
   0x1   :  { %v3326_v0 = vld [vmem:[%s4333_s0] sm:$0xff]  ;;  %v3331_v1 = vld [vmem:[%s4333_s0 + $0x10] sm:$0x7]  ;;  %v3336_v2 = vld [vmem:[%s4333_s0 + $0x8] sm:$0xff]  ;;  %s3253_s27 = smov 15   ;;  %175 = vmatprep.mubr.bf16.mxu0 %v3254_v6  ;;  %227 = vmatprep.mubr.bf16.mxu1 %v3254_v6  ;;  %s3256_s28 = smov 127  }
   0x2   :  { %v2975_v3 = vpack.i.bf16 %v3331_v1, %v3326_v0  ;;  %v3343_v4 = vld [vmem:[%s4333_s0 + $0x18] sm:$0x7]  ;;  %3045 = vset.pattern.permute.xlu0 %v3254_v6  ;;  %3046 = vset.pattern.permute.xlu1 %v3254_v6  ;;  %s3255_s0 = smov 1   ;;  %v412_v8 = vpack.c.bf16 %v3331_v1, %v3326_v0  ;;  %s3257_s29 = smov 113   ;;  %v808_v9 = vld [vmem:[%s4334_s2] sm:$0xff]  ;;  %v809_v10 = vld [vmem:[%s4334_s2 + $0x8] sm:$0xff] }
   0x3   :  { %v2980_v5 = vpack.i.bf16 %v3343_v4, %v3336_v2  ;;  %v413_v7 = vpack.c.bf16 %v3343_v4, %v3336_v2  ;;  %s3258_s30 = smov 112   ;;  %s3259_s12 = smov 111   ;;  %v3377_v12 = vand.u32 127, %v43_v11  ;;  %v3260_v15 = vmov 65535   ;;  %v3388_v18 = vld [vmem:[%s4335_s1 + $0x10] sm:$0xff]  ;;  %v3393_v19 = vld [vmem:[%s4335_s1 + $0x18] sm:$0xff] }
   0x4   :  { %2976 = vrot.lane.b32.xlu1 %v2975_v3, %s3251_s25  ;;  %2966 = vrot.lane.b32.xlu0 %v2975_v3, %s3252_s26  ;;  %v135_v16 = vsel %vm133_vm0, 4294967295, %v3260_v15  ;;  %v3400_v22 = vld [vmem:[%s4335_s1] sm:$0xff]  ;;  %v3405_v23 = vld [vmem:[%s4335_s1 + $0x8] sm:$0xff]  ;;  %v4367_v28 = vmov 0  ;;  %v126_v32 = vpack.c.bf16 %v3393_v19, %v3388_v18  ;;  %vm129_vm10 = vcmask 89088  }
   0x5   :  { %v3380_v13 = vadd.s32 128, %v3377_v12  ;;  %v50_v14 = vand.u32 15, %v3377_v12  ;;  %v3410_v24 = vld [vmem:[%s4335_s1 + $0x20] sm:$0xff]  ;;  %vm4348_vm2 = vcmp.ge.s32.totalorder %v3377_v12, 16  ;;  %vm4352_vm3 = vcmp.lt.s32.totalorder %v3377_v12, 15  ;;  %v3417_v25 = vld [vmem:[%s4335_s1 + $0x28] sm:$0xff] }
   0x6   :  { %v3422_v26 = vld [vmem:[%s4335_s1 + $0x30] sm:$0xff]  ;;  %v3427_v27 = vld [vmem:[%s4335_s1 + $0x38] sm:$0xff]  ;;  %vm4349_vm6 = vcmp.lt.s32.totalorder %v3377_v12, 16  ;;  %v3439_v30 = vsel %vm134_vm1, %v135_v16, 0  ;;  %vm4350_vm7 = vcmp.lt.s32.totalorder %v3377_v12, 17  ;;  %v99_v33 = vpack.c.bf16 %v3405_v23, %v3400_v22  ;;  %v2779_v22 = vld [vmem:[%s4335_s1 + $0x48] sm:$0xff] }
   0x7   :  { %v57_v17 = vand.u32 15, %v3380_v13  ;;  %vm3429_vm4 = vcmp.le.s32.totalorder %v50_v14, 14  ;;  %vm3433_vm5 = vcmp.ge.s32.totalorder %v50_v14, 1  ;;  %vm4355_vm9 = vcmp.lt.s32.totalorder %v3377_v12, 1  ;;  %v2856_v31 = vld [vmem:[%s4339_s5 + $0x20] sm:$0xff]  ;;  %v2863_v29 = vld [vmem:[%s4339_s5 + $0x48] sm:$0xff] }
   0x8   :  { %2981 = vrot.lane.b32.xlu1 %v2980_v5, %s3251_s25  ;;  %2971 = vrot.lane.b32.xlu0 %v2980_v5, %s3252_s26  ;;  %v4368_v28 = vsel %vm3429_vm4, 4294967295, %v4367_v28  ;;  %v266_v38 = vpack.c.bf16 %v3417_v25, %v3410_v24  ;;  %v349_v39 = vpack.c.bf16 %v3427_v27, %v3422_v26  ;;  %v3462_v47 = vand.u32 %v413_v7, %v3439_v30  ;;  %vm3485_vm12 = vmand %vm4348_vm2, %vm3429_vm4  ;;  %v2781_v26 = vld [vmem:[%s4335_s1 + $0x50] sm:$0xff]  ;;  %v2782_v27 = vld [vmem:[%s4335_s1 + $0x58] sm:$0xff] }
   0x9   :  { %vm3442_vm8 = vcmp.ge.s32.totalorder %v57_v17, 1  ;;  %vm3457_vm11 = vcmp.le.s32.totalorder %v57_v17, 14  ;;  %v3465_v48 = vand.u32 %v412_v8, %v3439_v30  ;;  %vm4345_vm13 = vcmp.lt.s32.totalorder %v3377_v12, 127  ;;  %vm3514_vm14 = vmand %vm4348_vm2, %vm3433_vm5 }
   0xa   :  { %vm4346_vm15 = vcmp.lt.s32.totalorder %v3377_v12, 113  ;;  %vm4347_vm0 = vcmp.lt.s32.totalorder %v3377_v12, 112  ;;  %vm4356_vm1 = vcmp.lt.s32.totalorder %v3380_v13, 240 }
   0xc   :  { %2991 = vrot.lane.b32.xlu1 %v2980_v5, %s3253_s27  ;;  %2986 = vrot.lane.b32.xlu0 %v2975_v3, %s3253_s27 }
  0x10   :  { %3001 = vrot.lane.b32.xlu1 %v2980_v5, %s3255_s0  ;;  %2996 = vrot.lane.b32.xlu0 %v2975_v3, %s3255_s0 }
  0x14   :  { %3011 = vrot.lane.b32.xlu1 %v2980_v5, %s3256_s28  ;;  %3006 = vrot.lane.b32.xlu0 %v2975_v3, %s3256_s28 }
  0x18   :  { %3021 = vrot.lane.b32.xlu1 %v2980_v5, %s3257_s29  ;;  %3016 = vrot.lane.b32.xlu0 %v2975_v3, %s3257_s29 }
  0x1c   :  { %3031 = vrot.lane.b32.xlu1 %v2980_v5, %s3258_s30  ;;  %3026 = vrot.lane.b32.xlu0 %v2975_v3, %s3258_s30 }
  0x20   :  { %3041 = vrot.lane.b32.xlu1 %v2980_v5, %s3259_s12  ;;  %3036 = vrot.lane.b32.xlu0 %v2975_v3, %s3259_s12 }
  0x24   :  { %812 = vperm.xlu0 %3045, %v808_v9   ;;  %817 = vperm.xlu1 %3046, %v809_v10  }
  0x76   :  { %v3395_v20 = vpop.permute.xlu1 %2976  ;;  %v2967_v21 = vpop.permute.xlu0 %2966 }
  0x77   :  { %v2978_v34 = vunpack.i.l.bf16 %v3395_v20  ;;  %v2969_v35 = vunpack.i.h.bf16 %v2967_v21  ;;  %v2968_v40 = vunpack.i.l.bf16 %v2967_v21  ;;  %v2979_v44 = vunpack.i.h.bf16 %v3395_v20 }
  0x7a   :  { %v2982_v36 = vpop.permute.xlu1 %2981  ;;  %v2972_v37 = vpop.permute.xlu0 %2971 }
  0x7b   :  { %v2983_v41 = vunpack.i.l.bf16 %v2982_v36  ;;  %v2974_v42 = vunpack.i.h.bf16 %v2972_v37  ;;  %v2973_v43 = vunpack.i.l.bf16 %v2972_v37  ;;  %v2984_v45 = vunpack.i.h.bf16 %v2982_v36 }
  0x7d   :  { %v111_v49 = vsel %vm4349_vm6, %v2968_v40, %v2973_v43  ;;  %v112_v50 = vsel %vm4349_vm6, %v2969_v35, %v2974_v42  ;;  %v113_v51 = vsel %vm4349_vm6, %v2973_v43, %v2968_v40  ;;  %v114_v52 = vsel %vm4349_vm6, %v2974_v42, %v2969_v35 }
  0x7e   :  { %v2992_v53 = vpop.permute.xlu1 %2991  ;;  %v2987_v54 = vpop.permute.xlu0 %2986  ;;  %v128_v55 = vpack.c.bf16 %v112_v50, %v111_v49  ;;  %v119_v56 = vsel %vm4348_vm2, %v113_v51, 0.0  ;;  %v121_v57 = vsel %vm4348_vm2, %v114_v52, 0.0  ;;  %v79_v58 = vsel %vm4350_vm7, %v2978_v34, %v2983_v41 }
  0x7f   :  { %v2994_v59 = vunpack.i.h.bf16 %v2992_v53  ;;  %v2993_v60 = vunpack.i.l.bf16 %v2992_v53  ;;  %v2989_v62 = vunpack.i.h.bf16 %v2987_v54  ;;  %v2988_v63 = vunpack.i.l.bf16 %v2987_v54 }
  0x80   :  { %v141_v0 = vand.u32 %v3439_v30, %v128_v55  ;;  %v127_v1 = vpack.c.bf16 %v121_v57, %v119_v56  ;;  %v80_v2 = vsel %vm4350_vm7, %v2979_v44, %v2984_v45  ;;  %v94_v3 = vsel %vm3442_vm8, %v79_v58, 0.0 }
  0x81   :  { %v248_v4 = vsel %vm4352_vm3, %v2989_v62, %v2994_v59  ;;  %v250_v5 = vsel %vm4352_vm3, %v2994_v59, %v2989_v62  ;;  %v247_v7 = vsel %vm4352_vm3, %v2988_v63, %v2993_v60  ;;  %v249_v8 = vsel %vm4352_vm3, %v2993_v60, %v2988_v63 }
  0x82   :  { %v261_v9 = vsel %vm3485_vm12, %v250_v5, 0.0  ;;  %v259_v10 = vsel %vm3485_vm12, %v249_v8, 0.0  ;;  %v3002_v11 = vpop.permute.xlu1 %3001  ;;  %v2997_v14 = vpop.permute.xlu0 %2996  ;;  %157 = vmatprep.subr.bf16.mxu0 %v141_v0  ;;  %v138_v16 = vand.u32 %v3439_v30, %v127_v1  ;;  %v96_v17 = vsel %vm3442_vm8, %v80_v2, 0.0 }
  0x83   :  { %v267_v21 = vpack.c.bf16 %v261_v9, %v259_v10  ;;  %v3004_v35 = vunpack.i.h.bf16 %v3002_v11  ;;  %v3003_v36 = vunpack.i.l.bf16 %v3002_v11  ;;  %v2999_v37 = vunpack.i.h.bf16 %v2997_v14 }
  0x84   :  { %v2998_v40 = vunpack.i.l.bf16 %v2997_v14  ;;  %158 = vmatpush1.bf16.msra.mxu0 %v138_v16  ;;  %v101_v42 = vpack.c.bf16 %v96_v17, %v94_v3  ;;  %v81_v43 = vsel %vm4350_vm7, %v2983_v41, %v2978_v34  ;;  %v82_v49 = vsel %vm4350_vm7, %v2984_v45, %v2979_v44 }
  0x85   :  { %v335_v50 = vsel %vm4355_vm9, %v2999_v37, %v3004_v35  ;;  %v337_v51 = vsel %vm4355_vm9, %v3004_v35, %v2999_v37  ;;  %v93_v52 = vsel %vm3514_vm14, %v81_v43, 0.0  ;;  %v95_v53 = vsel %vm3514_vm14, %v82_v49, 0.0 }
  0x86   :  { %v344_v34 = vsel %vm3433_vm5, %v337_v51, 0.0  ;;  %v334_v41 = vsel %vm4355_vm9, %v2998_v40, %v3003_v36  ;;  %v336_v44 = vsel %vm4355_vm9, %v3003_v36, %v2998_v40  ;;  %v193_v45 = vand.u32 %v3439_v30, %v101_v42  ;;  %v3012_v54 = vpop.permute.xlu1 %3011  ;;  %v3007_v55 = vpop.permute.xlu0 %3006 }
  0x87   :  { %v342_v56 = vsel %vm3433_vm5, %v336_v44, 0.0  ;;  %v100_v57 = vpack.c.bf16 %v95_v53, %v93_v52  ;;  %2770 = vmatmul.mubr.msk.bf16.vlgmr.msra.gmra.mxu0 %vm129_vm10, %v126_v32  ;;  %v260_v58 = vsel %vm3457_vm11, %v247_v7, 0.0  ;;  %v262_v59 = vsel %vm3457_vm11, %v248_v4, 0.0  ;;  %v2778_v53 = vld [vmem:[%s4335_s1 + $0x40] sm:$0xff] }
  0x88   :  { %v350_v60 = vpack.c.bf16 %v344_v34, %v342_v56  ;;  %209 = vmatprep.subr.bf16.mxu1 %v193_v45  ;;  %v268_v62 = vpack.c.bf16 %v262_v59, %v260_v58  ;;  %v3014_v63 = vunpack.i.h.bf16 %v3012_v54  ;;  %v3013_v0 = vunpack.i.l.bf16 %v3012_v54  ;;  %310 = vmatprep.mubr.bf16.mxu0 %v3254_v6 }
  0x89   :  { %v190_v1 = vand.u32 %v3439_v30, %v100_v57  ;;  %v3009_v18 = vunpack.i.h.bf16 %v3007_v55  ;;  %v3008_v19 = vunpack.i.l.bf16 %v3007_v55  ;;  %v273_v32 = vand.u32 %v267_v21, %v3439_v30 }
  0x8a   :  { %v276_v2 = vand.u32 %v268_v62, %v3439_v30  ;;  %v343_v3 = vsel %vm3442_vm8, %v334_v41, 0.0  ;;  %v345_v4 = vsel %vm3442_vm8, %v335_v50, 0.0  ;;  %v3022_v5 = vpop.permute.xlu1 %3021  ;;  %v3017_v7 = vpop.permute.xlu0 %3016  ;;  %v356_v35 = vand.u32 %v350_v60, %v3439_v30 }
  0x8b   :  { %210 = vmatpush1.bf16.msra.mxu1 %v190_v1  ;;  %v480_v8 = vsel %vm4345_vm13, %v3009_v18, %v3014_v63  ;;  %v482_v9 = vsel %vm4345_vm13, %v3014_v63, %v3009_v18  ;;  %v479_v10 = vsel %vm4345_vm13, %v3008_v19, %v3013_v0  ;;  %v481_v11 = vsel %vm4345_vm13, %v3013_v0, %v3008_v19  ;;  %vm3600_vm13 = vmand %vm4356_vm1, %vm3442_vm8 }
  0x8c   :  { %292 = vmatprep.subr.bf16.mxu0 %v276_v2  ;;  %v489_v14 = vsel %vm3429_vm4, %v480_v8, 0.0  ;;  %v487_v16 = vsel %vm3429_vm4, %v479_v10, 0.0  ;;  %v351_v17 = vpack.c.bf16 %v345_v4, %v343_v3  ;;  %v3024_v21 = vunpack.i.h.bf16 %v3022_v5 }
  0x8d   :  { %293 = vmatpush1.bf16.msra.mxu0 %v273_v32  ;;  %v3023_v36 = vunpack.i.l.bf16 %v3022_v5  ;;  %v3019_v37 = vunpack.i.h.bf16 %v3017_v7  ;;  %v3018_v40 = vunpack.i.l.bf16 %v3017_v7  ;;  %v495_v42 = vpack.c.bf16 %v489_v14, %v487_v16 }
  0x8e   :  { %2771 = vmatmul.mubr.msk.bf16.vlgmr.msra.gmra.mxu1 %vm129_vm10, %v99_v33  ;;  %v359_v43 = vand.u32 %v351_v17, %v3439_v30  ;;  %v3032_v49 = vpop.permute.xlu1 %3031  ;;  %v3027_v50 = vpop.permute.xlu0 %3026  ;;  %437 = vmatprep.subr.bf16.mxu0 %v3462_v47  ;;  %v488_v51 = vsel %vm3457_vm11, %v481_v11, 0.0  ;;  %v490_v52 = vsel %vm3457_vm11, %v482_v9, 0.0  ;;  %v4379_v41 = vmov 0 }
  0x8f   :  { %393 = vmatprep.mubr.bf16.mxu1 %v3254_v6  ;;  %v563_v23 = vsel %vm4346_vm15, %v3019_v37, %v3024_v21  ;;  %v565_v33 = vsel %vm4346_vm15, %v3024_v21, %v3019_v37  ;;  %v562_v47 = vsel %vm4346_vm15, %v3018_v40, %v3023_v36  ;;  %v564_v34 = vsel %vm4346_vm15, %v3023_v36, %v3018_v40 }
  0x90   :  { %v4380_v41 = vsel %vm3600_vm13, 4294967295, %v4379_v41  ;;  %375 = vmatprep.subr.bf16.mxu1 %v359_v43  ;;  %v576_v44 = vsel %vm3433_vm5, %v563_v23, 0.0  ;;  %v574_v45 = vsel %vm3433_vm5, %v562_v47, 0.0  ;;  %2774 = vmatmul.mubr.msk.bf16.vlgmr.msra.gmra.mxu0 %vm129_vm10, %v266_v38  ;;  %v3034_v54 = vunpack.i.h.bf16 %v3032_v49  ;;  %v2785_v43 = vld [vmem:[%s4335_s1 + $0x68] sm:$0xff] }
  0x91   :  { %v3033_v55 = vunpack.i.l.bf16 %v3032_v49  ;;  %376 = vmatpush1.bf16.msra.mxu1 %v356_v35  ;;  %v3029_v56 = vunpack.i.h.bf16 %v3027_v50  ;;  %v3028_v57 = vunpack.i.l.bf16 %v3027_v50  ;;  %438 = vmatpush1.bf16.msra.mxu0 %v3465_v48  ;;  %v496_v58 = vpack.c.bf16 %v490_v52, %v488_v51 }
  0x92   :  { %v411_v59 = vpack.c.bf16 %v2779_v22, %v2778_v53  ;;  %v582_v60 = vpack.c.bf16 %v576_v44, %v574_v45  ;;  %v501_v62 = vand.u32 %v495_v42, %v3439_v30  ;;  %455 = vmatprep.mubr.bf16.mxu0 %v3254_v6  ;;  %v3042_v63 = vpop.permute.xlu1 %3041  ;;  %v3037_v0 = vpop.permute.xlu0 %3036  ;;  %v575_v24 = vsel %vm3600_vm13, %v564_v34, 0.0  ;;  %v2784_v42 = vld [vmem:[%s4335_s1 + $0x60] sm:$0xff]  ;;  %v2787_v34 = vld [vmem:[%s4335_s1 + $0x70] sm:$0xff]  ;;  %v2788_v44 = vld [vmem:[%s4335_s1 + $0x78] sm:$0xff] }
  0x93   :  { %v577_v25 = vsel %vm3600_vm13, %v565_v33, 0.0  ;;  %v650_v38 = vsel %vm4347_vm0, %v3029_v56, %v3034_v54  ;;  %v652_v48 = vsel %vm4347_vm0, %v3034_v54, %v3029_v56  ;;  %v649_v1 = vsel %vm4347_vm0, %v3028_v57, %v3033_v55  ;;  %v2791_v45 = vld [vmem:[%s4335_s1 + $0x88] sm:$0xff] }
  0x94   :  { %v651_v18 = vsel %vm4347_vm0, %v3033_v55, %v3028_v57  ;;  %v504_v19 = vand.u32 %v496_v58, %v3439_v30  ;;  %v3044_v32 = vunpack.i.h.bf16 %v3042_v63  ;;  %v3043_v2 = vunpack.i.l.bf16 %v3042_v63  ;;  %vm3642_vm0 = vmand %vm4356_vm1, %vm3457_vm11 }
  0x95   :  { %vm4351_vm15 = vcmp.lt.s32.totalorder %v3377_v12, 111  ;;  %v3039_v3 = vunpack.i.h.bf16 %v3037_v0  ;;  %v3038_v4 = vunpack.i.l.bf16 %v3037_v0  ;;  %v583_v5 = vpack.c.bf16 %v577_v25, %v575_v24 }
  0x96   :  { %2777 = vmatmul.mubr.msk.bf16.vlgmr.msra.gmra.mxu1 %vm129_vm10, %v349_v39  ;;  %v665_v7 = vpack.c.bf16 %v650_v38, %v649_v1  ;;  %520 = vmatprep.subr.bf16.mxu1 %v504_v19  ;;  %v588_v8 = vand.u32 %v582_v60, %v3439_v30  ;;  %v658_v9 = vsel %vm4356_vm1, %v651_v18, 0.0  ;;  %v660_v10 = vsel %vm4356_vm1, %v652_v48, 0.0 }
  0x97   :  { %521 = vmatpush1.bf16.msra.mxu1 %v501_v62  ;;  %538 = vmatprep.mubr.bf16.mxu1 %v3254_v6  ;;  %v733_v39 = vsel %vm4351_vm15, %v3039_v3, %v3044_v32  ;;  %v735_v14 = vsel %vm4351_vm15, %v3044_v32, %v3039_v3  ;;  %v732_v16 = vsel %vm4351_vm15, %v3038_v4, %v3043_v2 }
  0x98   :  { %2780 = vmatmul.mubr.msk.bf16.vlgmr.msra.gmra.mxu0 %vm129_vm10, %v411_v59  ;;  %v744_v17 = vsel %vm3429_vm4, %v733_v39, 0.0  ;;  %v734_v21 = vsel %vm4351_vm15, %v3043_v2, %v3038_v4  ;;  %v742_v35 = vsel %vm3429_vm4, %v732_v16, 0.0  ;;  %v591_v36 = vand.u32 %v583_v5, %v3439_v30  ;;  %vm3780_vm15 = vmpackc.low %vm3457_vm11, %vm3457_vm11 }
  0x99   :  { %v750_v37 = vpack.c.bf16 %v744_v17, %v742_v35  ;;  %v666_v40 = vpack.c.bf16 %v660_v10, %v658_v9  ;;  %625 = vmatprep.mubr.bf16.mxu0 %v3254_v6  ;;  %v743_v49 = vsel %vm3642_vm0, %v734_v21, 0.0  ;;  %v745_v50 = vsel %vm3642_vm0, %v735_v14, 0.0 }
  0x9a   :  { %v494_v51 = vpack.c.bf16 %v2782_v27, %v2781_v26  ;;  %607 = vmatprep.subr.bf16.mxu0 %v591_v36  ;;  %v751_v52 = vpack.c.bf16 %v745_v50, %v743_v49  ;;  %v671_v22 = vand.u32 %v665_v7, %v3439_v30  ;;  %v581_v23 = vpack.c.bf16 %v2785_v43, %v2784_v42 }
  0x9b   :  { %608 = vmatpush1.bf16.msra.mxu0 %v588_v8  ;;  %v674_v53 = vand.u32 %v666_v40, %v3439_v30  ;;  %v756_v47 = vand.u32 %v750_v37, %v3439_v30  ;;  %v664_v54 = vpack.c.bf16 %v2788_v44, %v2787_v34 }
  0x9c   :  { %v759_v33 = vand.u32 %v751_v52, %v3439_v30  ;;  %v2790_v30 = vld [vmem:[%s4335_s1 + $0x80] sm:$0xff] }
  0x9d   :  { %690 = vmatprep.subr.bf16.mxu1 %v674_v53  ;;  %v749_v55 = vpack.c.bf16 %v2791_v45, %v2790_v30 }
  0x9e   :  { %2783 = vmatmul.mubr.msk.bf16.vlgmr.msra.gmra.mxu1 %vm129_vm10, %v494_v51  ;;  %775 = vmatprep.subr.bf16.mxu0 %v759_v33 }
  0x9f   :  { %691 = vmatpush1.bf16.msra.mxu1 %v671_v22  ;;  %708 = vmatprep.mubr.bf16.mxu1 %v3254_v6 }
  0xa0   :  { %2786 = vmatmul.mubr.msk.bf16.vlgmr.msra.gmra.mxu0 %vm129_vm10, %v581_v23 }
  0xa1   :  { %776 = vmatpush1.bf16.msra.mxu0 %v756_v47  ;;  %793 = vmatprep.mubr.bf16.mxu0 %v3254_v6 }
  0xa6   :  { %2789 = vmatmul.mubr.msk.bf16.vlgmr.msra.gmra.mxu1 %vm129_vm10, %v664_v54 }
  0xa7   :  { %905 = vmatprep.mubr.bf16.mxu1 %v3254_v6 }
  0xa8   :  { %2792 = vmatmul.mubr.msk.bf16.vlgmr.msra.gmra.mxu0 %vm129_vm10, %v749_v55  ;;  %vm3739_vm10 = vmpackc.low %vm4348_vm2, %vm4348_vm2 }
  0xa9   :  { %949 = vmatprep.mubr.bf16.mxu0 %v3254_v6  ;;  %vm3754_vm2 = vmpackc.low %vm3442_vm8, %vm3442_vm8 }
 0x147   :  { %v177_v56 = vpop.f32.mrf.mxu0 }
 0x149   :  { %v179_v57 = vpop.f32.mrf.mxu0 }
 0x14b   :  { %v181_v58 = vpop.f32.mrf.mxu0 }
 0x14d   :  { %v183_v59 = vpop.f32.mrf.mxu0 }
 0x14e   :  { %v229_v60 = vpop.f32.mrf.mxu1 }
 0x14f   :  { %v230_v48 = vadd.f32 %v229_v60, %v177_v56 }
 0x150   :  { %v231_v62 = vpop.f32.mrf.mxu1  ;;  %v312_v63 = vpop.f32.mrf.mxu0 }
 0x151   :  { %v232_v19 = vadd.f32 %v231_v62, %v179_v57  ;;  %v321_v32 = vadd.f32 %v312_v63, %v230_v48  ;;  %v813_v63 = vpop.permute.xlu0 %812  ;;  %v818_v48 = vpop.permute.xlu1 %817 }
 0x152   :  { %v233_v0 = vpop.f32.mrf.mxu1  ;;  %v314_v24 = vpop.f32.mrf.mxu0 }
 0x153   :  { %v234_v4 = vadd.f32 %v233_v0, %v181_v58  ;;  %v322_v5 = vadd.f32 %v314_v24, %v232_v19 }
 0x154   :  { %v235_v25 = vpop.f32.mrf.mxu1  ;;  %v316_v38 = vpop.f32.mrf.mxu0 }
 0x155   :  { %v236_v9 = vadd.f32 %v235_v25, %v183_v59  ;;  %v323_v26 = vadd.f32 %v316_v38, %v234_v4 }
 0x156   :  { %v395_v1 = vpop.f32.mrf.mxu1  ;;  %v318_v18 = vpop.f32.mrf.mxu0 }
 0x157   :  { %v404_v10 = vadd.f32 %v395_v1, %v321_v32  ;;  %v324_v16 = vadd.f32 %v318_v18, %v236_v9 }
 0x158   :  { %v397_v2 = vpop.f32.mrf.mxu1  ;;  %v457_v3 = vpop.f32.mrf.mxu0 }
 0x159   :  { %v405_v14 = vadd.f32 %v397_v2, %v322_v5  ;;  %v466_v17 = vadd.f32 %v457_v3, %v404_v10 }
 0x15a   :  { %v399_v7 = vpop.f32.mrf.mxu1  ;;  %v459_v8 = vpop.f32.mrf.mxu0 }
 0x15b   :  { %v406_v36 = vadd.f32 %v399_v7, %v323_v26  ;;  %v467_v37 = vadd.f32 %v459_v8, %v405_v14 }
 0x15c   :  { %v401_v27 = vpop.f32.mrf.mxu1  ;;  %v461_v39 = vpop.f32.mrf.mxu0 }
 0x15d   :  { %v407_v43 = vadd.f32 %v401_v27, %v324_v16  ;;  %v468_v50 = vadd.f32 %v461_v39, %v406_v36 }
 0x15e   :  { %v540_v21 = vpop.f32.mrf.mxu1  ;;  %v463_v35 = vpop.f32.mrf.mxu0 }
 0x15f   :  { %v549_v49 = vadd.f32 %v540_v21, %v466_v17  ;;  %v469_v22 = vadd.f32 %v463_v35, %v407_v43  ;;  %v1411_v21 = vld [vmem:[%s4336_s4] sm:$0x7] }
 0x160   :  { %v542_v40 = vpop.f32.mrf.mxu1  ;;  %v627_v42 = vpop.f32.mrf.mxu0 }
 0x161   :  { %v550_v53 = vadd.f32 %v542_v40, %v467_v37  ;;  %v636_v23 = vadd.f32 %v627_v42, %v549_v49 }
 0x162   :  { %v544_v51 = vpop.f32.mrf.mxu1  ;;  %v629_v52 = vpop.f32.mrf.mxu0 }
 0x163   :  { %v551_v34 = vadd.f32 %v544_v51, %v468_v50  ;;  %v637_v44 = vadd.f32 %v629_v52, %v550_v53  ;;  %v2793_v52 = vld [vmem:[%s4337_s3 + $0x4] sm:$0x7] }
 0x164   :  { %v546_v33 = vpop.f32.mrf.mxu1  ;;  %v631_v47 = vpop.f32.mrf.mxu0 }
 0x165   :  { %v552_v54 = vadd.f32 %v546_v33, %v469_v22  ;;  %v638_v56 = vadd.f32 %v631_v47, %v551_v34 }
 0x166   :  { %v710_v30 = vpop.f32.mrf.mxu1  ;;  %v633_v45 = vpop.f32.mrf.mxu0 }
 0x167   :  { %v719_v55 = vadd.f32 %v710_v30, %v636_v23  ;;  %v639_v60 = vadd.f32 %v633_v45, %v552_v54  ;;  %v4383_v54 = vmov 0 }
 0x168   :  { %v712_v57 = vpop.f32.mrf.mxu1  ;;  %v795_v58 = vpop.f32.mrf.mxu0  ;;  %v4384_v54 = vsel %vm3739_vm10, 4294967295, %v4383_v54 }
 0x169   :  { %v720_v59 = vadd.f32 %v712_v57, %v637_v44  ;;  %v804_v62 = vadd.f32 %v795_v58, %v719_v55 }
 0x16a   :  { %v714_v0 = vpop.f32.mrf.mxu1  ;;  %v797_v24 = vpop.f32.mrf.mxu0 }
 0x16b   :  { %v721_v25 = vadd.f32 %v714_v0, %v638_v56  ;;  %v805_v38 = vadd.f32 %v797_v24, %v720_v59  ;;  %v820_v32 = vadd.f32 %v813_v63, %v804_v62  ;;  %v866_v56 = vpack.c.bf16 %v2793_v52, %v2793_v52 }
 0x16c   :  { %v716_v1 = vpop.f32.mrf.mxu1  ;;  %v799_v18 = vpop.f32.mrf.mxu0  ;;  %v4385_v62 = vmov 0 }
 0x16d   :  { %v722_v19 = vadd.f32 %v716_v1, %v639_v60  ;;  %v806_v2 = vadd.f32 %v799_v18, %v721_v25  ;;  %v821_v4 = vadd.f32 %v813_v63, %v805_v38  ;;  %v824_v8 = vmax.f32 %v820_v32, 0.0  ;;  %v844_v63 = vld [vmem:[%s4337_s3] sm:$0x7] }
 0x16e   :  { %v801_v3 = vpop.f32.mrf.mxu0  ;;  %v4386_v62 = vsel %vm3754_vm2, 4294967295, %v4385_v62  ;;  %v845_v32 = vpack.c.bf16 %v844_v63, %v844_v63 }
 0x16f   :  { %v822_v5 = vadd.f32 %v818_v48, %v806_v2  ;;  %v807_v7 = vadd.f32 %v801_v3, %v722_v19  ;;  %v825_v26 = vmax.f32 %v821_v4, 0.0 }
 0x171   :  { %v826_v9 = vmax.f32 %v822_v5, 0.0  ;;  %v823_v10 = vadd.f32 %v818_v48, %v807_v7  ;;  %v4387_v7 = vmov 0 }
 0x172   :  { %v4388_v7 = vsel %vm3780_vm15, 4294967295, %v4387_v7 }
 0x173   :  { %v827_v27 = vmax.f32 %v823_v10, 0.0  ;;  %v3047_v39 = vpack.i.bf16 %v826_v9, %v824_v8  ;;  %v3706_v17 = vpack.c.bf16 %v826_v9, %v824_v8  ;;  %v2805_v8 = vld [vmem:[%s4337_s3 + $0x8] sm:$0x7] }
 0x175   :  { %3048 = vrot.lane.b32.xlu1 %v3047_v39, %s3252_s26  ;;  %v3062_v14 = vpack.i.bf16 %v827_v27, %v825_v26  ;;  %v3704_v16 = vpack.c.bf16 %v827_v27, %v825_v26 }
 0x177   :  { %3063 = vrot.lane.b32.xlu0 %v3062_v14, %s3252_s26 }
 0x179   :  { %3053 = vrot.lane.b32.xlu1 %v3047_v39, %s3251_s25 }
 0x17b   :  { %3068 = vrot.lane.b32.xlu0 %v3062_v14, %s3251_s25 }
 0x17d   :  { %3058 = vrot.lane.b32.xlu1 %v3047_v39, %s3253_s27 }
 0x17f   :  { %3073 = vrot.lane.b32.xlu0 %v3062_v14, %s3253_s27 }
 0x181   :  { %3078 = vrot.lane.b32.xlu1 %v3047_v39, %s3255_s0 }
 0x183   :  { %3083 = vrot.lane.b32.xlu0 %v3062_v14, %s3255_s0 }
 0x185   :  { %3088 = vrot.lane.b32.xlu1 %v3047_v39, %s3256_s28 }
 0x187   :  { %3108 = vrot.lane.b32.xlu0 %v3062_v14, %s3256_s28 }
 0x189   :  { %3093 = vrot.lane.b32.xlu1 %v3047_v39, %s3257_s29 }
 0x18b   :  { %3113 = vrot.lane.b32.xlu0 %v3062_v14, %s3257_s29 }
 0x18d   :  { %3098 = vrot.lane.b32.xlu1 %v3047_v39, %s3258_s30 }
 0x18f   :  { %3118 = vrot.lane.b32.xlu0 %v3062_v14, %s3258_s30 }
 0x191   :  { %3103 = vrot.lane.b32.xlu1 %v3047_v39, %s3259_s12 }
 0x193   :  { %3123 = vrot.lane.b32.xlu0 %v3062_v14, %s3259_s12 }
 0x195   :  { %1414 = vperm.xlu1 %3046, %v1411_v21  }
 0x1e7   :  { %v3049_v35 = vpop.permute.xlu1 %3048 }
 0x1e8   :  { %v3051_v37 = vunpack.i.h.bf16 %v3049_v35  ;;  %v3050_v40 = vunpack.i.l.bf16 %v3049_v35 }
 0x1e9   :  { %v3064_v36 = vpop.permute.xlu0 %3063 }
 0x1ea   :  { %v3066_v42 = vunpack.i.h.bf16 %v3064_v36  ;;  %v3065_v43 = vunpack.i.l.bf16 %v3064_v36  ;;  %v976_v36 = vpack.c.bf16 %v2805_v8, %v2805_v8 }
 0x1eb   :  { %v3054_v49 = vpop.permute.xlu1 %3053 }
 0x1ec   :  { %v859_v50 = vsel %vm4349_vm6, %v3066_v42, %v3051_v37  ;;  %v858_v51 = vsel %vm4349_vm6, %v3065_v43, %v3050_v40  ;;  %v3056_v22 = vunpack.i.h.bf16 %v3054_v49  ;;  %v856_v33 = vsel %vm4349_vm6, %v3050_v40, %v3065_v43 }
 0x1ed   :  { %v2795_v53 = vpack.c.bf16 %v859_v50, %v858_v51  ;;  %v3069_v23 = vpop.permute.xlu0 %3068  ;;  %v857_v47 = vsel %vm4349_vm6, %v3051_v37, %v3066_v42  ;;  %v3055_v34 = vunpack.i.l.bf16 %v3054_v49  ;;  %vm4357_vm6 = vcmask 130048   ;;  %v2813_v49 = vld [vmem:[%s4337_s3 + $0xc] sm:$0x7] }
 0x1ee   :  { %v3071_v44 = vunpack.i.h.bf16 %v3069_v23  ;;  %v3070_v30 = vunpack.i.l.bf16 %v3069_v23  ;;  %v868_v45 = vpack.c.bf16 %v857_v47, %v856_v33 }
 0x1ef   :  { %v3059_v55 = vpop.permute.xlu1 %3058 }
 0x1f0   :  { %v837_v57 = vsel %vm4350_vm7, %v3056_v22, %v3071_v44  ;;  %v839_v58 = vsel %vm4350_vm7, %v3071_v44, %v3056_v22  ;;  %v836_v59 = vsel %vm4350_vm7, %v3055_v34, %v3070_v30  ;;  %v838_v60 = vsel %vm4350_vm7, %v3070_v30, %v3055_v34  ;;  %887 = vmatprep.subr.bf16.mxu1 %v868_v45  ;;  %vm4353_vm7 = vmpackc.low %vm3514_vm14, %vm3514_vm14 }
 0x1f1   :  { %v2799_v0 = vpack.c.bf16 %v837_v57, %v836_v59  ;;  %v2802_v24 = vpack.c.bf16 %v839_v58, %v838_v60  ;;  %2796 = vmatpush1.bf16.msk.msra.mxu1 %vm3739_vm10, %v2795_v53  ;;  %v3074_v25 = vpop.permute.xlu0 %3073  ;;  %v3061_v38 = vunpack.i.h.bf16 %v3059_v55  ;;  %v3060_v48 = vunpack.i.l.bf16 %v3059_v55 }
 0x1f2   :  { %v3076_v1 = vunpack.i.h.bf16 %v3074_v25  ;;  %v3075_v18 = vunpack.i.l.bf16 %v3074_v25  ;;  %v1043_v44 = vpack.c.bf16 %v2813_v49, %v2813_v49  ;;  %vm4395_vm10 = vcmask 130048  }
 0x1f3   :  { %v3079_v19 = vpop.permute.xlu1 %3078  ;;  %2800 = vmatprep.subr.msk.bf16.mxu0 %vm3754_vm2, %v2799_v0 }
 0x1f4   :  { %v967_v2 = vsel %vm4352_vm3, %v3061_v38, %v3076_v1  ;;  %v969_v3 = vsel %vm4352_vm3, %v3076_v1, %v3061_v38  ;;  %v966_v4 = vsel %vm4352_vm3, %v3060_v48, %v3075_v18  ;;  %v968_v5 = vsel %vm4352_vm3, %v3075_v18, %v3060_v48  ;;  %2797 = vmatmul.mubr.msk.bf16.vlgmr.msra.gmra.mxu1 %vm4357_vm6, %v866_v56  ;;  %vm4354_vm3 = vmpackc.low %vm3485_vm12, %vm3485_vm12  ;;  %v2821_v56 = vld [vmem:[%s4337_s3 + $0x10] sm:$0x7] }
 0x1f5   :  { %v2807_v9 = vpack.c.bf16 %v967_v2, %v966_v4  ;;  %v2810_v10 = vpack.c.bf16 %v969_v3, %v968_v5  ;;  %2803 = vmatpush1.bf16.msk.msra.mxu0 %vm4353_vm7, %v2802_v24  ;;  %v3084_v26 = vpop.permute.xlu0 %3083  ;;  %1014 = vmatprep.mubr.bf16.mxu1 %v3254_v6  ;;  %v3081_v27 = vunpack.i.h.bf16 %v3079_v19  ;;  %v3080_v39 = vunpack.i.l.bf16 %v3079_v19  ;;  %vm3820_vm7 = vmpackc.low %vm3433_vm5, %vm3433_vm5 }
 0x1f6   :  { %v3086_v14 = vunpack.i.h.bf16 %v3084_v26  ;;  %v3085_v21 = vunpack.i.l.bf16 %v3084_v26  ;;  %v1094_v48 = vpack.c.bf16 %v2821_v56, %v2821_v56 }
 0x1f7   :  { %v3089_v35 = vpop.permute.xlu1 %3088  ;;  %2808 = vmatprep.subr.msk.bf16.mxu1 %vm3780_vm15, %v2807_v9 }
 0x1f8   :  { %v1034_v37 = vsel %vm4355_vm9, %v3081_v27, %v3086_v14  ;;  %v1036_v40 = vsel %vm4355_vm9, %v3086_v14, %v3081_v27  ;;  %v1033_v42 = vsel %vm4355_vm9, %v3080_v39, %v3085_v21  ;;  %v1035_v43 = vsel %vm4355_vm9, %v3085_v21, %v3080_v39  ;;  %2804 = vmatmul.mubr.msk.bf16.vlgmr.msra.gmra.mxu0 %vm4357_vm6, %v845_v32  ;;  %v2823_v32 = vld [vmem:[%s4337_s3 + $0x14] sm:$0x7] }
 0x1f9   :  { %v2815_v50 = vpack.c.bf16 %v1034_v37, %v1033_v42  ;;  %v2818_v51 = vpack.c.bf16 %v1036_v40, %v1035_v43  ;;  %2811 = vmatpush1.bf16.msk.msra.mxu1 %vm4354_vm3, %v2810_v10  ;;  %v3109_v52 = vpop.permute.xlu0 %3108  ;;  %1081 = vmatprep.mubr.bf16.mxu0 %v3254_v6  ;;  %v3091_v53 = vunpack.i.h.bf16 %v3089_v35  ;;  %v3090_v22 = vunpack.i.l.bf16 %v3089_v35  ;;  %v2831_v37 = vld [vmem:[%s4337_s3 + $0x18] sm:$0x7] }
 0x1fa   :  { %v3111_v23 = vunpack.i.h.bf16 %v3109_v52  ;;  %v3110_v33 = vunpack.i.l.bf16 %v3109_v52  ;;  %1114 = vmatprep.subr.bf16.mxu1 %v3704_v16  ;;  %vm4391_vm3 = vcmp.lt.s32.totalorder %v3377_v12, 127  ;;  %v1161_v27 = vpack.c.bf16 %v2823_v32, %v2823_v32 }
 0x1fb   :  { %v3094_v34 = vpop.permute.xlu1 %3093  ;;  %2816 = vmatprep.subr.msk.bf16.mxu0 %vm3754_vm2, %v2815_v50  ;;  %vm4392_vm9 = vmmov %vm4391_vm3  ;;  %vm4402_vm2 = vcmask 130048  }
 0x1fc   :  { %v1152_v30 = vsel %vm4391_vm3, %v3091_v53, %v3111_v23  ;;  %v1154_v45 = vsel %vm4392_vm9, %v3111_v23, %v3091_v53  ;;  %vm4393_vm1 = vmmov %vm4391_vm3  ;;  %2812 = vmatmul.mubr.msk.bf16.vlgmr.msra.gmra.mxu1 %vm4395_vm10, %v976_v36  ;;  %2819 = vmatpush1.bf16.msk.msra.mxu0 %vm3820_vm7, %v2818_v51  ;;  %v3096_v60 = vunpack.i.h.bf16 %v3094_v34  ;;  %v3095_v63 = vunpack.i.l.bf16 %v3094_v34  ;;  %v2929_v36 = vld [vmem:[%s4341_s7 + $0x70] sm:$0xff] }
 0x1fd   :  { %v1151_v16 = vsel %vm4393_vm1, %v3090_v22, %v3110_v33  ;;  %vm4394_vm6 = vmmov %vm4393_vm1  ;;  %1115 = vmatpush1.bf16.msra.mxu1 %v3706_v17  ;;  %v3114_v59 = vpop.permute.xlu0 %3113  ;;  %1132 = vmatprep.mubr.bf16.mxu1 %v3254_v6  ;;  %v1228_v53 = vpack.c.bf16 %v2831_v37, %v2831_v37 }
 0x1fe   :  { %v1153_v55 = vsel %vm4394_vm6, %v3110_v33, %v3090_v22  ;;  %v2828_v58 = vpack.c.bf16 %v1152_v30, %v1151_v16  ;;  %v3116_v0 = vunpack.i.h.bf16 %v3114_v59  ;;  %v3115_v24 = vunpack.i.l.bf16 %v3114_v59  ;;  %vm3844_vm3 = vmpackc.low %vm3429_vm4, %vm3429_vm4 }
 0x1ff   :  { %v2825_v57 = vpack.c.bf16 %v1154_v45, %v1153_v55  ;;  %v3099_v38 = vpop.permute.xlu1 %3098  ;;  %vm4398_vm6 = vcmp.lt.s32.totalorder %v3377_v12, 113  ;;  %vm2832_vm4 = vmpackc.low %vm3600_vm13, %vm3600_vm13  ;;  %v2839_v45 = vld [vmem:[%s4337_s3 + $0x1c] sm:$0x7]  ;;  %v2844_v55 = vld [vmem:[%s4337_s3 + $0x20] sm:$0x7] }
 0x200   :  { %v1219_v17 = vsel %vm4398_vm6, %v3096_v60, %v3116_v0  ;;  %vm4399_vm9 = vmmov %vm4398_vm6  ;;  %2820 = vmatmul.mubr.msk.bf16.vlgmr.msra.gmra.mxu0 %vm4402_vm2, %v1043_v44  ;;  %v3101_v5 = vunpack.i.h.bf16 %v3099_v38  ;;  %v3100_v8 = vunpack.i.l.bf16 %v3099_v38  ;;  %vm4403_vm2 = vcmp.lt.s32.totalorder %v3377_v12, 112 }
 0x201   :  { %2826 = vmatprep.subr.msk.bf16.mxu0 %vm3780_vm15, %v2825_v57  ;;  %v1221_v1 = vsel %vm4399_vm9, %v3116_v0, %v3096_v60  ;;  %vm4400_vm1 = vmmov %vm4398_vm6  ;;  %v3119_v4 = vpop.permute.xlu0 %3118  ;;  %1199 = vmatprep.mubr.bf16.mxu0 %v3254_v6  ;;  %vm4408_vm15 = vcmp.lt.s32.totalorder %v3380_v13, 240  ;;  %v1295_v16 = vpack.c.bf16 %v2839_v45, %v2839_v45  ;;  %v1362_v56 = vpack.c.bf16 %v2844_v55, %v2844_v55 }
 0x202   :  { %v1218_v18 = vsel %vm4400_vm1, %v3095_v63, %v3115_v24  ;;  %vm4401_vm10 = vmmov %vm4400_vm1  ;;  %2829 = vmatpush1.bf16.msk.msra.mxu0 %vm3844_vm3, %v2828_v58  ;;  %v3121_v9 = vunpack.i.h.bf16 %v3119_v4  ;;  %v3120_v10 = vunpack.i.l.bf16 %v3119_v4 }
 0x203   :  { %v1220_v19 = vsel %vm4401_vm10, %v3115_v24, %v3095_v63  ;;  %v2836_v3 = vpack.c.bf16 %v1219_v17, %v1218_v18  ;;  %v3104_v26 = vpop.permute.xlu1 %3103  ;;  %vm4404_vm6 = vmmov %vm4403_vm2  ;;  %vm4407_vm10 = vcmask 130048  }
 0x204   :  { %v2833_v2 = vpack.c.bf16 %v1221_v1, %v1220_v19  ;;  %v1286_v39 = vsel %vm4403_vm2, %v3101_v5, %v3121_v9  ;;  %v1288_v14 = vsel %vm4404_vm6, %v3121_v9, %v3101_v5  ;;  %vm4405_vm9 = vmmov %vm4403_vm2  ;;  %2822 = vmatmul.mubr.msk.bf16.vlgmr.msra.gmra.mxu1 %vm4407_vm10, %v1094_v48  ;;  %v3106_v49 = vunpack.i.h.bf16 %v3104_v26 }
 0x205   :  { %v1285_v21 = vsel %vm4405_vm9, %v3100_v8, %v3120_v10  ;;  %vm4406_vm1 = vmmov %vm4403_vm2  ;;  %v3124_v43 = vpop.permute.xlu0 %3123  ;;  %1266 = vmatprep.mubr.bf16.mxu1 %v3254_v6  ;;  %v3105_v50 = vunpack.i.l.bf16 %v3104_v26 }
 0x206   :  { %2834 = vmatprep.subr.msk.bf16.mxu1 %vm2832_vm4, %v2833_v2  ;;  %v1287_v35 = vsel %vm4406_vm1, %v3120_v10, %v3100_v8  ;;  %vm3886_vm13 = vmpackc.low %vm4408_vm15, %vm4408_vm15  ;;  %v1296_v40 = vpack.c.bf16 %v1286_v39, %v1285_v21  ;;  %v3126_v51 = vunpack.i.h.bf16 %v3124_v43  ;;  %v3125_v52 = vunpack.i.l.bf16 %v3124_v43 }
 0x207   :  { %v2841_v42 = vpack.c.bf16 %v1288_v14, %v1287_v35  ;;  %2837 = vmatpush1.bf16.msk.msra.mxu1 %vm3820_vm7, %v2836_v3  ;;  %vm4411_vm15 = vcmp.lt.s32.totalorder %v3377_v12, 111  ;;  %vm4415_vm1 = vmmov %vm4407_vm10 }
 0x208   :  { %v1353_v22 = vsel %vm4411_vm15, %v3106_v49, %v3126_v51  ;;  %vm4412_vm2 = vmmov %vm4411_vm15  ;;  %2830 = vmatmul.mubr.msk.bf16.vlgmr.msra.gmra.mxu0 %vm4415_vm1, %v1161_v27 }
 0x209   :  { %2842 = vmatprep.subr.msk.bf16.mxu0 %vm3886_vm13, %v2841_v42  ;;  %v1355_v23 = vsel %vm4412_vm2, %v3126_v51, %v3106_v49  ;;  %vm4413_vm6 = vmmov %vm4412_vm2  ;;  %1333 = vmatprep.mubr.bf16.mxu0 %v3254_v6 }
 0x20a   :  { %v1352_v33 = vsel %vm4413_vm6, %v3105_v50, %v3125_v52  ;;  %vm4414_vm9 = vmmov %vm4412_vm2  ;;  %1316 = vmatpush1.bf16.msra.mxu0 %v1296_v40 }
 0x20b   :  { %v1354_v34 = vsel %vm4414_vm9, %v3125_v52, %v3105_v50  ;;  %vm2845_vm10 = vmpackc.low %vm3642_vm0, %vm3642_vm0  ;;  %v2849_v30 = vpack.c.bf16 %v1353_v22, %v1352_v33  ;;  %vm1452_vm9 = vcmask 1040384  }
 0x20c   :  { %v2846_v44 = vpack.c.bf16 %v1355_v23, %v1354_v34  ;;  %vm4416_vm15 = vmmov %vm4415_vm1 }
 0x20d   :  { %2838 = vmatmul.mubr.msk.bf16.vlgmr.msra.gmra.mxu1 %vm4416_vm15, %v1228_v53  ;;  %vm4417_vm2 = vmmov %vm4415_vm1  ;;  %vm4419_vm15 = vcmp.lt.s32.totalorder %v3377_v12, 17 }
 0x20e   :  { %2847 = vmatprep.subr.msk.bf16.mxu1 %vm2845_vm10, %v2846_v44  ;;  %1400 = vmatprep.mubr.bf16.mxu1 %v3254_v6  ;;  %vm4418_vm6 = vmmov %vm4415_vm1  ;;  %vm1453_vm1 = vcmask 1041408  }
 0x20f   :  { %2850 = vmatpush1.bf16.msk.msra.mxu1 %vm3844_vm3, %v2849_v30 }
 0x210   :  { %2843 = vmatmul.mubr.msk.bf16.vlgmr.msra.gmra.mxu0 %vm4417_vm2, %v1295_v16  ;;  %vm4420_vm2 = vmmov %vm4419_vm15 }
 0x211   :  { %1494 = vmatprep.mubr.bf16.mxu0 %v3254_v6 }
 0x215   :  { %2851 = vmatmul.mubr.msk.bf16.vlgmr.msra.gmra.mxu1 %vm4418_vm6, %v1362_v56  ;;  %v1415_v56 = vpop.permute.xlu1 %1414  ;;  %vm4421_vm6 = vcmp.lt.s32.totalorder %v3377_v12, 16 }
 0x216   :  { %1546 = vmatprep.mubr.bf16.mxu1 %v3254_v6 }
 0x2b4   :  { %v907_v57 = vpop.f32.mrf.mxu1 }
 0x2b6   :  { %v909_v58 = vpop.f32.mrf.mxu1 }
 0x2b8   :  { %v911_v59 = vpop.f32.mrf.mxu1  ;;  %v951_v60 = vpop.f32.mrf.mxu0 }
 0x2b9   :  { %v952_v8 = vadd.f32 %v951_v60, %v907_v57 }
 0x2ba   :  { %v912_v63 = vpop.f32.mrf.mxu1  ;;  %v953_v0 = vpop.f32.mrf.mxu0 }
 0x2bb   :  { %v954_v26 = vadd.f32 %v953_v0, %v909_v58 }
 0x2bc   :  { %v955_v24 = vpop.f32.mrf.mxu0  ;;  %v1016_v38 = vpop.f32.mrf.mxu1 }
 0x2bd   :  { %v1023_v27 = vadd.f32 %v1016_v38, %v952_v8  ;;  %v2039_v8 = vld [vmem:[%s4338_s6] sm:$0xff] }
 0x2be   :  { %v956_v48 = vpop.f32.mrf.mxu0  ;;  %v1018_v17 = vpop.f32.mrf.mxu1 }
 0x2bf   :  { %v1024_v21 = vadd.f32 %v1018_v17, %v954_v26  ;;  %v1454_v17 = vsel %vm1452_vm9, 4294967295, %v3260_v15  ;;  %v2040_v15 = vld [vmem:[%s4338_s6 + $0x8] sm:$0xff]  ;;  %vm4422_vm9 = vmmov %vm4421_vm6 }
 0x2c0   :  { %v1020_v1 = vpop.f32.mrf.mxu1  ;;  %v1083_v18 = vpop.f32.mrf.mxu0 }
 0x2c1   :  { %v1090_v35 = vadd.f32 %v1083_v18, %v1023_v27 }
 0x2c2   :  { %v1021_v19 = vpop.f32.mrf.mxu1  ;;  %v1085_v32 = vpop.f32.mrf.mxu0 }
 0x2c3   :  { %v1091_v42 = vadd.f32 %v1085_v32, %v1024_v21  ;;  %v3931_v32 = vsel %vm1453_vm1, %v1454_v17, 0  ;;  %vm4423_vm1 = vcmp.ge.s32.totalorder %v3377_v12, 16 }
 0x2c4   :  { %v1087_v2 = vpop.f32.mrf.mxu0  ;;  %v1134_v3 = vpop.f32.mrf.mxu1 }
 0x2c5   :  { %v1141_v43 = vadd.f32 %v1134_v3, %v1090_v35 }
 0x2c6   :  { %v1088_v4 = vpop.f32.mrf.mxu0  ;;  %v1136_v5 = vpop.f32.mrf.mxu1 }
 0x2c7   :  { %v1142_v51 = vadd.f32 %v1136_v5, %v1091_v42 }
 0x2c8   :  { %v1138_v9 = vpop.f32.mrf.mxu1  ;;  %v1201_v10 = vpop.f32.mrf.mxu0 }
 0x2c9   :  { %v1208_v52 = vadd.f32 %v1201_v10, %v1141_v43 }
 0x2ca   :  { %v1139_v39 = vpop.f32.mrf.mxu1  ;;  %v1203_v14 = vpop.f32.mrf.mxu0 }
 0x2cb   :  { %v1209_v23 = vadd.f32 %v1203_v14, %v1142_v51 }
 0x2cc   :  { %v1205_v37 = vpop.f32.mrf.mxu0 }
 0x2cd   :  { %v1268_v40 = vpop.f32.mrf.mxu1 }
 0x2ce   :  { %v1206_v49 = vpop.f32.mrf.mxu0  ;;  %v1275_v33 = vadd.f32 %v1268_v40, %v1208_v52 }
 0x2cf   :  { %v1270_v50 = vpop.f32.mrf.mxu1 }
 0x2d0   :  { %v1335_v22 = vpop.f32.mrf.mxu0  ;;  %v1276_v30 = vadd.f32 %v1270_v50, %v1209_v23 }
 0x2d1   :  { %v1272_v53 = vpop.f32.mrf.mxu1  ;;  %v1342_v45 = vadd.f32 %v1335_v22, %v1275_v33  ;;  %v2853_v22 = vld [vmem:[%s4339_s5 + $0x18] sm:$0xff] }
 0x2d2   :  { %v1337_v44 = vpop.f32.mrf.mxu0  ;;  %v2852_v53 = vld [vmem:[%s4339_s5 + $0x10] sm:$0xff] }
 0x2d3   :  { %v1273_v34 = vpop.f32.mrf.mxu1  ;;  %v1343_v57 = vadd.f32 %v1337_v44, %v1276_v30 }
 0x2d4   :  { %v1339_v16 = vpop.f32.mrf.mxu0 }
 0x2d5   :  { %v1402_v55 = vpop.f32.mrf.mxu1 }
 0x2d6   :  { %v1409_v58 = vadd.f32 %v1402_v55, %v1342_v45  ;;  %v1340_v59 = vpop.f32.mrf.mxu0 }
 0x2d7   :  { %v1404_v60 = vpop.f32.mrf.mxu1 }
 0x2d8   :  { %v1417_v63 = vadd.f32 %v1415_v56, %v1409_v58  ;;  %v1410_v0 = vadd.f32 %v1404_v60, %v1343_v57  ;;  %v1430_v57 = vld [vmem:[%s4339_s5 + $0x8] sm:$0xff] }
 0x2d9   :  { %v1406_v24 = vpop.f32.mrf.mxu1 }
 0x2da   :  { %3247 = vtanh.f32 %v1417_v63  ;;  %v1418_v38 = vadd.f32 %v1415_v56, %v1410_v0  ;;  %v1429_v56 = vld [vmem:[%s4339_s5] sm:$0xff]  ;;  %v1445_v63 = vpack.c.bf16 %v2853_v22, %v2852_v53 }
 0x2db   :  { %v1407_v48 = vpop.f32.mrf.mxu1 }
 0x2dc   :  { %3249 = vtanh.f32 %v1418_v38 }
 0x2e7   :  { %v3248_v1 = vpop.eup %3247 }
 0x2e8   :  { %v1701_v18 = vpack.c.bf16 %v3248_v1, %v3248_v1 }
 0x2e9   :  { %v3250_v19 = vpop.eup %3249 }
 0x2ea   :  { %v3132_v2 = vpack.i.bf16 %v3250_v19, %v3248_v1  ;;  %v1702_v3 = vpack.c.bf16 %v3250_v19, %v3250_v19  ;;  %v3936_v4 = vand.u32 %v1701_v18, %v3931_v32 }
 0x2ec   :  { %3133 = vrot.lane.b32.xlu1 %v3132_v2, %s3251_s25  ;;  %3128 = vrot.lane.b32.xlu0 %v3132_v2, %s3252_s26  ;;  %v3939_v5 = vand.u32 %v1702_v3, %v3931_v32 }
 0x2f0   :  { %3143 = vrot.lane.b32.xlu1 %v3132_v2, %s3255_s0  ;;  %3138 = vrot.lane.b32.xlu0 %v3132_v2, %s3253_s27 }
 0x2f4   :  { %3153 = vrot.lane.b32.xlu1 %v3132_v2, %s3257_s29  ;;  %3148 = vrot.lane.b32.xlu0 %v3132_v2, %s3256_s28 }
 0x2f8   :  { %3163 = vrot.lane.b32.xlu1 %v3132_v2, %s3259_s12  ;;  %3158 = vrot.lane.b32.xlu0 %v3132_v2, %s3258_s30  ;;  %v1431_v2 = vpack.c.bf16 %v1430_v57, %v1429_v56 }
 0x2fc   :  { %2048 = vperm.xlu1 %3046, %v2040_v15   ;;  %2043 = vperm.xlu0 %3045, %v2039_v8  }
 0x35e   :  { %v3134_v9 = vpop.permute.xlu1 %3133  ;;  %v3129_v10 = vpop.permute.xlu0 %3128 }
 0x35f   :  { %v3136_v26 = vunpack.i.h.bf16 %v3134_v9  ;;  %v3135_v27 = vunpack.i.l.bf16 %v3134_v9  ;;  %v3131_v39 = vunpack.i.h.bf16 %v3129_v10  ;;  %v3130_v14 = vunpack.i.l.bf16 %v3129_v10 }
 0x361   :  { %v1425_v21 = vsel %vm4419_vm15, %v3135_v27, %v3136_v26  ;;  %v1426_v35 = vsel %vm4420_vm2, %v3136_v26, %v3135_v27  ;;  %v1439_v37 = vsel %vm4421_vm6, %v3131_v39, %v3130_v14  ;;  %v1438_v40 = vsel %vm4422_vm9, %v3130_v14, %v3131_v39 }
 0x362   :  { %v1427_v42 = vsel %vm3514_vm14, %v1426_v35, 0.0  ;;  %v1440_v43 = vsel %vm4423_vm1, %v1439_v37, 0.0  ;;  %v3144_v49 = vpop.permute.xlu1 %3143  ;;  %v3139_v50 = vpop.permute.xlu0 %3138  ;;  %v1447_v51 = vpack.c.bf16 %v1438_v40, %v1438_v40  ;;  %v1428_v52 = vsel %vm3442_vm8, %v1425_v21, 0.0 }
 0x363   :  { %v1432_v23 = vpack.c.bf16 %v1427_v42, %v1427_v42  ;;  %v1446_v33 = vpack.c.bf16 %v1440_v43, %v1440_v43  ;;  %v3146_v34 = vunpack.i.h.bf16 %v3144_v49  ;;  %v3145_v44 = vunpack.i.l.bf16 %v3144_v49 }
 0x364   :  { %v3141_v30 = vunpack.i.h.bf16 %v3139_v50  ;;  %v3140_v45 = vunpack.i.l.bf16 %v3139_v50  ;;  %v1460_v16 = vand.u32 %v3931_v32, %v1447_v51  ;;  %v1433_v55 = vpack.c.bf16 %v1428_v52, %v1428_v52  ;;  %v2857_v50 = vld [vmem:[%s4339_s5 + $0x28] sm:$0xff] }
 0x365   :  { %vm4424_vm15 = vcmp.lt.s32.totalorder %v3377_v12, 1  ;;  %v1457_v59 = vand.u32 %v3931_v32, %v1446_v33  ;;  %v1509_v60 = vand.u32 %v3931_v32, %v1432_v23  ;;  %vm4426_vm6 = vcmp.lt.s32.totalorder %v3377_v12, 15  ;;  %v2859_v23 = vld [vmem:[%s4339_s5 + $0x30] sm:$0xff]  ;;  %v2860_v33 = vld [vmem:[%s4339_s5 + $0x38] sm:$0xff] }
 0x366   :  { %v1632_v58 = vsel %vm4424_vm15, %v3146_v34, %v3145_v44  ;;  %vm4425_vm2 = vmmov %vm4424_vm15  ;;  %v1561_v24 = vsel %vm4426_vm6, %v3140_v45, %v3141_v30  ;;  %v3154_v48 = vpop.permute.xlu1 %3153  ;;  %v3149_v17 = vpop.permute.xlu0 %3148  ;;  %1476 = vmatprep.subr.bf16.mxu0 %v1460_v16  ;;  %v1512_v1 = vand.u32 %v3931_v32, %v1433_v55  ;;  %vm1448_vm1 = vcmask 23552  }
 0x367   :  { %v1631_v0 = vsel %vm4425_vm2, %v3145_v44, %v3146_v34  ;;  %vm4427_vm9 = vmmov %vm4426_vm6  ;;  %v1633_v18 = vsel %vm3433_vm5, %v1632_v58, 0.0  ;;  %1477 = vmatpush1.bf16.msra.mxu0 %v1457_v59  ;;  %v3156_v3 = vunpack.i.h.bf16 %v3154_v48  ;;  %v3151_v15 = vunpack.i.h.bf16 %v3149_v17 }
 0x368   :  { %v1562_v38 = vsel %vm4427_vm9, %v3141_v30, %v3140_v45  ;;  %v3150_v8 = vunpack.i.l.bf16 %v3149_v17  ;;  %1528 = vmatprep.subr.bf16.mxu1 %v1512_v1  ;;  %v1564_v9 = vsel %vm3457_vm11, %v1561_v24, 0.0  ;;  %v3155_v26 = vunpack.i.l.bf16 %v3154_v48 }
 0x369   :  { %v1563_v19 = vsel %vm3485_vm12, %v1562_v38, 0.0  ;;  %1529 = vmatpush1.bf16.msra.mxu1 %v1509_v60  ;;  %v1570_v27 = vpack.c.bf16 %v1564_v9, %v1564_v9  ;;  %v1634_v39 = vsel %vm3442_vm8, %v1631_v0, 0.0  ;;  %v1639_v14 = vpack.c.bf16 %v1633_v18, %v1633_v18 }
 0x36a   :  { %v1569_v10 = vpack.c.bf16 %v1563_v19, %v1563_v19  ;;  %vm4428_vm15 = vcmp.lt.s32.totalorder %v3377_v12, 127  ;;  %v4001_v35 = vpop.permute.xlu1 %3163  ;;  %v3159_v37 = vpop.permute.xlu0 %3158  ;;  %2854 = vmatmul.mubr.msk.bf16.vlgmr.msra.gmra.mxu0 %vm1448_vm1, %v1445_v63  ;;  %v1640_v40 = vpack.c.bf16 %v1634_v39, %v1634_v39  ;;  %vm4430_vm6 = vnez %v4368_v28 }
 0x36b   :  { %v1763_v21 = vsel %vm4428_vm15, %v3150_v8, %v3151_v15  ;;  %vm4429_vm2 = vmmov %vm4428_vm15  ;;  %v3166_v49 = vunpack.i.h.bf16 %v4001_v35  ;;  %1612 = vmatprep.mubr.bf16.mxu0 %v3254_v6  ;;  %v3165_v51 = vunpack.i.l.bf16 %v4001_v35  ;;  %v3161_v52 = vunpack.i.h.bf16 %v3159_v37 }
 0x36c   :  { %v1764_v42 = vsel %vm4429_vm2, %v3151_v15, %v3150_v8  ;;  %v1765_v43 = vsel %vm4430_vm6, %v1763_v21, 0.0  ;;  %v3160_v53 = vunpack.i.l.bf16 %v3159_v37  ;;  %2855 = vmatmul.mubr.msk.bf16.vlgmr.msra.gmra.mxu1 %vm1448_vm1, %v1431_v2  ;;  %v1578_v22 = vand.u32 %v1570_v27, %v3931_v32  ;;  %v2866_v15 = vld [vmem:[%s4339_s5 + $0x58] sm:$0xff]  ;;  %v2868_v37 = vld [vmem:[%s4339_s5 + $0x60] sm:$0xff] }
 0x36d   :  { %vm4431_vm8 = vcmp.lt.s32.totalorder %v3377_v12, 113  ;;  %v1648_v44 = vand.u32 %v1640_v40, %v3931_v32  ;;  %v1575_v30 = vand.u32 %v1569_v10, %v3931_v32  ;;  %1682 = vmatprep.mubr.bf16.mxu1 %v3254_v6  ;;  %vm4432_vm9 = vcmp.lt.s32.totalorder %v3377_v12, 112  ;;  %v2869_v40 = vld [vmem:[%s4339_s5 + $0x68] sm:$0xff] }
 0x36e   :  { %v1834_v34 = vsel %vm4431_vm8, %v3156_v3, %v3155_v26  ;;  %v1904_v45 = vsel %vm4432_vm9, %v3161_v52, %v3160_v53  ;;  %1594 = vmatprep.subr.bf16.mxu0 %v1578_v22  ;;  %v1645_v16 = vand.u32 %v1639_v14, %v3931_v32  ;;  %v1568_v55 = vpack.c.bf16 %v2857_v50, %v2856_v31  ;;  %vm4433_vm15 = vmmov %vm4431_vm8 }
 0x36f   :  { %v1833_v56 = vsel %vm4433_vm15, %v3155_v26, %v3156_v3  ;;  %v1771_v57 = vpack.c.bf16 %v1765_v43, %v1765_v43  ;;  %1664 = vmatprep.subr.bf16.mxu1 %v1648_v44  ;;  %1595 = vmatpush1.bf16.msra.mxu0 %v1575_v30  ;;  %v1766_v58 = vsel %vm3457_vm11, %v1764_v42, 0.0  ;;  %v1638_v59 = vpack.c.bf16 %v2860_v33, %v2859_v23  ;;  %v2865_v3 = vld [vmem:[%s4339_s5 + $0x50] sm:$0xff]  ;;  %v2872_v43 = vld [vmem:[%s4339_s5 + $0x78] sm:$0xff] }
 0x370   :  { %vm4434_vm2 = vcmp.lt.s32.totalorder %v3377_v12, 111  ;;  %1665 = vmatpush1.bf16.msra.mxu1 %v1645_v16  ;;  %1726 = vmatprep.subr.bf16.mxu0 %v3939_v5  ;;  %v1772_v63 = vpack.c.bf16 %v1766_v58, %v1766_v58  ;;  %vm4435_vm8 = vnez %v4380_v41  ;;  %vm4436_vm9 = vcmp.lt.s32.totalorder %v3380_v13, 240  ;;  %v2862_v13 = vld [vmem:[%s4339_s5 + $0x40] sm:$0xff]  ;;  %v2871_v42 = vld [vmem:[%s4339_s5 + $0x70] sm:$0xff] }
 0x371   :  { %v1974_v60 = vsel %vm4434_vm2, %v3166_v49, %v3165_v51  ;;  %v1836_v0 = vsel %vm4435_vm8, %v1834_v34, 0.0  ;;  %v1906_v24 = vsel %vm4436_vm9, %v1904_v45, 0.0  ;;  %v1835_v46 = vsel %vm3433_vm5, %v1833_v56, 0.0  ;;  %vm4438_vm11 = vmmov %vm4434_vm2  ;;  %v2920_v41 = vld [vmem:[%s4341_s7 + $0x60] sm:$0xff] }
 0x372   :  { %v1842_v38 = vpack.c.bf16 %v1836_v0, %v1836_v0  ;;  %v1912_v48 = vpack.c.bf16 %v1906_v24, %v1906_v24  ;;  %v1780_v17 = vand.u32 %v1772_v63, %v3931_v32  ;;  %2858 = vmatmul.mubr.msk.bf16.vlgmr.msra.gmra.mxu0 %vm1448_vm1, %v1568_v55  ;;  %v1777_v5 = vand.u32 %v1771_v57, %v3931_v32 }
 0x373   :  { %1727 = vmatpush1.bf16.msra.mxu0 %v3936_v4  ;;  %1744 = vmatprep.mubr.bf16.mxu0 %v3254_v6  ;;  %v1976_v19 = vsel %vm3642_vm0, %v1974_v60, 0.0  ;;  %vm4437_vm5 = vcmp.lt.s32.totalorder %v3377_v12, 112  ;;  %v1841_v2 = vpack.c.bf16 %v1835_v46, %v1835_v46  ;;  %v1700_v8 = vpack.c.bf16 %v2863_v29, %v2862_v13 }
 0x374   :  { %v1850_v1 = vand.u32 %v1842_v38, %v3931_v32  ;;  %v1920_v18 = vand.u32 %v1912_v48, %v3931_v32  ;;  %v1903_v4 = vsel %vm4437_vm5, %v3160_v53, %v3161_v52  ;;  %1796 = vmatprep.subr.bf16.mxu1 %v1780_v17  ;;  %2861 = vmatmul.mubr.msk.bf16.vlgmr.msra.gmra.mxu1 %vm1448_vm1, %v1638_v59  ;;  %v2875_v52 = vld [vmem:[%s4339_s5 + $0x88] sm:$0xff]  ;;  %vm4443_vm9 = vcmp.lt.s32.totalorder %v3377_v12, 17 }
 0x375   :  { %1797 = vmatpush1.bf16.msra.mxu1 %v1777_v5  ;;  %1814 = vmatprep.mubr.bf16.mxu1 %v3254_v6  ;;  %v1982_v9 = vpack.c.bf16 %v1976_v19, %v1976_v19  ;;  %v1973_v10 = vsel %vm4438_vm11, %v3165_v51, %v3166_v49  ;;  %v1911_v26 = vpack.c.bf16 %v1903_v4, %v1903_v4  ;;  %v2874_v51 = vld [vmem:[%s4339_s5 + $0x80] sm:$0xff]  ;;  %vm4444_vm5 = vmmov %vm4443_vm9 }
 0x376   :  { %1866 = vmatprep.subr.bf16.mxu0 %v1850_v1  ;;  %1936 = vmatprep.subr.bf16.mxu1 %v1920_v18  ;;  %v1770_v27 = vpack.c.bf16 %v2866_v15, %v2865_v3  ;;  %v1847_v39 = vand.u32 %v1841_v2, %v3931_v32  ;;  %v1975_v14 = vsel %vm4430_vm6, %v1973_v10, 0.0  ;;  %v1840_v49 = vpack.c.bf16 %v2869_v40, %v2868_v37  ;;  %vm4445_vm11 = vmmov %vm4444_vm5 }
 0x377   :  { %v1990_v21 = vand.u32 %v1982_v9, %v3931_v32  ;;  %v1917_v35 = vand.u32 %v1911_v26, %v3931_v32  ;;  %v1981_v28 = vpack.c.bf16 %v1975_v14, %v1975_v14  ;;  %v1910_v31 = vpack.c.bf16 %v2872_v43, %v2871_v42 }
 0x378   :  { %v1980_v53 = vpack.c.bf16 %v2875_v52, %v2874_v51 }
 0x379   :  { %v1987_v50 = vand.u32 %v1981_v28, %v3931_v32 }
 0x37a   :  { %2864 = vmatmul.mubr.msk.bf16.vlgmr.msra.gmra.mxu0 %vm1448_vm1, %v1700_v8 }
 0x37b   :  { %1867 = vmatpush1.bf16.msra.mxu0 %v1847_v39  ;;  %1884 = vmatprep.mubr.bf16.mxu0 %v3254_v6 }
 0x37c   :  { %2867 = vmatmul.mubr.msk.bf16.vlgmr.msra.gmra.mxu1 %vm1448_vm1, %v1770_v27  ;;  %2006 = vmatprep.subr.bf16.mxu0 %v1990_v21 }
 0x37d   :  { %1937 = vmatpush1.bf16.msra.mxu1 %v1917_v35  ;;  %1954 = vmatprep.mubr.bf16.mxu1 %v3254_v6 }
 0x382   :  { %2870 = vmatmul.mubr.msk.bf16.vlgmr.msra.gmra.mxu0 %vm1448_vm1, %v1840_v49 }
 0x383   :  { %2007 = vmatpush1.bf16.msra.mxu0 %v1987_v50  ;;  %2024 = vmatprep.mubr.bf16.mxu0 %v3254_v6 }
 0x384   :  { %2873 = vmatmul.mubr.msk.bf16.vlgmr.msra.gmra.mxu1 %vm1448_vm1, %v1910_v31 }
 0x385   :  { %2137 = vmatprep.mubr.bf16.mxu1 %v3254_v6 }
 0x38a   :  { %2876 = vmatmul.mubr.msk.bf16.vlgmr.msra.gmra.mxu0 %vm1448_vm1, %v1980_v53  ;;  %vm4439_vm1 = vcmp.lt.s32.totalorder %v3377_v12, 16 }
 0x38b   :  { %2183 = vmatprep.mubr.bf16.mxu0 %v3254_v6  ;;  %vm4440_vm6 = vmmov %vm4439_vm1 }
 0x38c   :  { %vm4441_vm15 = vmmov %vm4439_vm1 }
 0x38d   :  { %vm4442_vm2 = vmmov %vm4439_vm1 }
 0x42a   :  { %v1496_v32 = vpop.f32.mrf.mxu0 }
 0x42c   :  { %v1548_v22 = vpop.f32.mrf.mxu1  ;;  %v1498_v23 = vpop.f32.mrf.mxu0 }
 0x42d   :  { %v1549_v59 = vadd.f32 %v1548_v22, %v1496_v32 }
 0x42e   :  { %v1550_v33 = vpop.f32.mrf.mxu1  ;;  %v1500_v34 = vpop.f32.mrf.mxu0 }
 0x42f   :  { %v1551_v0 = vadd.f32 %v1550_v33, %v1498_v23 }
 0x430   :  { %v1552_v44 = vpop.f32.mrf.mxu1  ;;  %v1502_v30 = vpop.f32.mrf.mxu0 }
 0x431   :  { %v1553_v46 = vadd.f32 %v1552_v44, %v1500_v34 }
 0x432   :  { %v1554_v45 = vpop.f32.mrf.mxu1  ;;  %v1614_v16 = vpop.f32.mrf.mxu0 }
 0x433   :  { %v1623_v24 = vadd.f32 %v1614_v16, %v1549_v59  ;;  %v1555_v18 = vadd.f32 %v1554_v45, %v1502_v30 }
 0x434   :  { %v1684_v55 = vpop.f32.mrf.mxu1  ;;  %v1616_v56 = vpop.f32.mrf.mxu0 }
 0x435   :  { %v1624_v17 = vadd.f32 %v1616_v56, %v1551_v0  ;;  %v1693_v13 = vadd.f32 %v1684_v55, %v1623_v24  ;;  %v2049_v0 = vpop.permute.xlu1 %2048 }
 0x436   :  { %v1686_v57 = vpop.f32.mrf.mxu1  ;;  %v1618_v58 = vpop.f32.mrf.mxu0 }
 0x437   :  { %v1625_v29 = vadd.f32 %v1618_v58, %v1553_v46  ;;  %v1694_v2 = vadd.f32 %v1686_v57, %v1624_v17  ;;  %v2044_v57 = vpop.permute.xlu0 %2043 }
 0x438   :  { %v1688_v60 = vpop.f32.mrf.mxu1  ;;  %v1620_v63 = vpop.f32.mrf.mxu0 }
 0x439   :  { %v1626_v3 = vadd.f32 %v1620_v63, %v1555_v18  ;;  %v1695_v10 = vadd.f32 %v1688_v60, %v1625_v29 }
 0x43a   :  { %v1690_v38 = vpop.f32.mrf.mxu1  ;;  %v1746_v48 = vpop.f32.mrf.mxu0 }
 0x43b   :  { %v1755_v15 = vadd.f32 %v1746_v48, %v1693_v13  ;;  %v1696_v14 = vadd.f32 %v1690_v38, %v1626_v3 }
 0x43c   :  { %v1816_v5 = vpop.f32.mrf.mxu1  ;;  %v1748_v1 = vpop.f32.mrf.mxu0 }
 0x43d   :  { %v1756_v26 = vadd.f32 %v1748_v1, %v1694_v2  ;;  %v1825_v21 = vadd.f32 %v1816_v5, %v1755_v15  ;;  %v2683_v2 = vld [vmem:[%s4340_s8 + $0x8] sm:$0xff] }
 0x43e   :  { %v1818_v19 = vpop.f32.mrf.mxu1  ;;  %v1750_v4 = vpop.f32.mrf.mxu0 }
 0x43f   :  { %v1757_v35 = vadd.f32 %v1750_v4, %v1695_v10  ;;  %v1826_v28 = vadd.f32 %v1818_v19, %v1756_v26  ;;  %v2682_v4 = vld [vmem:[%s4340_s8] sm:$0xff] }
 0x440   :  { %v1820_v8 = vpop.f32.mrf.mxu1  ;;  %v1752_v9 = vpop.f32.mrf.mxu0 }
 0x441   :  { %v1758_v42 = vadd.f32 %v1752_v9, %v1696_v14  ;;  %v1827_v50 = vadd.f32 %v1820_v8, %v1757_v35  ;;  %v2878_v35 = vld [vmem:[%s4341_s7 + $0x18] sm:$0xff] }
 0x442   :  { %v1822_v27 = vpop.f32.mrf.mxu1  ;;  %v1886_v39 = vpop.f32.mrf.mxu0 }
 0x443   :  { %v1895_v43 = vadd.f32 %v1886_v39, %v1825_v21  ;;  %v1828_v32 = vadd.f32 %v1822_v27, %v1758_v42  ;;  %v2877_v21 = vld [vmem:[%s4341_s7 + $0x10] sm:$0xff] }
 0x444   :  { %v1956_v37 = vpop.f32.mrf.mxu1  ;;  %v1888_v40 = vpop.f32.mrf.mxu0 }
 0x445   :  { %v1896_v51 = vadd.f32 %v1888_v40, %v1826_v28  ;;  %v1965_v22 = vadd.f32 %v1956_v37, %v1895_v43 }
 0x446   :  { %v1958_v49 = vpop.f32.mrf.mxu1  ;;  %v1890_v31 = vpop.f32.mrf.mxu0 }
 0x447   :  { %v1897_v23 = vadd.f32 %v1890_v31, %v1827_v50  ;;  %v1966_v34 = vadd.f32 %v1958_v49, %v1896_v51 }
 0x448   :  { %v1960_v52 = vpop.f32.mrf.mxu1  ;;  %v1892_v53 = vpop.f32.mrf.mxu0 }
 0x449   :  { %v1898_v44 = vadd.f32 %v1892_v53, %v1828_v32  ;;  %v1967_v55 = vadd.f32 %v1960_v52, %v1897_v23  ;;  %v2099_v53 = vpack.c.bf16 %v2878_v35, %v2877_v21 }
 0x44a   :  { %v2026_v33 = vpop.f32.mrf.mxu0  ;;  %v1962_v45 = vpop.f32.mrf.mxu1 }
 0x44b   :  { %v2035_v30 = vadd.f32 %v2026_v33, %v1965_v22  ;;  %v1968_v59 = vadd.f32 %v1962_v45, %v1898_v44  ;;  %v2076_v44 = vld [vmem:[%s4341_s7 + $0x8] sm:$0xff] }
 0x44c   :  { %v2028_v16 = vpop.f32.mrf.mxu0 }
 0x44d   :  { %v2036_v56 = vadd.f32 %v2028_v16, %v1966_v34  ;;  %v2051_v60 = vadd.f32 %v2044_v57, %v2035_v30  ;;  %v2075_v34 = vld [vmem:[%s4341_s7] sm:$0xff] }
 0x44e   :  { %v2030_v58 = vpop.f32.mrf.mxu0 }
 0x44f   :  { %v2037_v63 = vadd.f32 %v2030_v58, %v1967_v55  ;;  %v2052_v38 = vadd.f32 %v2044_v57, %v2036_v56  ;;  %v4107_v17 = vmax.f32 %v2051_v60, 0.0  ;;  %v2077_v60 = vpack.c.bf16 %v2076_v44, %v2075_v34 }
 0x450   :  { %v2032_v24 = vpop.f32.mrf.mxu0 }
 0x451   :  { %v2053_v48 = vadd.f32 %v2049_v0, %v2037_v63  ;;  %v2038_v46 = vadd.f32 %v2032_v24, %v1968_v59  ;;  %v4111_v18 = vmax.f32 %v2052_v38, 0.0  ;;  %v2890_v38 = vld [vmem:[%s4341_s7 + $0x20] sm:$0xff] }
 0x453   :  { %v4109_v5 = vmax.f32 %v2053_v48, 0.0  ;;  %v2054_v1 = vadd.f32 %v2049_v0, %v2038_v46  ;;  %v2891_v48 = vld [vmem:[%s4341_s7 + $0x28] sm:$0xff] }
 0x455   :  { %v4113_v13 = vmax.f32 %v2054_v1, 0.0  ;;  %v3167_v29 = vpack.i.bf16 %v4109_v5, %v4107_v17 }
 0x457   :  { %3168 = vrot.lane.b32.xlu0 %v3167_v29, %s3252_s26  ;;  %v3182_v19 = vpack.i.bf16 %v4113_v13, %v4111_v18 }
 0x459   :  { %3183 = vrot.lane.b32.xlu1 %v3182_v19, %s3252_s26 }
 0x45b   :  { %3173 = vrot.lane.b32.xlu0 %v3167_v29, %s3251_s25 }
 0x45d   :  { %3188 = vrot.lane.b32.xlu1 %v3182_v19, %s3251_s25 }
 0x45f   :  { %3178 = vrot.lane.b32.xlu0 %v3167_v29, %s3253_s27 }
 0x461   :  { %3193 = vrot.lane.b32.xlu1 %v3182_v19, %s3253_s27 }
 0x463   :  { %3198 = vrot.lane.b32.xlu0 %v3167_v29, %s3255_s0 }
 0x465   :  { %3203 = vrot.lane.b32.xlu1 %v3182_v19, %s3255_s0 }
 0x467   :  { %3208 = vrot.lane.b32.xlu0 %v3167_v29, %s3256_s28 }
 0x469   :  { %3228 = vrot.lane.b32.xlu1 %v3182_v19, %s3256_s28 }
 0x46b   :  { %3213 = vrot.lane.b32.xlu0 %v3167_v29, %s3257_s29 }
 0x46d   :  { %3233 = vrot.lane.b32.xlu1 %v3182_v19, %s3257_s29 }
 0x46f   :  { %3218 = vrot.lane.b32.xlu0 %v3167_v29, %s3258_s30 }
 0x471   :  { %3238 = vrot.lane.b32.xlu1 %v3182_v19, %s3258_s30 }
 0x473   :  { %3223 = vrot.lane.b32.xlu0 %v3167_v29, %s3259_s12 }
 0x475   :  { %3243 = vrot.lane.b32.xlu1 %v3182_v19, %s3259_s12 }
 0x477   :  { %2686 = vperm.xlu0 %3045, %v2682_v4  }
 0x479   :  { %2691 = vperm.xlu1 %3046, %v2683_v2  }
 0x4c9   :  { %v3169_v3 = vpop.permute.xlu0 %3168 }
 0x4ca   :  { %v3171_v8 = vunpack.i.h.bf16 %v3169_v3  ;;  %v3170_v9 = vunpack.i.l.bf16 %v3169_v3 }
 0x4cb   :  { %v3184_v15 = vpop.permute.xlu1 %3183 }
 0x4cc   :  { %v3186_v10 = vunpack.i.h.bf16 %v3184_v15  ;;  %v3185_v26 = vunpack.i.l.bf16 %v3184_v15 }
 0x4cd   :  { %v3174_v27 = vpop.permute.xlu0 %3173 }
 0x4ce   :  { %v2090_v39 = vsel %vm4439_vm1, %v3185_v26, %v3170_v9  ;;  %v2091_v14 = vsel %vm4440_vm6, %v3186_v10, %v3171_v8  ;;  %v3176_v40 = vunpack.i.h.bf16 %v3174_v27  ;;  %v2088_v42 = vsel %vm4441_vm15, %v3170_v9, %v3185_v26  ;;  %vm4446_vm1 = vmmov %vm4444_vm5 }
 0x4cf   :  { %v2880_v37 = vpack.c.bf16 %v2091_v14, %v2090_v39  ;;  %v3189_v28 = vpop.permute.xlu1 %3188  ;;  %v2089_v43 = vsel %vm4442_vm2, %v3171_v8, %v3186_v10  ;;  %v3175_v49 = vunpack.i.l.bf16 %v3174_v27  ;;  %vm4447_vm6 = vnez %v4384_v54  ;;  %v2899_v39 = vld [vmem:[%s4341_s7 + $0x30] sm:$0xff]  ;;  %v2900_v14 = vld [vmem:[%s4341_s7 + $0x38] sm:$0xff] }
 0x4d0   :  { %v3191_v31 = vunpack.i.h.bf16 %v3189_v28  ;;  %v3190_v50 = vunpack.i.l.bf16 %v3189_v28  ;;  %v2101_v51 = vpack.c.bf16 %v2089_v43, %v2088_v42  ;;  %vm4448_vm15 = vnez %v4386_v62  ;;  %v2908_v62 = vld [vmem:[%s4341_s7 + $0x40] sm:$0xff] }
 0x4d1   :  { %v3179_v52 = vpop.permute.xlu0 %3178  ;;  %vm4449_vm2 = vcmp.lt.s32.totalorder %v3377_v12, 15  ;;  %v2343_v8 = vpack.c.bf16 %v4113_v13, %v4111_v18  ;;  %v2213_v9 = vpack.c.bf16 %v2891_v48, %v2890_v38 }
 0x4d2   :  { %v2067_v32 = vsel %vm4443_vm9, %v3175_v49, %v3190_v50  ;;  %v2068_v22 = vsel %vm4444_vm5, %v3176_v40, %v3191_v31  ;;  %v2069_v23 = vsel %vm4445_vm11, %v3190_v50, %v3175_v49  ;;  %v2070_v33 = vsel %vm4446_vm1, %v3191_v31, %v3176_v40  ;;  %2119 = vmatprep.subr.bf16.mxu1 %v2101_v51  ;;  %vm4450_vm9 = vmmov %vm4449_vm2 }
 0x4d3   :  { %v2884_v30 = vpack.c.bf16 %v2068_v22, %v2067_v32  ;;  %v2887_v45 = vpack.c.bf16 %v2070_v33, %v2069_v23  ;;  %2881 = vmatpush1.bf16.msk.msra.mxu1 %vm4447_vm6, %v2880_v37  ;;  %v3194_v16 = vpop.permute.xlu1 %3193  ;;  %v3181_v55 = vunpack.i.h.bf16 %v3179_v52  ;;  %v3180_v56 = vunpack.i.l.bf16 %v3179_v52  ;;  %vm4451_vm5 = vmmov %vm4449_vm2  ;;  %v2909_v32 = vld [vmem:[%s4341_s7 + $0x48] sm:$0xff] }
 0x4d4   :  { %v3196_v57 = vunpack.i.h.bf16 %v3194_v16  ;;  %v3195_v58 = vunpack.i.l.bf16 %v3194_v16  ;;  %vm4452_vm11 = vmmov %vm4449_vm2  ;;  %vm4453_vm1 = vcmask 130048   ;;  %v2342_v31 = vpack.c.bf16 %v4109_v5, %v4107_v17 }
 0x4d5   :  { %v3199_v59 = vpop.permute.xlu0 %3198  ;;  %2885 = vmatprep.subr.msk.bf16.mxu0 %vm4448_vm15, %v2884_v30  ;;  %vm4454_vm6 = vmpackc.low %vm3514_vm14, %vm3514_vm14  ;;  %v2285_v50 = vpack.c.bf16 %v2900_v14, %v2899_v39 }
 0x4d6   :  { %v2202_v63 = vsel %vm4449_vm2, %v3180_v56, %v3195_v58  ;;  %v2203_v0 = vsel %vm4450_vm9, %v3181_v55, %v3196_v57  ;;  %v2204_v54 = vsel %vm4451_vm5, %v3195_v58, %v3180_v56  ;;  %v2205_v24 = vsel %vm4452_vm11, %v3196_v57, %v3181_v55  ;;  %2882 = vmatmul.mubr.msk.bf16.vlgmr.msra.gmra.mxu1 %vm4453_vm1, %v2099_v53 }
 0x4d7   :  { %v2893_v46 = vpack.c.bf16 %v2203_v0, %v2202_v63  ;;  %v2896_v1 = vpack.c.bf16 %v2205_v24, %v2204_v54  ;;  %2888 = vmatpush1.bf16.msk.msra.mxu0 %vm4454_vm6, %v2887_v45  ;;  %v3204_v29 = vpop.permute.xlu1 %3203  ;;  %2251 = vmatprep.mubr.bf16.mxu1 %v3254_v6  ;;  %v3201_v19 = vunpack.i.h.bf16 %v3199_v59  ;;  %v3200_v4 = vunpack.i.l.bf16 %v3199_v59  ;;  %vm4460_vm6 = vmpackc.low %vm3485_vm12, %vm3485_vm12 }
 0x4d8   :  { %v3206_v2 = vunpack.i.h.bf16 %v3204_v29  ;;  %v3205_v3 = vunpack.i.l.bf16 %v3204_v29  ;;  %vm4455_vm2 = vnez %v4388_v7  ;;  %vm4456_vm9 = vcmp.lt.s32.totalorder %v3377_v12, 1  ;;  %v2911_v7 = vld [vmem:[%s4341_s7 + $0x50] sm:$0xff] }
 0x4d9   :  { %v3209_v15 = vpop.permute.xlu0 %3208  ;;  %2894 = vmatprep.subr.msk.bf16.mxu1 %vm4455_vm2, %v2893_v46  ;;  %vm4457_vm14 = vmmov %vm4456_vm9  ;;  %v2341_v55 = vpack.c.bf16 %v2909_v32, %v2908_v62 }
 0x4da   :  { %v2274_v20 = vsel %vm4456_vm9, %v3200_v4, %v3205_v3  ;;  %v2275_v10 = vsel %vm4457_vm14, %v3201_v19, %v3206_v2  ;;  %vm4458_vm5 = vmmov %vm4456_vm9  ;;  %2889 = vmatmul.mubr.msk.bf16.vlgmr.msra.gmra.mxu0 %vm4453_vm1, %v2077_v60  ;;  %2897 = vmatpush1.bf16.msk.msra.mxu1 %vm4460_vm6, %v2896_v1  ;;  %v3211_v40 = vunpack.i.h.bf16 %v3209_v15  ;;  %v3210_v28 = vunpack.i.l.bf16 %v3209_v15  ;;  %v2912_v60 = vld [vmem:[%s4341_s7 + $0x58] sm:$0xff]  ;;  %v2921_v15 = vld [vmem:[%s4341_s7 + $0x68] sm:$0xff] }
 0x4db   :  { %v2276_v26 = vsel %vm4458_vm5, %v3205_v3, %v3200_v4  ;;  %vm4459_vm11 = vmmov %vm4458_vm5  ;;  %v2902_v21 = vpack.c.bf16 %v2275_v10, %v2274_v20  ;;  %v3229_v37 = vpop.permute.xlu1 %3228  ;;  %2323 = vmatprep.mubr.bf16.mxu0 %v3254_v6  ;;  %2361 = vmatprep.subr.bf16.mxu1 %v2343_v8  ;;  %vm4461_vm9 = vcmp.lt.s32.totalorder %v3377_v12, 127  ;;  %v2413_v29 = vpack.c.bf16 %v2912_v60, %v2911_v7 }
 0x4dc   :  { %v2277_v27 = vsel %vm4459_vm11, %v3206_v2, %v3201_v19  ;;  %v3231_v42 = vunpack.i.h.bf16 %v3229_v37  ;;  %v3230_v43 = vunpack.i.l.bf16 %v3229_v37  ;;  %vm4462_vm12 = vmmov %vm4461_vm9  ;;  %v2485_v14 = vpack.c.bf16 %v2921_v15, %v2920_v41 }
 0x4dd   :  { %v2905_v35 = vpack.c.bf16 %v2277_v27, %v2276_v26  ;;  %v3214_v49 = vpop.permute.xlu0 %3213  ;;  %2903 = vmatprep.subr.msk.bf16.mxu0 %vm4448_vm15, %v2902_v21  ;;  %vm4463_vm14 = vmmov %vm4461_vm9  ;;  %vm4466_vm15 = vcmp.lt.s32.totalorder %v3377_v12, 113 }
 0x4de   :  { %v2402_v61 = vsel %vm4461_vm9, %v3210_v28, %v3230_v43  ;;  %v2403_v51 = vsel %vm4462_vm12, %v3211_v40, %v3231_v42  ;;  %v2404_v52 = vsel %vm4463_vm14, %v3230_v43, %v3210_v28  ;;  %vm4464_vm5 = vmmov %vm4461_vm9  ;;  %v3216_v34 = vunpack.i.h.bf16 %v3214_v49  ;;  %v2935_v43 = vld [vmem:[%s4341_s7 + $0x80] sm:$0xff] }
 0x4df   :  { %v2405_v53 = vsel %vm4464_vm5, %v3231_v42, %v3211_v40  ;;  %vm4465_vm11 = vmmov %vm4453_vm1  ;;  %v2917_v23 = vpack.c.bf16 %v2403_v51, %v2402_v61  ;;  %2906 = vmatpush1.bf16.msk.msra.mxu0 %vm3820_vm7, %v2905_v35  ;;  %v3234_v33 = vpop.permute.xlu1 %3233  ;;  %v3215_v44 = vunpack.i.l.bf16 %v3214_v49  ;;  %v2930_v42 = vld [vmem:[%s4341_s7 + $0x78] sm:$0xff]  ;;  %v2936_v49 = vld [vmem:[%s4341_s7 + $0x88] sm:$0xff] }
 0x4e0   :  { %2898 = vmatmul.mubr.msk.bf16.vlgmr.msra.gmra.mxu1 %vm4465_vm11, %v2213_v9  ;;  %v2914_v22 = vpack.c.bf16 %v2405_v53, %v2404_v52  ;;  %v3236_v30 = vunpack.i.h.bf16 %v3234_v33  ;;  %v3235_v45 = vunpack.i.l.bf16 %v3234_v33  ;;  %vm4467_vm1 = vmmov %vm4466_vm15  ;;  %v2629_v11 = vpack.c.bf16 %v2936_v49, %v2935_v43 }
 0x4e1   :  { %2362 = vmatpush1.bf16.msra.mxu1 %v2342_v31  ;;  %2379 = vmatprep.mubr.bf16.mxu1 %v3254_v6  ;;  %v3219_v16 = vpop.permute.xlu0 %3218  ;;  %vm4468_vm6 = vmmov %vm4467_vm1 }
 0x4e2   :  { %2915 = vmatprep.subr.msk.bf16.mxu0 %vm4455_vm2, %v2914_v22  ;;  %v2474_v56 = vsel %vm4466_vm15, %v3215_v44, %v3235_v45  ;;  %v2475_v57 = vsel %vm4467_vm1, %v3216_v34, %v3236_v30  ;;  %v2476_v58 = vsel %vm4468_vm6, %v3235_v45, %v3215_v44  ;;  %vm4469_vm9 = vmmov %vm4467_vm1  ;;  %v3221_v24 = vunpack.i.h.bf16 %v3219_v16 }
 0x4e3   :  { %v2477_v59 = vsel %vm4469_vm9, %v3236_v30, %v3216_v34  ;;  %vm4470_vm12 = vmmov %vm4465_vm11  ;;  %v2926_v0 = vpack.c.bf16 %v2475_v57, %v2474_v56  ;;  %v3239_v54 = vpop.permute.xlu1 %3238  ;;  %v3220_v38 = vunpack.i.l.bf16 %v3219_v16  ;;  %vm4471_vm2 = vcmp.lt.s32.totalorder %v3377_v12, 112 }
 0x4e4   :  { %2907 = vmatmul.mubr.msk.bf16.vlgmr.msra.gmra.mxu0 %vm4470_vm12, %v2285_v50  ;;  %v2923_v63 = vpack.c.bf16 %v2477_v59, %v2476_v58  ;;  %v3241_v48 = vunpack.i.h.bf16 %v3239_v54  ;;  %v3240_v46 = vunpack.i.l.bf16 %v3239_v54  ;;  %vm4472_vm14 = vmmov %vm4471_vm2 }
 0x4e5   :  { %2918 = vmatpush1.bf16.msk.msra.mxu0 %vm3844_vm3, %v2917_v23  ;;  %2451 = vmatprep.mubr.bf16.mxu0 %v3254_v6  ;;  %v3224_v1 = vpop.permute.xlu0 %3223  ;;  %vm4473_vm5 = vmmov %vm4471_vm2 }
 0x4e6   :  { %2924 = vmatprep.subr.msk.bf16.mxu1 %vm2832_vm4, %v2923_v63  ;;  %v2546_v19 = vsel %vm4471_vm2, %v3220_v38, %v3240_v46  ;;  %v2547_v4 = vsel %vm4472_vm14, %v3221_v24, %v3241_v48  ;;  %v2548_v2 = vsel %vm4473_vm5, %v3240_v46, %v3220_v38  ;;  %vm4474_vm11 = vmmov %vm4471_vm2  ;;  %v3226_v10 = vunpack.i.h.bf16 %v3224_v1 }
 0x4e7   :  { %v2549_v3 = vsel %vm4474_vm11, %v3241_v48, %v3221_v24  ;;  %vm4475_vm15 = vmmov %vm4470_vm12  ;;  %v2558_v8 = vpack.c.bf16 %v2547_v4, %v2546_v19  ;;  %v3244_v20 = vpop.permute.xlu1 %3243  ;;  %v3225_v26 = vunpack.i.l.bf16 %v3224_v1  ;;  %vm4476_vm4 = vcmp.lt.s32.totalorder %v3377_v12, 111 }
 0x4e8   :  { %2910 = vmatmul.mubr.msk.bf16.vlgmr.msra.gmra.mxu1 %vm4475_vm15, %v2341_v55  ;;  %v2932_v9 = vpack.c.bf16 %v2549_v3, %v2548_v2  ;;  %v3246_v27 = vunpack.i.h.bf16 %v3244_v20  ;;  %v3245_v39 = vunpack.i.l.bf16 %v3244_v20  ;;  %vm4477_vm8 = vmmov %vm4476_vm4  ;;  %v2557_v12 = vpack.c.bf16 %v2930_v42, %v2929_v36 }
 0x4e9   :  { %2927 = vmatpush1.bf16.msk.msra.mxu1 %vm3820_vm7, %v2926_v0  ;;  %2523 = vmatprep.mubr.bf16.mxu1 %v3254_v6  ;;  %vm4478_vm1 = vmmov %vm4476_vm4 }
 0x4ea   :  { %2933 = vmatprep.subr.msk.bf16.mxu0 %vm3886_vm13, %v2932_v9  ;;  %v2618_v21 = vsel %vm4476_vm4, %v3225_v26, %v3245_v39  ;;  %v2619_v35 = vsel %vm4477_vm8, %v3226_v10, %v3246_v27  ;;  %v2620_v47 = vsel %vm4478_vm1, %v3245_v39, %v3225_v26  ;;  %vm4479_vm7 = vmmov %vm4478_vm1 }
 0x4eb   :  { %v2621_v37 = vsel %vm4479_vm7, %v3246_v27, %v3226_v10  ;;  %vm4480_vm6 = vmmov %vm4470_vm12  ;;  %v2941_v28 = vpack.c.bf16 %v2619_v35, %v2618_v21  ;;  %vm2762_vm12 = vcmask 1024  }
 0x4ec   :  { %2919 = vmatmul.mubr.msk.bf16.vlgmr.msra.gmra.mxu0 %vm4480_vm6, %v2413_v29  ;;  %v2938_v40 = vpack.c.bf16 %v2621_v37, %v2620_v47  ;;  %vm4481_vm13 = vmmov %vm4480_vm6 }
 0x4ed   :  { %2578 = vmatpush1.bf16.msra.mxu0 %v2558_v8  ;;  %2595 = vmatprep.mubr.bf16.mxu0 %v3254_v6  ;;  %vm4482_vm9 = vmmov %vm4480_vm6 }
 0x4ee   :  { %2939 = vmatprep.subr.msk.bf16.mxu1 %vm2845_vm10, %v2938_v40  ;;  %vm4483_vm0 = vmmov %vm4480_vm6 }
 0x4ef   :  { %vm4484_vm10 = vmmov %vm4483_vm0 }
 0x4f0   :  { %2928 = vmatmul.mubr.msk.bf16.vlgmr.msra.gmra.mxu1 %vm4481_vm13, %v2485_v14 }
 0x4f1   :  { %2942 = vmatpush1.bf16.msk.msra.mxu1 %vm3844_vm3, %v2941_v28  ;;  %2667 = vmatprep.mubr.bf16.mxu1 %v3254_v6  ;;  %vm3262_vm3 = vmmov 0  }
 0x4f2   :  { %v2687_v36 = vpop.permute.xlu0 %2686 }
 0x4f4   :  { %2934 = vmatmul.mubr.msk.bf16.vlgmr.msra.gmra.mxu0 %vm4482_vm9, %v2557_v12 }
 0x4f8   :  { %2943 = vmatmul.mubr.msk.bf16.vlgmr.msra.gmra.mxu1 %vm4483_vm0, %v2629_v11 }
 0x596   :  { %v2139_v31 = vpop.f32.mrf.mxu1 }
 0x598   :  { %v2141_v50 = vpop.f32.mrf.mxu1 }
 0x59a   :  { %v2143_v61 = vpop.f32.mrf.mxu1  ;;  %v2185_v25 = vpop.f32.mrf.mxu0 }
 0x59b   :  { %v2186_v55 = vadd.f32 %v2185_v25, %v2139_v31 }
 0x59c   :  { %v2145_v51 = vpop.f32.mrf.mxu1  ;;  %v2187_v52 = vpop.f32.mrf.mxu0 }
 0x59d   :  { %v2188_v58 = vadd.f32 %v2187_v52, %v2141_v50 }
 0x59e   :  { %v2189_v6 = vpop.f32.mrf.mxu0 }
 0x59f   :  { %v2190_v63 = vadd.f32 %v2189_v6, %v2143_v61 }
 0x5a0   :  { %v2253_v53 = vpop.f32.mrf.mxu1  ;;  %v2191_v62 = vpop.f32.mrf.mxu0 }
 0x5a1   :  { %v2262_v59 = vadd.f32 %v2253_v53, %v2186_v55  ;;  %v2192_v48 = vadd.f32 %v2191_v62, %v2145_v51 }
 0x5a2   :  { %v2255_v32 = vpop.f32.mrf.mxu1 }
 0x5a3   :  { %v2263_v0 = vadd.f32 %v2255_v32, %v2188_v58 }
 0x5a4   :  { %v2257_v22 = vpop.f32.mrf.mxu1  ;;  %v2325_v23 = vpop.f32.mrf.mxu0 }
 0x5a5   :  { %v2334_v54 = vadd.f32 %v2325_v23, %v2262_v59  ;;  %v2264_v46 = vadd.f32 %v2257_v22, %v2190_v63  ;;  %v2692_v22 = vpop.permute.xlu1 %2691 }
 0x5a6   :  { %v2259_v33 = vpop.f32.mrf.mxu1  ;;  %v2327_v34 = vpop.f32.mrf.mxu0 }
 0x5a7   :  { %v2335_v1 = vadd.f32 %v2327_v34, %v2263_v0  ;;  %v2265_v2 = vadd.f32 %v2259_v33, %v2192_v48 }
 0x5a8   :  { %v2329_v44 = vpop.f32.mrf.mxu0  ;;  %v2381_v30 = vpop.f32.mrf.mxu1 }
 0x5a9   :  { %v2390_v29 = vadd.f32 %v2381_v30, %v2334_v54  ;;  %v2336_v3 = vadd.f32 %v2329_v44, %v2264_v46 }
 0x5aa   :  { %v2331_v45 = vpop.f32.mrf.mxu0  ;;  %v2383_v16 = vpop.f32.mrf.mxu1 }
 0x5ab   :  { %v2391_v41 = vadd.f32 %v2383_v16, %v2335_v1  ;;  %v2337_v20 = vadd.f32 %v2331_v45, %v2265_v2 }
 0x5ac   :  { %v2385_v56 = vpop.f32.mrf.mxu1  ;;  %v2453_v57 = vpop.f32.mrf.mxu0 }
 0x5ad   :  { %v2462_v15 = vadd.f32 %v2453_v57, %v2390_v29  ;;  %v2392_v10 = vadd.f32 %v2385_v56, %v2336_v3 }
 0x5ae   :  { %v2387_v7 = vpop.f32.mrf.mxu1  ;;  %v2455_v60 = vpop.f32.mrf.mxu0 }
 0x5af   :  { %v2463_v26 = vadd.f32 %v2455_v60, %v2391_v41  ;;  %v2393_v21 = vadd.f32 %v2387_v7, %v2337_v20 }
 0x5b0   :  { %v2457_v24 = vpop.f32.mrf.mxu0  ;;  %v2525_v38 = vpop.f32.mrf.mxu1 }
 0x5b1   :  { %v2534_v27 = vadd.f32 %v2525_v38, %v2462_v15  ;;  %v2464_v35 = vadd.f32 %v2457_v24, %v2392_v10 }
 0x5b2   :  { %v2459_v19 = vpop.f32.mrf.mxu0  ;;  %v2527_v4 = vpop.f32.mrf.mxu1 }
 0x5b3   :  { %v2535_v47 = vadd.f32 %v2527_v4, %v2463_v26  ;;  %v2465_v42 = vadd.f32 %v2459_v19, %v2393_v21 }
 0x5b4   :  { %v2529_v8 = vpop.f32.mrf.mxu1  ;;  %v2597_v9 = vpop.f32.mrf.mxu0 }
 0x5b5   :  { %v2606_v37 = vadd.f32 %v2597_v9, %v2534_v27  ;;  %v2536_v12 = vadd.f32 %v2529_v8, %v2464_v35 }
 0x5b6   :  { %v2531_v39 = vpop.f32.mrf.mxu1  ;;  %v2599_v14 = vpop.f32.mrf.mxu0 }
 0x5b7   :  { %v2607_v43 = vadd.f32 %v2599_v14, %v2535_v47  ;;  %v2537_v50 = vadd.f32 %v2531_v39, %v2465_v42 }
 0x5b8   :  { %v2601_v40 = vpop.f32.mrf.mxu0  ;;  %v2669_v28 = vpop.f32.mrf.mxu1 }
 0x5b9   :  { %v2678_v49 = vadd.f32 %v2669_v28, %v2606_v37  ;;  %v2608_v61 = vadd.f32 %v2601_v40, %v2536_v12 }
 0x5ba   :  { %v2603_v11 = vpop.f32.mrf.mxu0  ;;  %v2671_v31 = vpop.f32.mrf.mxu1 }
 0x5bb   :  { %v2694_v25 = vadd.f32 %v2687_v36, %v2678_v49  ;;  %v2679_v51 = vadd.f32 %v2671_v31, %v2607_v43  ;;  %v2609_v6 = vadd.f32 %v2603_v11, %v2537_v50 }
 0x5bc   :  { %v2673_v52 = vpop.f32.mrf.mxu1 }
 0x5bd   :  { %v2695_v53 = vadd.f32 %v2687_v36, %v2679_v51  ;;  %v2680_v62 = vadd.f32 %v2673_v52, %v2608_v61  ;;  %v2698_v32 = vadd.f32 %v2694_v25, %v4107_v17  ;;  %v3261_v17 = vmov 0.0  }
 0x5be   :  { %v2675_v23 = vpop.f32.mrf.mxu1  ;;  %2947 = vmatprep.subr.bf16.mxu0 %v3261_v17  ;;  %2949 = vmatprep.mubr.msk.bf16.mxu0 %vm3262_vm3, %v3261_v17 }
 0x5bf   :  { %v2696_v33 = vadd.f32 %v2692_v22, %v2680_v62  ;;  %v2681_v34 = vadd.f32 %v2675_v23, %v2609_v6  ;;  %v2699_v44 = vadd.f32 %v2695_v53, %v4111_v18  ;;  %v2702_v45 = vmax.f32 %v2698_v32, 0.0 }
 0x5c1   :  { %v2697_v30 = vadd.f32 %v2692_v22, %v2681_v34  ;;  %v2703_v16 = vmax.f32 %v2699_v44, 0.0  ;;  %v2700_v55 = vadd.f32 %v2696_v33, %v4109_v5  ;;  %v2715_v5 = vld [vmem:[%s4342_s9] sm:$0x3] }
 0x5c2   :  { %v2716_v24 = vpack.c.bf16 %v2715_v5, %v2715_v5 }
 0x5c3   :  { %v2706_v56 = vadd.f32 %v2703_v16, %v2702_v45  ;;  %v2701_v57 = vadd.f32 %v2697_v30, %v4113_v13  ;;  %v2704_v58 = vmax.f32 %v2700_v55, 0.0  ;;  %v2718_v13 = vld [vmem:[%s4343_s10] sm:$0x3] }
 0x5c5   :  { %2707 = vadd.xlane.f32.xlu0 %v2706_v56  ;;  %v2705_v59 = vmax.f32 %v2701_v57, 0.0 }
 0x5c7   :  { %v2709_v7 = vadd.f32 %v2705_v59, %v2704_v58 }
 0x5c9   :  { %2710 = vadd.xlane.f32.xlu1 %v2709_v7 }
 0x64e   :  { %v2708_v60 = vpop.xlane.xlu0 %2707 }
 0x64f   :  { %v2713_v18 = vmul.f32 0.00390625, %v2708_v60 }
 0x652   :  { %v2711_v63 = vpop.xlane.xlu1 %2710 }
 0x653   :  { %v2714_v0 = vmul.f32 0.00390625, %v2711_v63 }
 0x655   :  { %v2717_v54 = vpack.c.bf16 %v2714_v0, %v2713_v18 }
 0x657   :  { %2948 = vmatpush3.bf16.msra.mxu0 %v2717_v54 }
 0x65a   :  { %2950 = vmatmul.mubr.msk.bf16.vlgmr.msra.gmra.mxu0 %vm4484_vm10, %v2716_v24 }
 0x71a   :  { %v2756_v38 = vpop.f32.mrf.mxu0 }
 0x71b   :  { %v2757_v48 = vadd.f32 %v2756_v38, %v2718_v13 }
 0x71c   :  { %v2951_v46 = vpop.f32.mrf.mxu0 }
 0x71d   :  { %2763 = vst.msk [vmem:[%s4344_s11] sm:$0x3] %vm2762_vm12, %v2757_v48 }
 0x71e   :  { %v2759_v1 = vpop.f32.mrf.mxu0 }
 0x720   :  { %v2952_v29 = vpop.f32.mrf.mxu0 }

</bundles_post_ra>
